<compile_context>
chip_gen: v6e
topology: v6e:2x2x1
jax: 0.10.0
libtpu: 0.0.40
codegen_flags: <defaults>
</compile_context>

<pallas_src>
import jax
import jax.numpy as jnp
from jax.experimental import pallas as pl
from jax.experimental.pallas import tpu as pltpu

LN_EPS = 1e-5  # torch.nn.LayerNorm default


def _ffn_kernel(x_ref, w1_ref, b1_ref, w2_ref, b2_ref, gamma_ref, beta_ref, o_ref):
    x = x_ref[...]                                              # (tm, d_in), native dtype (bf16/f32)

    # Conv1d(d_in -> d_hid, k=1)  ==  x @ W1 + b1   (MXU, f32 accumulation)
    h = jnp.dot(x, w1_ref[...], preferred_element_type=jnp.float32)
    h = jnp.maximum(h + b1_ref[...], 0.0)                       # bias + ReLU in f32

    # Conv1d(d_hid -> d_in, k=1)  ==  h @ W2 + b2   (operands back in weight dtype for the MXU)
    y = jnp.dot(h.astype(w2_ref.dtype), w2_ref[...], preferred_element_type=jnp.float32)
    y = y + b2_ref[...] + x.astype(jnp.float32)                 # bias + residual in f32

    # LayerNorm over d_in (biased variance, eps inside rsqrt), all in f32.
    mean = jnp.mean(y, axis=-1, keepdims=True)
    centered = y - mean
    var = jnp.mean(centered * centered, axis=-1, keepdims=True)
    inv = jax.lax.rsqrt(var + LN_EPS)
    o_ref[...] = (centered * inv * gamma_ref[...] + beta_ref[...]).astype(o_ref.dtype)


def positionwise_feed_forward(x, w1, b1, w2, b2, gamma, beta, *, tm=None):
    """x: (B, L, d_in). w1: (d_in, d_hid); w2: (d_hid, d_in); b1: (d_hid,); b2/gamma/beta: (d_in,)."""
    B, L, d_in = x.shape
    d_hid = w1.shape[1]
    assert w1.shape == (d_in, d_hid) and w2.shape == (d_hid, d_in)
    # Lane-dense requirement: full 128-lane vregs for loads, stores and the LayerNorm reduction.
    assert d_in % 128 == 0 and d_hid % 128 == 0, "d_in and d_hid must be multiples of 128"
    # TODO(synk): non-multiple-of-128 d_in would need a padded + masked LayerNorm; not implemented.

    M = B * L
    if tm is None:
        tm = 512
        # Keep at least 2 grid steps where M permits so the parallel axis shards across
        # both v7x TensorCores (and the pipeline has something to overlap).
        while tm > 8 and M < 2 * tm:
            tm //= 2
    grid_m = pl.cdiv(M, tm)
    m_pad = grid_m * tm

    x2 = x.reshape(M, d_in)
    if m_pad != M:
        x2 = jnp.pad(x2, ((0, m_pad - M), (0, 0)))              # zero rows, sliced off after

    f32 = jnp.float32
    b1r = b1.reshape(1, d_hid).astype(f32)                      # small vectors stay f32 (cheap)
    b2r = b2.reshape(1, d_in).astype(f32)
    gr = gamma.reshape(1, d_in).astype(f32)
    br = beta.reshape(1, d_in).astype(f32)

    def _resident_spec(shape, single_buffer):
        # Constant index_map -> block never changes; single-buffer it when supported.
        if single_buffer:
            return pl.BlockSpec(shape, lambda i: (0, 0), pipeline_mode=pl.Buffered(1))
        return pl.BlockSpec(shape, lambda i: (0, 0))

    def _run(single_buffer):
        call = pl.pallas_call(
            _ffn_kernel,
            out_shape=jax.ShapeDtypeStruct((m_pad, d_in), x.dtype),
            grid_spec=pltpu.PrefetchScalarGridSpec(
                num_scalar_prefetch=0,
                grid=(grid_m,),
                in_specs=[
                    pl.BlockSpec((tm, d_in), lambda i: (i, 0)),        # x rows (pipelined)
                    _resident_spec((d_in, d_hid), single_buffer),      # W1 (resident)
                    _resident_spec((1, d_hid), single_buffer),         # b1
                    _resident_spec((d_hid, d_in), single_buffer),      # W2 (resident)
                    _resident_spec((1, d_in), single_buffer),          # b2
                    _resident_spec((1, d_in), single_buffer),          # gamma
                    _resident_spec((1, d_in), single_buffer),          # beta
                ],
                out_specs=pl.BlockSpec((tm, d_in), lambda i: (i, 0)),
            ),
            compiler_params=pltpu.CompilerParams(
                dimension_semantics=("parallel",),
                # Explicit scoped-VMEM limit so larger tiles are accepted; 48 MiB fits under
                # v7x's 64 MiB physical VMEM with headroom (v5e/v6e have 128 MiB).
                vmem_limit_bytes=48 * 1024 * 1024,
            ),
        )
        return call(x2, w1, b1r, w2, b2r, gr, br)

    if hasattr(pl, "Buffered"):
        try:
            out = _run(True)
        except Exception:
            out = _run(False)   # older Pallas: fall back to default double-buffering
    else:
        out = _run(False)

    if m_pad != M:
        out = out[:M]
    return out.reshape(B, L, d_in)


def _reference(x, w1, b1, w2, b2, gamma, beta):
    h = jnp.maximum(jnp.einsum("bld,dh->blh", x, w1) + b1, 0.0)
    y = jnp.einsum("blh,hd->bld", h, w2) + b2 + x
    mean = jnp.mean(y, axis=-1, keepdims=True)
    var = jnp.mean((y - mean) ** 2, axis=-1, keepdims=True)
    return (y - mean) / jnp.sqrt(var + LN_EPS) * gamma + beta


if __name__ == "__main__":
    # Small but lane-dense / MXU-friendly shapes: B*L = 512 rows -> tm=256, grid of 2.
    B, L, d_in, d_hid = 2, 256, 128, 256

    key = jax.random.PRNGKey(0)
    kx, kw1, kb1, kw2, kb2 = jax.random.split(key, 5)

    x = jax.random.normal(kx, (B, L, d_in), dtype=jnp.float32)

    # Deterministic parameter init (Conv1d kernel=1 shapes, stored transposed for matmul).
    bound1 = 1.0 / (d_in ** 0.5)
    w1 = jax.random.uniform(kw1, (d_in, d_hid), jnp.float32, -bound1, bound1)
    b1 = jax.random.uniform(kb1, (d_hid,), jnp.float32, -bound1, bound1)
    bound2 = 1.0 / (d_hid ** 0.5)
    w2 = jax.random.uniform(kw2, (d_hid, d_in), jnp.float32, -bound2, bound2)
    b2 = jax.random.uniform(kb2, (d_in,), jnp.float32, -bound2, bound2)
    gamma = jnp.ones((d_in,), jnp.float32)   # LayerNorm weight init
    beta = jnp.zeros((d_in,), jnp.float32)   # LayerNorm bias init

    # f32 path: tight check against the pure-JAX reference.
    out = jax.block_until_ready(positionwise_feed_forward(x, w1, b1, w2, b2, gamma, beta))
    ref = _reference(x, w1, b1, w2, b2, gamma, beta)
    assert out.shape == (B, L, d_in)
    assert jnp.allclose(out, ref, atol=1e-4, rtol=1e-4), "f32 mismatch vs. reference"

    # bf16 path (production dtype per review): bf16 MXU operands, f32 accumulation + f32 LN tail.
    xb, w1b, w2b = x.astype(jnp.bfloat16), w1.astype(jnp.bfloat16), w2.astype(jnp.bfloat16)
    out_bf16 = jax.block_until_ready(
        positionwise_feed_forward(xb, w1b, b1, w2b, b2, gamma, beta))
    ref_bf16 = _reference(xb.astype(jnp.float32), w1b.astype(jnp.float32), b1,
                          w2b.astype(jnp.float32), b2, gamma, beta)
    assert out_bf16.dtype == jnp.bfloat16 and out_bf16.shape == (B, L, d_in)
    assert jnp.allclose(out_bf16.astype(jnp.float32), ref_bf16, atol=5e-2, rtol=0.0), \
        "bf16 mismatch vs. reference"

    print("KERNEL_OK")
</pallas_src>

<mosaic_0001>
module attributes {stable_mosaic.version = 11 : i64} {
  func.func @_ffn_kernel(%arg0: i32, %arg1: memref<256x128xf32, #tpu.memory_space<vmem>>, %arg2: memref<128x256xf32, #tpu.memory_space<vmem>>, %arg3: memref<1x256xf32, #tpu.memory_space<vmem>>, %arg4: memref<256x128xf32, #tpu.memory_space<vmem>>, %arg5: memref<1x128xf32, #tpu.memory_space<vmem>>, %arg6: memref<1x128xf32, #tpu.memory_space<vmem>>, %arg7: memref<1x128xf32, #tpu.memory_space<vmem>>, %arg8: memref<256x128xf32, #tpu.memory_space<vmem>>) attributes {dimension_semantics = [#tpu.dimension_semantics<parallel>], iteration_bounds = array<i64: 2>, scalar_prefetch = 0 : i64, scratch_operands = 0 : i64, tpu.core_type = #tpu.core_type<tc>, window_params = [{transform_indices = @transform_0, window_bounds = array<i64: 256, 128>}, {pipeline_mode = #tpu.pipeline_mode<synchronous>, transform_indices = @transform_1, window_bounds = array<i64: 128, 256>}, {pipeline_mode = #tpu.pipeline_mode<synchronous>, transform_indices = @transform_2, window_bounds = array<i64: 1, 256>}, {pipeline_mode = #tpu.pipeline_mode<synchronous>, transform_indices = @transform_3, window_bounds = array<i64: 256, 128>}, {pipeline_mode = #tpu.pipeline_mode<synchronous>, transform_indices = @transform_4, window_bounds = array<i64: 1, 128>}, {pipeline_mode = #tpu.pipeline_mode<synchronous>, transform_indices = @transform_5, window_bounds = array<i64: 1, 128>}, {pipeline_mode = #tpu.pipeline_mode<synchronous>, transform_indices = @transform_6, window_bounds = array<i64: 1, 128>}, {transform_indices = @transform_7, window_bounds = array<i64: 256, 128>}]} {
    %c0 = arith.constant 0 : index
    %c0_0 = arith.constant 0 : index
    %0 = vector.load %arg1[%c0, %c0_0] : memref<256x128xf32, #tpu.memory_space<vmem>>, vector<256x128xf32>
    %c0_1 = arith.constant 0 : index
    %c0_2 = arith.constant 0 : index
    %1 = vector.load %arg2[%c0_1, %c0_2] : memref<128x256xf32, #tpu.memory_space<vmem>>, vector<128x256xf32>
    %cst = arith.constant dense<0.000000e+00> : vector<256x256xf32>
    %2 = tpu.matmul %0, %1, %cst {dimension_numbers = #tpu.dot_dimension_numbers<[1], [0], [0], [1], [0, 0, 1, 1], [], []>} : vector<256x128xf32>, vector<128x256xf32>, vector<256x256xf32> -> vector<256x256xf32>
    %c0_3 = arith.constant 0 : index
    %c0_4 = arith.constant 0 : index
    %3 = vector.load %arg3[%c0_3, %c0_4] : memref<1x256xf32, #tpu.memory_space<vmem>>, vector<1x256xf32>
    %4 = vector.broadcast %3 : vector<1x256xf32> to vector<256x256xf32>
    %5 = arith.addf %2, %4 : vector<256x256xf32>
    %cst_5 = arith.constant 0.000000e+00 : f32
    %6 = vector.broadcast %cst_5 : f32 to vector<256x256xf32>
    %7 = arith.maximumf %5, %6 : vector<256x256xf32>
    %c0_6 = arith.constant 0 : index
    %c0_7 = arith.constant 0 : index
    %8 = vector.load %arg4[%c0_6, %c0_7] : memref<256x128xf32, #tpu.memory_space<vmem>>, vector<256x128xf32>
    %cst_8 = arith.constant dense<0.000000e+00> : vector<256x128xf32>
    %9 = tpu.matmul %7, %8, %cst_8 {dimension_numbers = #tpu.dot_dimension_numbers<[1], [0], [0], [1], [0, 0, 1, 1], [], []>} : vector<256x256xf32>, vector<256x128xf32>, vector<256x128xf32> -> vector<256x128xf32>
    %c0_9 = arith.constant 0 : index
    %c0_10 = arith.constant 0 : index
    %10 = vector.load %arg5[%c0_9, %c0_10] : memref<1x128xf32, #tpu.memory_space<vmem>>, vector<1x128xf32>
    %11 = vector.broadcast %10 : vector<1x128xf32> to vector<256x128xf32>
    %12 = arith.addf %9, %11 : vector<256x128xf32>
    %13 = arith.addf %12, %0 : vector<256x128xf32>
    %cst_11 = arith.constant dense<0.000000e+00> : vector<256xf32>
    %14 = vector.multi_reduction <add>, %13, %cst_11 [1] : vector<256x128xf32> to vector<256xf32>
    %15 = vector.shape_cast %14 : vector<256xf32> to vector<256x1xf32>
    %cst_12 = arith.constant 1.280000e+02 : f32
    %16 = vector.broadcast %cst_12 : f32 to vector<256x1xf32>
    %17 = arith.divf %15, %16 : vector<256x1xf32>
    %18 = vector.broadcast %17 : vector<256x1xf32> to vector<256x128xf32>
    %19 = arith.subf %13, %18 : vector<256x128xf32>
    %20 = arith.mulf %19, %19 : vector<256x128xf32>
    %cst_13 = arith.constant dense<0.000000e+00> : vector<256xf32>
    %21 = vector.multi_reduction <add>, %20, %cst_13 [1] : vector<256x128xf32> to vector<256xf32>
    %22 = vector.shape_cast %21 : vector<256xf32> to vector<256x1xf32>
    %cst_14 = arith.constant 1.280000e+02 : f32
    %23 = vector.broadcast %cst_14 : f32 to vector<256x1xf32>
    %24 = arith.divf %22, %23 : vector<256x1xf32>
    %cst_15 = arith.constant 9.99999974E-6 : f32
    %25 = vector.broadcast %cst_15 : f32 to vector<256x1xf32>
    %26 = arith.addf %24, %25 : vector<256x1xf32>
    %27 = math.rsqrt %26 : vector<256x1xf32>
    %28 = vector.broadcast %27 : vector<256x1xf32> to vector<256x128xf32>
    %29 = arith.mulf %19, %28 : vector<256x128xf32>
    %c0_16 = arith.constant 0 : index
    %c0_17 = arith.constant 0 : index
    %30 = vector.load %arg6[%c0_16, %c0_17] : memref<1x128xf32, #tpu.memory_space<vmem>>, vector<1x128xf32>
    %31 = vector.broadcast %30 : vector<1x128xf32> to vector<256x128xf32>
    %32 = arith.mulf %29, %31 : vector<256x128xf32>
    %c0_18 = arith.constant 0 : index
    %c0_19 = arith.constant 0 : index
    %33 = vector.load %arg7[%c0_18, %c0_19] : memref<1x128xf32, #tpu.memory_space<vmem>>, vector<1x128xf32>
    %34 = vector.broadcast %33 : vector<1x128xf32> to vector<256x128xf32>
    %35 = arith.addf %32, %34 : vector<256x128xf32>
    %c0_20 = arith.constant 0 : index
    %c0_21 = arith.constant 0 : index
    %36 = vector.load %arg8[%c0_20, %c0_21] : memref<256x128xf32, #tpu.memory_space<vmem>>, vector<256x128xf32>
    tpu.vector_store %arg8[%c0_20, %c0_21], %35 {strides = array<i32>} : memref<256x128xf32, #tpu.memory_space<vmem>>, vector<256x128xf32>,
    return
  }
  func.func @transform_0(%arg0: i32) -> (i32, i32) {
    %c0_i32 = arith.constant 0 : i32
    %c0_i32_0 = arith.constant 0 : i32
    return %arg0, %c0_i32 : i32, i32
  }
  func.func @transform_1(%arg0: i32) -> (i32, i32) {
    %c0_i32 = arith.constant 0 : i32
    %c0_i32_0 = arith.constant 0 : i32
    %c0_i32_1 = arith.constant 0 : i32
    return %c0_i32, %c0_i32_0 : i32, i32
  }
  func.func @transform_2(%arg0: i32) -> (i32, i32) {
    %c0_i32 = arith.constant 0 : i32
    %c0_i32_0 = arith.constant 0 : i32
    %c0_i32_1 = arith.constant 0 : i32
    return %c0_i32, %c0_i32_0 : i32, i32
  }
  func.func @transform_3(%arg0: i32) -> (i32, i32) {
    %c0_i32 = arith.constant 0 : i32
    %c0_i32_0 = arith.constant 0 : i32
    %c0_i32_1 = arith.constant 0 : i32
    return %c0_i32, %c0_i32_0 : i32, i32
  }
  func.func @transform_4(%arg0: i32) -> (i32, i32) {
    %c0_i32 = arith.constant 0 : i32
    %c0_i32_0 = arith.constant 0 : i32
    %c0_i32_1 = arith.constant 0 : i32
    return %c0_i32, %c0_i32_0 : i32, i32
  }
  func.func @transform_5(%arg0: i32) -> (i32, i32) {
    %c0_i32 = arith.constant 0 : i32
    %c0_i32_0 = arith.constant 0 : i32
    %c0_i32_1 = arith.constant 0 : i32
    return %c0_i32, %c0_i32_0 : i32, i32
  }
  func.func @transform_6(%arg0: i32) -> (i32, i32) {
    %c0_i32 = arith.constant 0 : i32
    %c0_i32_0 = arith.constant 0 : i32
    %c0_i32_1 = arith.constant 0 : i32
    return %c0_i32, %c0_i32_0 : i32, i32
  }
  func.func @transform_7(%arg0: i32) -> (i32, i32) {
    %c0_i32 = arith.constant 0 : i32
    %c0_i32_0 = arith.constant 0 : i32
    return %arg0, %c0_i32 : i32, i32
  }
}

module attributes {stable_mosaic.version = 11 : i64} {
  func.func @_ffn_kernel(%arg0: i32, %arg1: memref<256x128xf32, #tpu.memory_space<vmem>>, %arg2: memref<128x256xf32, #tpu.memory_space<vmem>>, %arg3: memref<1x256xf32, #tpu.memory_space<vmem>>, %arg4: memref<256x128xf32, #tpu.memory_space<vmem>>, %arg5: memref<1x128xf32, #tpu.memory_space<vmem>>, %arg6: memref<1x128xf32, #tpu.memory_space<vmem>>, %arg7: memref<1x128xf32, #tpu.memory_space<vmem>>, %arg8: memref<256x128xf32, #tpu.memory_space<vmem>>) attributes {dimension_semantics = [#tpu.dimension_semantics<parallel>], iteration_bounds = array<i64: 2>, scalar_prefetch = 0 : i64, scratch_operands = 0 : i64, tpu.core_type = #tpu.core_type<tc>, window_params = [{transform_indices = @transform_0, window_bounds = array<i64: 256, 128>}, {pipeline_mode = #tpu.pipeline_mode<synchronous>, transform_indices = @transform_1, window_bounds = array<i64: 128, 256>}, {pipeline_mode = #tpu.pipeline_mode<synchronous>, transform_indices = @transform_2, window_bounds = array<i64: 1, 256>}, {pipeline_mode = #tpu.pipeline_mode<synchronous>, transform_indices = @transform_3, window_bounds = array<i64: 256, 128>}, {pipeline_mode = #tpu.pipeline_mode<synchronous>, transform_indices = @transform_4, window_bounds = array<i64: 1, 128>}, {pipeline_mode = #tpu.pipeline_mode<synchronous>, transform_indices = @transform_5, window_bounds = array<i64: 1, 128>}, {pipeline_mode = #tpu.pipeline_mode<synchronous>, transform_indices = @transform_6, window_bounds = array<i64: 1, 128>}, {transform_indices = @transform_7, window_bounds = array<i64: 256, 128>}]} {
    %c0 = arith.constant 0 : index
    %c0_0 = arith.constant 0 : index
    %0 = vector.load %arg1[%c0, %c0_0] : memref<256x128xf32, #tpu.memory_space<vmem>>, vector<256x128xf32>
    %c0_1 = arith.constant 0 : index
    %c0_2 = arith.constant 0 : index
    %1 = vector.load %arg2[%c0_1, %c0_2] : memref<128x256xf32, #tpu.memory_space<vmem>>, vector<128x256xf32>
    %cst = arith.constant dense<0.000000e+00> : vector<256x256xf32>
    %2 = tpu.matmul %0, %1, %cst {dimension_numbers = #tpu.dot_dimension_numbers<[1], [0], [0], [1], [0, 0, 1, 1], [], []>} : vector<256x128xf32>, vector<128x256xf32>, vector<256x256xf32> -> vector<256x256xf32>
    %c0_3 = arith.constant 0 : index
    %c0_4 = arith.constant 0 : index
    %3 = vector.load %arg3[%c0_3, %c0_4] : memref<1x256xf32, #tpu.memory_space<vmem>>, vector<1x256xf32>
    %4 = vector.broadcast %3 : vector<1x256xf32> to vector<256x256xf32>
    %5 = arith.addf %2, %4 : vector<256x256xf32>
    %cst_5 = arith.constant 0.000000e+00 : f32
    %6 = vector.broadcast %cst_5 : f32 to vector<256x256xf32>
    %7 = arith.maximumf %5, %6 : vector<256x256xf32>
    %c0_6 = arith.constant 0 : index
    %c0_7 = arith.constant 0 : index
    %8 = vector.load %arg4[%c0_6, %c0_7] : memref<256x128xf32, #tpu.memory_space<vmem>>, vector<256x128xf32>
    %cst_8 = arith.constant dense<0.000000e+00> : vector<256x128xf32>
    %9 = tpu.matmul %7, %8, %cst_8 {dimension_numbers = #tpu.dot_dimension_numbers<[1], [0], [0], [1], [0, 0, 1, 1], [], []>} : vector<256x256xf32>, vector<256x128xf32>, vector<256x128xf32> -> vector<256x128xf32>
    %c0_9 = arith.constant 0 : index
    %c0_10 = arith.constant 0 : index
    %10 = vector.load %arg5[%c0_9, %c0_10] : memref<1x128xf32, #tpu.memory_space<vmem>>, vector<1x128xf32>
    %11 = vector.broadcast %10 : vector<1x128xf32> to vector<256x128xf32>
    %12 = arith.addf %9, %11 : vector<256x128xf32>
    %13 = arith.addf %12, %0 : vector<256x128xf32>
    %cst_11 = arith.constant dense<0.000000e+00> : vector<256xf32>
    %14 = vector.multi_reduction <add>, %13, %cst_11 [1] : vector<256x128xf32> to vector<256xf32>
    %15 = vector.shape_cast %14 : vector<256xf32> to vector<256x1xf32>
    %cst_12 = arith.constant 1.280000e+02 : f32
    %16 = vector.broadcast %cst_12 : f32 to vector<256x1xf32>
    %17 = arith.divf %15, %16 : vector<256x1xf32>
    %18 = vector.broadcast %17 : vector<256x1xf32> to vector<256x128xf32>
    %19 = arith.subf %13, %18 : vector<256x128xf32>
    %20 = arith.mulf %19, %19 : vector<256x128xf32>
    %cst_13 = arith.constant dense<0.000000e+00> : vector<256xf32>
    %21 = vector.multi_reduction <add>, %20, %cst_13 [1] : vector<256x128xf32> to vector<256xf32>
    %22 = vector.shape_cast %21 : vector<256xf32> to vector<256x1xf32>
    %cst_14 = arith.constant 1.280000e+02 : f32
    %23 = vector.broadcast %cst_14 : f32 to vector<256x1xf32>
    %24 = arith.divf %22, %23 : vector<256x1xf32>
    %cst_15 = arith.constant 9.99999974E-6 : f32
    %25 = vector.broadcast %cst_15 : f32 to vector<256x1xf32>
    %26 = arith.addf %24, %25 : vector<256x1xf32>
    %27 = math.rsqrt %26 : vector<256x1xf32>
    %28 = vector.broadcast %27 : vector<256x1xf32> to vector<256x128xf32>
    %29 = arith.mulf %19, %28 : vector<256x128xf32>
    %c0_16 = arith.constant 0 : index
    %c0_17 = arith.constant 0 : index
    %30 = vector.load %arg6[%c0_16, %c0_17] : memref<1x128xf32, #tpu.memory_space<vmem>>, vector<1x128xf32>
    %31 = vector.broadcast %30 : vector<1x128xf32> to vector<256x128xf32>
    %32 = arith.mulf %29, %31 : vector<256x128xf32>
    %c0_18 = arith.constant 0 : index
    %c0_19 = arith.constant 0 : index
    %33 = vector.load %arg7[%c0_18, %c0_19] : memref<1x128xf32, #tpu.memory_space<vmem>>, vector<1x128xf32>
    %34 = vector.broadcast %33 : vector<1x128xf32> to vector<256x128xf32>
    %35 = arith.addf %32, %34 : vector<256x128xf32>
    %c0_20 = arith.constant 0 : index
    %c0_21 = arith.constant 0 : index
    %36 = vector.load %arg8[%c0_20, %c0_21] : memref<256x128xf32, #tpu.memory_space<vmem>>, vector<256x128xf32>
    tpu.vector_store %arg8[%c0_20, %c0_21], %35 {strides = array<i32>} : memref<256x128xf32, #tpu.memory_space<vmem>>, vector<256x128xf32>,
    return
  }
  func.func @transform_0(%arg0: i32) -> (i32, i32) {
    %c0_i32 = arith.constant 0 : i32
    %c0_i32_0 = arith.constant 0 : i32
    return %arg0, %c0_i32 : i32, i32
  }
  func.func @transform_1(%arg0: i32) -> (i32, i32) {
    %c0_i32 = arith.constant 0 : i32
    %c0_i32_0 = arith.constant 0 : i32
    %c0_i32_1 = arith.constant 0 : i32
    return %c0_i32, %c0_i32_0 : i32, i32
  }
  func.func @transform_2(%arg0: i32) -> (i32, i32) {
    %c0_i32 = arith.constant 0 : i32
    %c0_i32_0 = arith.constant 0 : i32
    %c0_i32_1 = arith.constant 0 : i32
    return %c0_i32, %c0_i32_0 : i32, i32
  }
  func.func @transform_3(%arg0: i32) -> (i32, i32) {
    %c0_i32 = arith.constant 0 : i32
    %c0_i32_0 = arith.constant 0 : i32
    %c0_i32_1 = arith.constant 0 : i32
    return %c0_i32, %c0_i32_0 : i32, i32
  }
  func.func @transform_4(%arg0: i32) -> (i32, i32) {
    %c0_i32 = arith.constant 0 : i32
    %c0_i32_0 = arith.constant 0 : i32
    %c0_i32_1 = arith.constant 0 : i32
    return %c0_i32, %c0_i32_0 : i32, i32
  }
  func.func @transform_5(%arg0: i32) -> (i32, i32) {
    %c0_i32 = arith.constant 0 : i32
    %c0_i32_0 = arith.constant 0 : i32
    %c0_i32_1 = arith.constant 0 : i32
    return %c0_i32, %c0_i32_0 : i32, i32
  }
  func.func @transform_6(%arg0: i32) -> (i32, i32) {
    %c0_i32 = arith.constant 0 : i32
    %c0_i32_0 = arith.constant 0 : i32
    %c0_i32_1 = arith.constant 0 : i32
    return %c0_i32, %c0_i32_0 : i32, i32
  }
  func.func @transform_7(%arg0: i32) -> (i32, i32) {
    %c0_i32 = arith.constant 0 : i32
    %c0_i32_0 = arith.constant 0 : i32
    return %arg0, %c0_i32 : i32, i32
  }
}

</mosaic_0001>

<bundles_post_ra>
// kernel: tpu_custom_call.1
= control target key start
LH: loop header
LB: loop body
LE: loop exit
PB: predicated region body
PF: predicated region fallthrough
CT: control target
= control target key end

     0   :  { %s2977_s0 = inlined_call_operand.hbm [shape: f32[512,128], index: 0, kind: input, shape index: {}]   ;;  %s2978_s1 = inlined_call_operand.hbm [shape: f32[128,256], index: 1, kind: input, shape index: {}]   ;;  %s2979_s2 = inlined_call_operand.vmem [shape: f32[1,256], index: 2, kind: input, shape index: {}]   ;;  %s2980_s3 = inlined_call_operand.hbm [shape: f32[256,128], index: 3, kind: input, shape index: {}]   ;;  %s2981_s4 = inlined_call_operand.vmem [shape: f32[1,128], index: 4, kind: input, shape index: {}]   ;;  %s2982_s5 = inlined_call_operand.vmem [shape: f32[1,128], index: 5, kind: input, shape index: {}]   ;;  %s2983_s6 = inlined_call_operand.vmem [shape: f32[1,128], index: 6, kind: input, shape index: {}]   ;;  %s2984_s7 = inlined_call_operand.hbm [shape: f32[512,128], index: 7, kind: output, shape index: {}]  }
   0x1   :  { %2991 = sst [smem:[#allocation12_spill]] %s2978_s1 }
   0x2   :  { %12 = vsyncpa [#allocation3], 0 }
   0x3   :  { %14 = vsyncpa [#allocation3 + $0x1], 0 }
   0x4   :  { %15 = vsyncpa [#allocation6], 0 }
   0x5   :  { %16 = vsyncpa [#allocation4], 0 }
   0x6   :  { %18 = vsyncpa [#allocation4 + $0x1], 0  ;;  %s2018_s24 = smov 0   ;;  %s2020_s25 = smov 0  }
   0x7   :  { %s2022_s26 = smov 0   ;;  %s2024_s27 = smov 0  }
   0x8 LB: > { %s2039_s28 = sadd.s32 4294967295, %s1965_s27   ;;  %s1590_s29 = sadd.s32 4294967294, %s1965_s27   ;;  %s1965_s27 = sphi %s2024_s27, %s3012_s27   ;;  %s1961_s26 = sphi %s2022_s26, %s3011_s26   ;;  %s1957_s25 = sphi %s2020_s25, %s3010_s25   ;;  %s1953_s24 = sphi %s2018_s24, %s3009_s24  }
   0x9   : > { %p44_p0 = scmp.ne.s32.totalorder %s1957_s25, %s1953_s24  ;;  %p2985_p1 = scmp.eq.s32.totalorder %s2039_s28, 0 }
   0xa   : > { %p200_p3 = scmp.eq.s32.totalorder %s1590_s29, 1  ;;  %p1591_p5 = scmp.ge.s32.totalorder %s1965_s27, 1 }
   0xb   : > { %p2048_p4 = por %p2985_p1, %p44_p0  ;;  %p207_p7 = scmp.lt.s32.totalorder %s1965_s27, 3 }
   0xc   : > { %p2053_p6 = por %p200_p3, %p44_p0  ;;  %s1967_s10 = smov [#allocation5]  }
   0xd   : > { %s2992_s30 = scalar_select %p2048_p4, 1, 0 }
   0xe   : > { %s2993_s8 = scalar_select %p2053_p6, 1, 0 }
   0xf   : > { %p2058_p8 = pnand %p1591_p5, %p207_p7  ;;  %s219_s11 = sshll.u32 %s1967_s10, 4  ;;  %s220_s11 = int_to_ptr.vmem [resolvable:$true] %s219_s11 }
  0x10   : > { %s1968_s13 = smov [#allocation7]   ;;  %s1828_s15 = scalar_lea.vmem %s220_s11, 4096 }
  0x11   : > { %s2994_s9 = scalar_select %p2058_p8, 1, 0 }
  0x12   : > { %p1689_p9 = pneg %p2058_p8  ;;  %s235_s14 = sshll.u32 %s1968_s13, 4  ;;  %s236_s14 = int_to_ptr.vmem [resolvable:$true] %s235_s14 }
  0x13   : > { %p1829_p13 = scmp.ne.s32.totalorder %s220_s11, %s1828_s15  ;;  %p1836_p5 = scmp.lt.s32.totalorder %s220_s11, %s220_s11 }
  0x14   : > { %p2067_p11 = pnand %p1689_p9, %p2985_p1  ;;  %p1837_p7 = scmp.lt.s32.totalorder %s1828_s15, %s1828_s15 }
  0x16   : > { %p1819_p12 = pneg %p2067_p11  ;;  %p1838_p10 = por %p1837_p7, %p1836_p5 }
  0x18   : > { %p1831_p0 = pnand %p1829_p13, %p1819_p12 }
  0x1a   : > { %p1832_p3 = pneg %p1831_p0 }
  0x1c   : > { %p1839_p9 = pnand %p1838_p10, %p1832_p3 }
  0x1e   : > { %1842 = shalt.err (!%p1839_p9)
}
  0x1f   : > { %s1969_s16 = smov 256   ;;  %s1970_s17 = smov 16  }
  0x20   : > { %s2996_s1 = sld [smem:[#allocation12_spill]]  ;;  %s1854_s20 = scalar_lea.vmem %s236_s14, 4096 }
  0x21   : > { %p1855_p1 = scmp.ne.s32.totalorder %s236_s14, %s1854_s20  ;;  %p1862_p2 = scmp.lt.s32.totalorder %s236_s14, %s236_s14 }
  0x22   : > { %p1863_p6 = scmp.lt.s32.totalorder %s1854_s20, %s1854_s20 }
  0x23   : > { %p1857_p13 = pnand %p1855_p1, %p1819_p12 }
  0x24   : > { %p1864_p5 = por %p1863_p6, %p1862_p2 }
  0x25   : > { %p1858_p0 = pneg %p1857_p13 }
  0x26   : > { %1692 = dma.hbm_to_vmem [thread:$0]  (!%p2067_p11), %s2996_s1, 4096, %s220_s11, [#allocation6], %s1969_s16, %s1969_s16, %s1970_s17  }
  0x27   : > { %p1865_p10 = pnand %p1864_p5, %p1858_p0 }
  0x29   : > { %1868 = shalt.err (!%p1865_p10)
}
  0x2a   : > { %s2986_s21 = smov 128   ;;  %s2987_s22 = smov 8  }
  0x2b   : > { %1695 = dma.hbm_to_vmem [thread:$0]  (!%p2067_p11), %s2980_s3, 4096, %s236_s14, [#allocation6], %s2986_s21, %s2986_s21, %s2987_s22  }
  0x2c   : > { %s2093_s10 = sadd.s32 1, %s1965_s27   ;;  %s31_s13 = sadd.s32 1, %s1961_s26 }
  0x2d   : > { %s28_s11 = ssub.s32 %s1965_s27, %s2093_s10  ;;  %p38_p2 = scmp.ne.s32.totalorder %s1961_s26, %s1957_s25 }
  0x2e   : > { %p29_p1 = scmp.eq.s32.totalorder %s28_s11, 0  ;;  %p39_p6 = scmp.eq.s32.totalorder %s1965_s27, 0 }
  0x2f   : > { %p2997_p3 = scmp.eq.s32.totalorder %s2039_s28, 1  ;;  %p1706_p9 = scmp.lt.s32.totalorder %s1965_s27, 2 }
  0x30   : > { %s2102_s15 = scalar_select %p29_p1, %s1961_s26, %s31_s13  }
  0x31   : > { %p40_p12 = por %p39_p6, %p38_p2  ;;  %p2106_p7 = por %p2997_p3, %p38_p2 }
  0x32   : > { %s258_s16 = sand.u32 1, %s1961_s26   ;;  %s1611_s14 = sshll.u32 %s1965_s27, 12 }
  0x33   : > { %s2998_s12 = scalar_select %p2106_p7, 1, 0 }
  0x34   : > { %s1595_s17 = sshll.u32 %s258_s16, 8  ;;  %s2116_s20 = scalar_lea.hbm %s2977_s0, %s1611_s14 }
  0x35   : > { %s262_s23 = scalar_lea.vmem [#allocation2], %s1595_s17  ;;  %p2120_p11 = pnand %p1706_p9, %p40_p12 }
  0x36   : > { %s269_s29 = sshll.u32 %s262_s23, 4  ;;  %s2124_s13 = scalar_lea.sflag [#allocation3], %s258_s16  ;;  %s2118_s29 = int_to_ptr.vmem [resolvable:$true] %s269_s29 }
  0x37   : > { %s1869_s21 = scalar_lea.hbm %s2116_s20, 4096  ;;  %p1871_p0 = pneg %p2120_p11 }
  0x38   : > { %p1870_p13 = scmp.ne.s32.totalorder %s2116_s20, %s1869_s21  ;;  %s1874_s17 = scalar_lea.hbm %s2977_s0, 8192 }
  0x39   : > { %p1875_p1 = scmp.lt.s32.totalorder %s2116_s20, %s2977_s0  ;;  %p1876_p2 = scmp.lt.s32.totalorder %s1874_s17, %s1869_s21 }
  0x3a   : > { %p1872_p5 = pnand %p1871_p0, %p1870_p13 }
  0x3b   : > { %p1877_p6 = por %p1876_p2, %p1875_p1 }
  0x3c   : > { %p1873_p10 = pneg %p1872_p5 }
  0x3e   : > { %p1878_p12 = pnand %p1877_p6, %p1873_p10 }
  0x40   : > { %1881 = shalt.err (!%p1878_p12)
}
  0x41   : > { %s1882_s16 = scalar_lea.vmem %s2118_s29, 4096  ;;  %s1973_s22 = smov [#allocation2]  }
  0x42   : > { %p1883_p3 = scmp.ne.s32.totalorder %s2118_s29, %s1882_s16  ;;  %s1887_s1 = sshll.u32 %s1973_s22, 4  ;;  %s1888_s1 = int_to_ptr.vmem [resolvable:$false] %s1887_s1 }
  0x43   : > { %s1889_s14 = scalar_lea.vmem %s1888_s1, 8192  ;;  %p1890_p5 = scmp.lt.s32.totalorder %s2118_s29, %s1888_s1 }
  0x44   : > { %p1885_p9 = pnand %p1883_p3, %p1871_p0  ;;  %p1891_p7 = scmp.lt.s32.totalorder %s1889_s14, %s1882_s16 }
  0x46   : > { %p1886_p13 = pneg %p1885_p9  ;;  %p1892_p4 = por %p1891_p7, %p1890_p5 }
  0x48   : > { %p1893_p8 = pnand %p1892_p4, %p1886_p13 }
  0x4a   : > { %1896 = shalt.err (!%p1893_p8)
}
  0x4b   : > { %s3000_s21 = smov 8   ;;  %s3001_s18 = smov 128  }
  0x4c   : > { %1699 = dma.hbm_to_vmem [thread:$0]  (!%p2120_p11), %s2116_s20, 4096, %s2118_s29, %s2124_s13, %s3001_s18, %s3001_s18, %s3000_s21  }
  0x4d   : > { %p3002_p0 = scmp.ne.s32.totalorder %s2994_s9, 0 }
  0x4e   : > { %s2151_s22 = sand.u32 (!%p3002_p0), 1, %s1957_s25   ;;  %p3003_p4 = scmp.ne.s32.totalorder (!%p3002_p0), %s2992_s30, 0 }
  0x4f   : > { %281 = sbr.rel (%p3002_p0) target bundleno = 963 (0x3c3), region = 48  ;;  %s1599_s1 = sshll.u32 (!%p3002_p0), %s2151_s22, 8 }
  0x50   : > { %s284_s17 = scalar_lea.sflag (!%p3002_p0), [#allocation3], %s2151_s22  ;;  %s2157_s11 = scalar_lea.vmem (!%p3002_p0), [#allocation2], %s1599_s1 }
  0x54   : > { %1940 = dma.done.wait (%p3003_p4), %s284_s17, 4096  }
  0x55   : > { %1942 = vsyncadd (%p3003_p4), %s284_s17, 4294963200  ;;  %p3004_p8 = scmp.eq.s32.totalorder %s2039_s28, 0 }
  0x57   : > { %1944 = dma.done.wait (%p3004_p8), [#allocation6], 8192   ;;  %p3005_p7 = pmov %p3004_p8 }
  0x58   : > { %v1974_v0 = vmov 0.0   ;;  %v391_v1 = vld [vmem:[#allocation5 + $0xf8] sm:$0xff]  ;;  %v390_v2 = vld [vmem:[#allocation5 + $0xf0] sm:$0xff]  ;;  %v389_v3 = vld [vmem:[#allocation5 + $0xe8] sm:$0xff]  ;;  %s2801_s14 = scalar_lea.vmem [#allocation8], %s1599_s1  ;;  %s1612_s21 = sshll.u32 %s2039_s28, 12 }
  0x59   : > { %1946 = vsyncadd (%p3005_p7), [#allocation6], 4294959104  ;;  %468 = vmatprep.mubr.f32.mxu0 %v1974_v0  ;;  %1613 = vmatprep.subr.mxu1 %v1974_v0  ;;  %v388_v4 = vld [vmem:[#allocation5 + $0xe0] sm:$0xff]  ;;  %v387_v5 = vld [vmem:[#allocation5 + $0xd8] sm:$0xff]  ;;  %s1498_s18 = sshll.u32 %s2801_s14, 4  ;;  %s1485_s30 = scalar_lea.sflag [#allocation4], %s2151_s22  ;;  %s2932_s18 = int_to_ptr.vmem [resolvable:$true] %s1498_s18 }
  0x5a   : > { %404 = vmatprep.subr.mxu0 %v391_v1  ;;  %v386_v6 = vld [vmem:[#allocation5 + $0xd0] sm:$0xff]  ;;  %v385_v7 = vld [vmem:[#allocation5 + $0xc8] sm:$0xff]  ;;  %v384_v8 = vld [vmem:[#allocation5 + $0xc0] sm:$0xff]  ;;  %s1897_s9 = scalar_lea.vmem %s2932_s18, 4096  ;;  %p3006_p10 = scmp.ne.s32.totalorder %s2998_s12, 0 }
  0x5b   : > { %405 = vmatpush1.msra.mxu0 %v390_v2  ;;  %v383_v9 = vld [vmem:[#allocation5 + $0xb8] sm:$0xff]  ;;  %v382_v10 = vld [vmem:[#allocation5 + $0xb0] sm:$0xff]  ;;  %v381_v11 = vld [vmem:[#allocation5 + $0xa8] sm:$0xff]  ;;  %p1898_p11 = scmp.ne.s32.totalorder %s2932_s18, %s1897_s9  ;;  %s1975_s28 = smov [#allocation8]  }
  0x5c   : > { %406 = vmatprep.subr.mxu0 %v389_v3  ;;  %v380_v12 = vld [vmem:[#allocation5 + $0xa0] sm:$0xff]  ;;  %v379_v13 = vld [vmem:[#allocation5 + $0x98] sm:$0xff]  ;;  %v378_v14 = vld [vmem:[#allocation5 + $0x90] sm:$0xff]  ;;  %s1901_s20 = sshll.u32 %s1975_s28, 4  ;;  %s1902_s20 = int_to_ptr.vmem [resolvable:$false] %s1901_s20 }
  0x5d   : > { %407 = vmatpush1.msra.mxu0 %v388_v4  ;;  %v377_v15 = vld [vmem:[#allocation5 + $0x88] sm:$0xff]  ;;  %v376_v16 = vld [vmem:[#allocation5 + $0x80] sm:$0xff]  ;;  %v375_v17 = vld [vmem:[#allocation5 + $0x78] sm:$0xff]  ;;  %p1899_p1 = pnand %p1898_p11, %p3006_p10  ;;  %s1903_s29 = scalar_lea.vmem %s1902_s20, 8192 }
  0x5e   : > { %408 = vmatprep.subr.mxu0 %v387_v5  ;;  %v374_v18 = vld [vmem:[#allocation5 + $0x70] sm:$0xff]  ;;  %v373_v19 = vld [vmem:[#allocation5 + $0x68] sm:$0xff]  ;;  %v372_v20 = vld [vmem:[#allocation5 + $0x60] sm:$0xff]  ;;  %p1904_p6 = scmp.lt.s32.totalorder %s2932_s18, %s1902_s20  ;;  %p1905_p12 = scmp.lt.s32.totalorder %s1903_s29, %s1897_s9 }
  0x5f   : > { %409 = vmatpush1.msra.mxu0 %v386_v6  ;;  %v371_v21 = vld [vmem:[#allocation5 + $0x58] sm:$0xff]  ;;  %v370_v22 = vld [vmem:[#allocation5 + $0x50] sm:$0xff]  ;;  %v369_v23 = vld [vmem:[#allocation5 + $0x48] sm:$0xff]  ;;  %p1900_p2 = pneg %p1899_p1 }
  0x60   : > { %410 = vmatprep.subr.mxu0 %v385_v7  ;;  %v368_v24 = vld [vmem:[#allocation5 + $0x40] sm:$0xff]  ;;  %v367_v25 = vld [vmem:[#allocation5 + $0x38] sm:$0xff]  ;;  %v366_v26 = vld [vmem:[#allocation5 + $0x30] sm:$0xff]  ;;  %p1906_p3 = por %p1905_p12, %p1904_p6 }
  0x61   : > { %411 = vmatpush1.msra.mxu0 %v384_v8  ;;  %v365_v27 = vld [vmem:[#allocation5 + $0x28] sm:$0xff]  ;;  %v364_v28 = vld [vmem:[#allocation5 + $0x20] sm:$0xff]  ;;  %v363_v29 = vld [vmem:[#allocation5 + $0x18] sm:$0xff] }
  0x62   : > { %412 = vmatprep.subr.mxu0 %v383_v9  ;;  %v362_v30 = vld [vmem:[#allocation5 + $0x10] sm:$0xff]  ;;  %v361_v31 = vld [vmem:[#allocation5 + $0x8] sm:$0xff]  ;;  %v360_v32 = vld [vmem:[#allocation5] sm:$0xff]  ;;  %p1907_p9 = pnand %p1906_p3, %p1900_p2 }
  0x63   : > { %413 = vmatpush1.msra.mxu0 %v382_v10  ;;  %v740_v33 = vld [vmem:[#allocation7 + $0x78] sm:$0xff]  ;;  %v328_v34 = vld [vmem:[%s2157_s11] sm:$0xff]  ;;  %v739_v35 = vld [vmem:[#allocation7 + $0x70] sm:$0xff] }
  0x64   : > { %414 = vmatprep.subr.mxu0 %v381_v11  ;;  %1645 = vmatpush1.msra.mxu1 %v740_v33  ;;  %v329_v36 = vld [vmem:[%s2157_s11 + $0x8] sm:$0xff]  ;;  %v737_v38 = vld [vmem:[#allocation7 + $0x60] sm:$0xff]  ;;  %v2179_v39 = vld [vmem:[%s2157_s11 + $0x10] sm:$0xff] }
  0x65   : > { %415 = vmatpush1.msra.mxu0 %v380_v12  ;;  %1614 = vmatprep.subr.mxu1 %v1974_v0  ;;  %v738_v37 = vld [vmem:[#allocation7 + $0x68] sm:$0xff]  ;;  %v736_v40 = vld [vmem:[#allocation7 + $0x58] sm:$0xff]  ;;  %v735_v41 = vld [vmem:[#allocation7 + $0x50] sm:$0xff] }
  0x66   : > { %416 = vmatprep.subr.mxu0 %v379_v13  ;;  %1646 = vmatpush1.msra.mxu1 %v739_v35  ;;  %v2187_v42 = vld [vmem:[%s2157_s11 + $0x18] sm:$0xff]  ;;  %v734_v43 = vld [vmem:[#allocation7 + $0x48] sm:$0xff]  ;;  %v733_v44 = vld [vmem:[#allocation7 + $0x40] sm:$0xff] }
  0x67   : > { %417 = vmatpush1.msra.mxu0 %v378_v14  ;;  %1615 = vmatprep.subr.mxu1 %v1974_v0  ;;  %v2195_v45 = vld [vmem:[%s2157_s11 + $0x20] sm:$0xff]  ;;  %v732_v46 = vld [vmem:[#allocation7 + $0x38] sm:$0xff]  ;;  %v731_v47 = vld [vmem:[#allocation7 + $0x30] sm:$0xff] }
  0x68   : > { %418 = vmatprep.subr.mxu0 %v377_v15  ;;  %1647 = vmatpush1.msra.mxu1 %v738_v37  ;;  %v2203_v48 = vld [vmem:[%s2157_s11 + $0x28] sm:$0xff]  ;;  %v729_v50 = vld [vmem:[#allocation7 + $0x20] sm:$0xff]  ;;  %v2211_v51 = vld [vmem:[%s2157_s11 + $0x30] sm:$0xff] }
  0x69   : > { %419 = vmatpush1.msra.mxu0 %v376_v16  ;;  %1616 = vmatprep.subr.mxu1 %v1974_v0  ;;  %v730_v49 = vld [vmem:[#allocation7 + $0x28] sm:$0xff]  ;;  %v728_v52 = vld [vmem:[#allocation7 + $0x18] sm:$0xff]  ;;  %v727_v53 = vld [vmem:[#allocation7 + $0x10] sm:$0xff] }
  0x6a   : > { %420 = vmatprep.subr.mxu0 %v375_v17  ;;  %1648 = vmatpush1.msra.mxu1 %v737_v38  ;;  %v2219_v54 = vld [vmem:[%s2157_s11 + $0x38] sm:$0xff]  ;;  %v726_v55 = vld [vmem:[#allocation7 + $0x8] sm:$0xff]  ;;  %v725_v56 = vld [vmem:[#allocation7] sm:$0xff] }
  0x6b   : > { %421 = vmatpush1.msra.mxu0 %v374_v18  ;;  %1617 = vmatprep.subr.mxu1 %v1974_v0  ;;  %v2227_v57 = vld [vmem:[%s2157_s11 + $0x40] sm:$0xff]  ;;  %v756_v58 = vld [vmem:[#allocation7 + $0xf8] sm:$0xff]  ;;  %v755_v59 = vld [vmem:[#allocation7 + $0xf0] sm:$0xff] }
  0x6c   : > { %422 = vmatprep.subr.mxu0 %v373_v19  ;;  %1649 = vmatpush1.msra.mxu1 %v736_v40  ;;  %v2235_v60 = vld [vmem:[%s2157_s11 + $0x48] sm:$0xff]  ;;  %v753_v62 = vld [vmem:[#allocation7 + $0xe0] sm:$0xff]  ;;  %v2243_v63 = vld [vmem:[%s2157_s11 + $0x50] sm:$0xff] }
  0x6d   : > { %423 = vmatpush1.msra.mxu0 %v372_v20  ;;  %1618 = vmatprep.subr.mxu1 %v1974_v0  ;;  %v754_v61 = vld [vmem:[#allocation7 + $0xe8] sm:$0xff]  ;;  %v752_v1 = vld [vmem:[#allocation7 + $0xd8] sm:$0xff]  ;;  %v751_v3 = vld [vmem:[#allocation7 + $0xd0] sm:$0xff] }
  0x6e   : > { %424 = vmatprep.subr.mxu0 %v371_v21  ;;  %1650 = vmatpush1.msra.mxu1 %v735_v41  ;;  %v2251_v2 = vld [vmem:[%s2157_s11 + $0x58] sm:$0xff]  ;;  %v2257_v4 = vld [vmem:[#allocation7 + $0xc8] sm:$0xff]  ;;  %v2261_v5 = vld [vmem:[%s2157_s11 + $0x60] sm:$0xff] }
  0x6f   : > { %425 = vmatpush1.msra.mxu0 %v370_v22  ;;  %1619 = vmatprep.subr.mxu1 %v1974_v0  ;;  %v749_v6 = vld [vmem:[#allocation7 + $0xc0] sm:$0xff]  ;;  %v2270_v7 = vld [vmem:[%s2157_s11 + $0x68] sm:$0xff]  ;;  %v748_v8 = vld [vmem:[#allocation7 + $0xb8] sm:$0xff] }
  0x70   : > { %426 = vmatprep.subr.mxu0 %v369_v23  ;;  %1651 = vmatpush1.msra.mxu1 %v734_v43  ;;  %v747_v9 = vld [vmem:[#allocation7 + $0xb0] sm:$0xff]  ;;  %v746_v11 = vld [vmem:[#allocation7 + $0xa8] sm:$0xff]  ;;  %v2286_v12 = vld [vmem:[%s2157_s11 + $0x78] sm:$0xff] }
  0x71   : > { %427 = vmatpush1.msra.mxu0 %v368_v24  ;;  %1620 = vmatprep.subr.mxu1 %v1974_v0  ;;  %v2278_v10 = vld [vmem:[%s2157_s11 + $0x70] sm:$0xff]  ;;  %v745_v13 = vld [vmem:[#allocation7 + $0xa0] sm:$0xff]  ;;  %v744_v15 = vld [vmem:[#allocation7 + $0x98] sm:$0xff] }
  0x72   : > { %428 = vmatprep.subr.mxu0 %v367_v25  ;;  %1652 = vmatpush1.msra.mxu1 %v733_v44  ;;  %v2294_v14 = vld [vmem:[%s2157_s11 + $0x80] sm:$0xff]  ;;  %v2302_v16 = vld [vmem:[%s2157_s11 + $0x88] sm:$0xff]  ;;  %v743_v17 = vld [vmem:[#allocation7 + $0x90] sm:$0xff] }
  0x73   : > { %429 = vmatpush1.msra.mxu0 %v366_v26  ;;  %1621 = vmatprep.subr.mxu1 %v1974_v0  ;;  %v742_v18 = vld [vmem:[#allocation7 + $0x88] sm:$0xff]  ;;  %v2310_v19 = vld [vmem:[%s2157_s11 + $0x90] sm:$0xff]  ;;  %v741_v20 = vld [vmem:[#allocation7 + $0x80] sm:$0xff] }
  0x74   : > { %430 = vmatprep.subr.mxu0 %v365_v27  ;;  %1653 = vmatpush1.msra.mxu1 %v732_v46  ;;  %v2319_v21 = vld [vmem:[%s2157_s11 + $0x98] sm:$0xff]  ;;  %v2325_v22 = vld [vmem:[%s2157_s11 + $0xa0] sm:$0xff]  ;;  %v2332_v23 = vld [vmem:[%s2157_s11 + $0xa8] sm:$0xff] }
  0x75   : > { %431 = vmatpush1.msra.mxu0 %v364_v28  ;;  %1622 = vmatprep.subr.mxu1 %v1974_v0  ;;  %v2339_v24 = vld [vmem:[%s2157_s11 + $0xb0] sm:$0xff]  ;;  %v2346_v25 = vld [vmem:[%s2157_s11 + $0xb8] sm:$0xff]  ;;  %v2351_v26 = vld [vmem:[%s2157_s11 + $0xc0] sm:$0xff] }
  0x76   : > { %432 = vmatprep.subr.mxu0 %v363_v29  ;;  %1654 = vmatpush1.msra.mxu1 %v731_v47  ;;  %v2356_v27 = vld [vmem:[%s2157_s11 + $0xc8] sm:$0xff]  ;;  %v2361_v28 = vld [vmem:[%s2157_s11 + $0xd0] sm:$0xff]  ;;  %v2366_v29 = vld [vmem:[%s2157_s11 + $0xd8] sm:$0xff] }
  0x77   : > { %433 = vmatpush1.msra.mxu0 %v362_v30  ;;  %1623 = vmatprep.subr.mxu1 %v1974_v0  ;;  %v2371_v30 = vld [vmem:[%s2157_s11 + $0xe0] sm:$0xff] }
  0x78   : > { %434 = vmatprep.subr.mxu0 %v361_v31  ;;  %1655 = vmatpush1.msra.mxu1 %v730_v49  ;;  %v2376_v31 = vld [vmem:[%s2157_s11 + $0xe8] sm:$0xff] }
  0x79   : > { %435 = vmatpush1.msra.mxu0 %v360_v32  ;;  %1624 = vmatprep.subr.mxu1 %v1974_v0  ;;  %v2381_v32 = vld [vmem:[%s2157_s11 + $0xf0] sm:$0xff] }
  0x7a   : > { %469 = vmatmul.mubr.f32.vlgmr.msra.gmra.mxu0 %v328_v34  ;;  %764 = vmatprep.subr.mxu0 %v1974_v0  ;;  %v394_v34 = vlaneseq }
  0x7b   : > { %474 = vmatprep.mubr.f32.mxu0 %v1974_v0  ;;  %765 = vmatpush1.msra.mxu0 %v740_v33  ;;  %v2386_v33 = vld [vmem:[%s2157_s11 + $0xf8] sm:$0xff] }
  0x7c   : > { %766 = vmatprep.subr.mxu0 %v1974_v0  ;;  %1656 = vmatpush1.msra.mxu1 %v729_v50 }
  0x7d   : > { %767 = vmatpush1.msra.mxu0 %v739_v35  ;;  %1625 = vmatprep.subr.mxu1 %v1974_v0  ;;  %v395_v35 = vshrl.u32 %v394_v34, 7 }
  0x7e   : > { %475 = vmatmul.mubr.f32.gmra.mxu0 %v329_v36  ;;  %768 = vmatprep.subr.mxu0 %v1974_v0 }
  0x7f   : > { %480 = vmatprep.mubr.f32.mxu0 %v1974_v0  ;;  %769 = vmatpush1.msra.mxu0 %v738_v37  ;;  %v396_v36 = vsub.s32 0, %v395_v35  ;;  %v392_v37 = vld [vmem:[%s2979_s2] sm:$0x3] }
  0x80   : > { %770 = vmatprep.subr.mxu0 %v1974_v0  ;;  %1657 = vmatpush1.msra.mxu1 %v728_v52 }
  0x81   : > { %771 = vmatpush1.msra.mxu0 %v737_v38  ;;  %1626 = vmatprep.subr.mxu1 %v1974_v0  ;;  %v400_v38 = vsub.s32 1, %v395_v35 }
  0x82   : > { %481 = vmatmul.mubr.f32.gmra.mxu0 %v2179_v39  ;;  %772 = vmatprep.subr.mxu0 %v1974_v0 }
  0x83   : > { %486 = vmatprep.mubr.f32.mxu0 %v1974_v0  ;;  %773 = vmatpush1.msra.mxu0 %v736_v40  ;;  %v2392_v40 = vrot.slane %v392_v37, %v396_v36 }
  0x84   : > { %774 = vmatprep.subr.mxu0 %v1974_v0  ;;  %1658 = vmatpush1.msra.mxu1 %v727_v53 }
  0x85   : > { %775 = vmatpush1.msra.mxu0 %v735_v41  ;;  %1627 = vmatprep.subr.mxu1 %v1974_v0  ;;  %v2394_v41 = vrot.slane %v392_v37, %v400_v38 }
  0x86   : > { %487 = vmatmul.mubr.f32.gmra.mxu0 %v2187_v42  ;;  %776 = vmatprep.subr.mxu0 %v1974_v0 }
  0x87   : > { %492 = vmatprep.mubr.f32.mxu0 %v1974_v0  ;;  %777 = vmatpush1.msra.mxu0 %v734_v43 }
  0x88   : > { %778 = vmatprep.subr.mxu0 %v1974_v0  ;;  %1659 = vmatpush1.msra.mxu1 %v726_v55 }
  0x89   : > { %779 = vmatpush1.msra.mxu0 %v733_v44  ;;  %1628 = vmatprep.subr.mxu1 %v1974_v0 }
  0x8a   : > { %493 = vmatmul.mubr.f32.gmra.mxu0 %v2195_v45  ;;  %780 = vmatprep.subr.mxu0 %v1974_v0 }
  0x8b   : > { %498 = vmatprep.mubr.f32.mxu0 %v1974_v0  ;;  %781 = vmatpush1.msra.mxu0 %v732_v46 }
  0x8c   : > { %782 = vmatprep.subr.mxu0 %v1974_v0  ;;  %1660 = vmatpush1.msra.mxu1 %v725_v56 }
  0x8d   : > { %783 = vmatpush1.msra.mxu0 %v731_v47  ;;  %1629 = vmatprep.subr.mxu1 %v1974_v0 }
  0x8e   : > { %499 = vmatmul.mubr.f32.gmra.mxu0 %v2203_v48  ;;  %784 = vmatprep.subr.mxu0 %v1974_v0 }
  0x8f   : > { %504 = vmatprep.mubr.f32.mxu0 %v1974_v0  ;;  %785 = vmatpush1.msra.mxu0 %v730_v49 }
  0x90   : > { %786 = vmatprep.subr.mxu0 %v1974_v0  ;;  %1661 = vmatpush2.msra.mxu1 %v756_v58 }
  0x91   : > { %787 = vmatpush1.msra.mxu0 %v729_v50  ;;  %1630 = vmatprep.subr.mxu1 %v1974_v0 }
  0x92   : > { %505 = vmatmul.mubr.f32.gmra.mxu0 %v2211_v51  ;;  %788 = vmatprep.subr.mxu0 %v1974_v0 }
  0x93   : > { %510 = vmatprep.mubr.f32.mxu0 %v1974_v0  ;;  %789 = vmatpush1.msra.mxu0 %v728_v52 }
  0x94   : > { %790 = vmatprep.subr.mxu0 %v1974_v0  ;;  %1662 = vmatpush2.msra.mxu1 %v755_v59 }
  0x95   : > { %791 = vmatpush1.msra.mxu0 %v727_v53  ;;  %1631 = vmatprep.subr.mxu1 %v1974_v0 }
  0x96   : > { %511 = vmatmul.mubr.f32.gmra.mxu0 %v2219_v54  ;;  %792 = vmatprep.subr.mxu0 %v1974_v0 }
  0x97   : > { %516 = vmatprep.mubr.f32.mxu0 %v1974_v0  ;;  %793 = vmatpush1.msra.mxu0 %v726_v55 }
  0x98   : > { %794 = vmatprep.subr.mxu0 %v1974_v0  ;;  %1663 = vmatpush2.msra.mxu1 %v754_v61 }
  0x99   : > { %795 = vmatpush1.msra.mxu0 %v725_v56  ;;  %1632 = vmatprep.subr.mxu1 %v1974_v0 }
  0x9a   : > { %517 = vmatmul.mubr.f32.gmra.mxu0 %v2227_v57  ;;  %796 = vmatprep.subr.mxu0 %v1974_v0 }
  0x9b   : > { %522 = vmatprep.mubr.f32.mxu0 %v1974_v0  ;;  %797 = vmatpush2.msra.mxu0 %v756_v58 }
  0x9c   : > { %798 = vmatprep.subr.mxu0 %v1974_v0  ;;  %1664 = vmatpush2.msra.mxu1 %v753_v62 }
  0x9d   : > { %799 = vmatpush2.msra.mxu0 %v755_v59  ;;  %1633 = vmatprep.subr.mxu1 %v1974_v0 }
  0x9e   : > { %523 = vmatmul.mubr.f32.gmra.mxu0 %v2235_v60  ;;  %800 = vmatprep.subr.mxu0 %v1974_v0 }
  0x9f   : > { %528 = vmatprep.mubr.f32.mxu0 %v1974_v0  ;;  %801 = vmatpush2.msra.mxu0 %v754_v61 }
  0xa0   : > { %802 = vmatprep.subr.mxu0 %v1974_v0  ;;  %1665 = vmatpush2.msra.mxu1 %v752_v1 }
  0xa1   : > { %803 = vmatpush2.msra.mxu0 %v753_v62  ;;  %1634 = vmatprep.subr.mxu1 %v1974_v0 }
  0xa2   : > { %529 = vmatmul.mubr.f32.gmra.mxu0 %v2243_v63  ;;  %804 = vmatprep.subr.mxu0 %v1974_v0 }
  0xa3   : > { %534 = vmatprep.mubr.f32.mxu0 %v1974_v0  ;;  %805 = vmatpush2.msra.mxu0 %v752_v1 }
  0xa4   : > { %806 = vmatprep.subr.mxu0 %v1974_v0  ;;  %1666 = vmatpush2.msra.mxu1 %v751_v3 }
  0xa5   : > { %807 = vmatpush2.msra.mxu0 %v751_v3  ;;  %1635 = vmatprep.subr.mxu1 %v1974_v0 }
  0xa6   : > { %535 = vmatmul.mubr.f32.gmra.mxu0 %v2251_v2  ;;  %808 = vmatprep.subr.mxu0 %v1974_v0 }
  0xa7   : > { %540 = vmatprep.mubr.f32.mxu0 %v1974_v0  ;;  %809 = vmatpush2.msra.mxu0 %v2257_v4 }
  0xa8   : > { %810 = vmatprep.subr.mxu0 %v1974_v0  ;;  %1667 = vmatpush2.msra.mxu1 %v2257_v4 }
  0xa9   : > { %811 = vmatpush2.msra.mxu0 %v749_v6  ;;  %1636 = vmatprep.subr.mxu1 %v1974_v0 }
  0xaa   : > { %541 = vmatmul.mubr.f32.gmra.mxu0 %v2261_v5  ;;  %812 = vmatprep.subr.mxu0 %v1974_v0 }
  0xab   : > { %546 = vmatprep.mubr.f32.mxu0 %v1974_v0  ;;  %813 = vmatpush2.msra.mxu0 %v748_v8 }
  0xac   : > { %814 = vmatprep.subr.mxu0 %v1974_v0  ;;  %1668 = vmatpush2.msra.mxu1 %v749_v6 }
  0xad   : > { %815 = vmatpush2.msra.mxu0 %v747_v9  ;;  %1637 = vmatprep.subr.mxu1 %v1974_v0 }
  0xae   : > { %547 = vmatmul.mubr.f32.gmra.mxu0 %v2270_v7  ;;  %816 = vmatprep.subr.mxu0 %v1974_v0 }
  0xaf   : > { %552 = vmatprep.mubr.f32.mxu0 %v1974_v0  ;;  %817 = vmatpush2.msra.mxu0 %v746_v11 }
  0xb0   : > { %818 = vmatprep.subr.mxu0 %v1974_v0  ;;  %1669 = vmatpush2.msra.mxu1 %v748_v8 }
  0xb1   : > { %819 = vmatpush2.msra.mxu0 %v745_v13  ;;  %1638 = vmatprep.subr.mxu1 %v1974_v0 }
  0xb2   : > { %553 = vmatmul.mubr.f32.gmra.mxu0 %v2278_v10  ;;  %820 = vmatprep.subr.mxu0 %v1974_v0 }
  0xb3   : > { %558 = vmatprep.mubr.f32.mxu0 %v1974_v0  ;;  %821 = vmatpush2.msra.mxu0 %v744_v15 }
  0xb4   : > { %822 = vmatprep.subr.mxu0 %v1974_v0  ;;  %1670 = vmatpush2.msra.mxu1 %v747_v9 }
  0xb5   : > { %823 = vmatpush2.msra.mxu0 %v743_v17  ;;  %1639 = vmatprep.subr.mxu1 %v1974_v0 }
  0xb6   : > { %559 = vmatmul.mubr.f32.gmra.mxu0 %v2286_v12  ;;  %824 = vmatprep.subr.mxu0 %v1974_v0 }
  0xb7   : > { %564 = vmatprep.mubr.f32.mxu0 %v1974_v0  ;;  %825 = vmatpush2.msra.mxu0 %v742_v18 }
  0xb8   : > { %826 = vmatprep.subr.mxu0 %v1974_v0  ;;  %1671 = vmatpush2.msra.mxu1 %v746_v11 }
  0xb9   : > { %827 = vmatpush2.msra.mxu0 %v741_v20  ;;  %1640 = vmatprep.subr.mxu1 %v1974_v0 }
  0xba   : > { %565 = vmatmul.mubr.f32.gmra.mxu0 %v2294_v14  ;;  %1672 = vmatpush2.msra.mxu1 %v745_v13 }
  0xbb   : > { %570 = vmatprep.mubr.f32.mxu0 %v1974_v0  ;;  %1641 = vmatprep.subr.mxu1 %v1974_v0 }
  0xbc   : > { %1673 = vmatpush2.msra.mxu1 %v744_v15 }
  0xbd   : > { %1642 = vmatprep.subr.mxu1 %v1974_v0 }
  0xbe   : > { %571 = vmatmul.mubr.f32.gmra.mxu0 %v2302_v16  ;;  %1674 = vmatpush2.msra.mxu1 %v743_v17 }
  0xbf   : > { %576 = vmatprep.mubr.f32.mxu0 %v1974_v0  ;;  %1643 = vmatprep.subr.mxu1 %v1974_v0 }
  0xc0   : > { %1675 = vmatpush2.msra.mxu1 %v742_v18 }
  0xc1   : > { %1644 = vmatprep.subr.mxu1 %v1974_v0 }
  0xc2   : > { %577 = vmatmul.mubr.f32.gmra.mxu0 %v2310_v19  ;;  %1676 = vmatpush2.msra.mxu1 %v741_v20 }
  0xc3   : > { %582 = vmatprep.mubr.f32.mxu0 %v1974_v0 }
  0xc6   : > { %583 = vmatmul.mubr.f32.gmra.mxu0 %v2319_v21 }
  0xc7   : > { %588 = vmatprep.mubr.f32.mxu0 %v1974_v0 }
  0xca   : > { %589 = vmatmul.mubr.f32.gmra.mxu0 %v2325_v22 }
  0xcb   : > { %594 = vmatprep.mubr.f32.mxu0 %v1974_v0 }
  0xce   : > { %595 = vmatmul.mubr.f32.gmra.mxu0 %v2332_v23 }
  0xcf   : > { %600 = vmatprep.mubr.f32.mxu0 %v1974_v0 }
  0xd2   : > { %601 = vmatmul.mubr.f32.gmra.mxu0 %v2339_v24 }
  0xd3   : > { %606 = vmatprep.mubr.f32.mxu0 %v1974_v0 }
  0xd6   : > { %607 = vmatmul.mubr.f32.gmra.mxu0 %v2346_v25 }
  0xd7   : > { %612 = vmatprep.mubr.f32.mxu0 %v1974_v0 }
  0xda   : > { %613 = vmatmul.mubr.f32.gmra.mxu0 %v2351_v26 }
  0xdb   : > { %618 = vmatprep.mubr.f32.mxu0 %v1974_v0 }
  0xde   : > { %619 = vmatmul.mubr.f32.gmra.mxu0 %v2356_v27 }
  0xdf   : > { %624 = vmatprep.mubr.f32.mxu0 %v1974_v0 }
  0xe2   : > { %625 = vmatmul.mubr.f32.gmra.mxu0 %v2361_v28 }
  0xe3   : > { %630 = vmatprep.mubr.f32.mxu0 %v1974_v0 }
  0xe6   : > { %631 = vmatmul.mubr.f32.gmra.mxu0 %v2366_v29 }
  0xe7   : > { %636 = vmatprep.mubr.f32.mxu0 %v1974_v0 }
  0xea   : > { %637 = vmatmul.mubr.f32.gmra.mxu0 %v2371_v30 }
  0xeb   : > { %642 = vmatprep.mubr.f32.mxu0 %v1974_v0 }
  0xee   : > { %643 = vmatmul.mubr.f32.gmra.mxu0 %v2376_v31 }
  0xef   : > { %648 = vmatprep.mubr.f32.mxu0 %v1974_v0 }
  0xf2   : > { %649 = vmatmul.mubr.f32.gmra.mxu0 %v2381_v32 }
  0xf3   : > { %654 = vmatprep.mubr.f32.mxu0 %v1974_v0 }
  0xf6   : > { %655 = vmatmul.mubr.f32.gmra.mxu0 %v2386_v33 }
 0x13a   : > { %v470_v43 = vpop.f32.mrf.mxu0 }
 0x13b   : > { %v471_v44 = vadd.f32 %v470_v43, %v2392_v40 }
 0x13c   : > { %v472_v0 = vpop.f32.mrf.mxu0 }
 0x13d   : > { %v473_v46 = vadd.f32 %v472_v0, %v2394_v41  ;;  %v661_v50 = vmax.f32 %v471_v44, 0.0 }
 0x13e   : > { %v476_v47 = vpop.f32.mrf.mxu0 }
 0x13f   : > { %v662_v49 = vmax.f32 %v473_v46, 0.0  ;;  %v477_v52 = vadd.f32 %v476_v47, %v2392_v40 }
 0x140   : > { %v478_v53 = vpop.f32.mrf.mxu0 }
 0x141   : > { %v479_v55 = vadd.f32 %v478_v53, %v2394_v41  ;;  %828 = vmatprep.mubr.f32.mxu0 %v662_v49  ;;  %v663_v59 = vmax.f32 %v477_v52, 0.0 }
 0x142   : > { %v482_v56 = vpop.f32.mrf.mxu0  ;;  %829 = vmatmul.mubr.f32.vlgmr.msra.gmra.mxu0 %v661_v50 }
 0x143   : > { %v664_v58 = vmax.f32 %v479_v55, 0.0  ;;  %v483_v61 = vadd.f32 %v482_v56, %v2392_v40 }
 0x144   : > { %v484_v62 = vpop.f32.mrf.mxu0 }
 0x145   : > { %v485_v1 = vadd.f32 %v484_v62, %v2394_v41  ;;  %833 = vmatprep.mubr.f32.mxu0 %v664_v58  ;;  %v665_v6 = vmax.f32 %v483_v61, 0.0 }
 0x146   : > { %v488_v3 = vpop.f32.mrf.mxu0  ;;  %834 = vmatmul.mubr.f32.gmra.mxu0 %v663_v59 }
 0x147   : > { %v666_v4 = vmax.f32 %v485_v1, 0.0  ;;  %v489_v8 = vadd.f32 %v488_v3, %v2392_v40 }
 0x148   : > { %v490_v9 = vpop.f32.mrf.mxu0 }
 0x149   : > { %v491_v11 = vadd.f32 %v490_v9, %v2394_v41  ;;  %838 = vmatprep.mubr.f32.mxu0 %v666_v4  ;;  %v667_v17 = vmax.f32 %v489_v8, 0.0 }
 0x14a   : > { %v494_v13 = vpop.f32.mrf.mxu0  ;;  %839 = vmatmul.mubr.f32.gmra.mxu0 %v665_v6 }
 0x14b   : > { %v668_v15 = vmax.f32 %v491_v11, 0.0  ;;  %v495_v18 = vadd.f32 %v494_v13, %v2392_v40 }
 0x14c   : > { %v496_v20 = vpop.f32.mrf.mxu0 }
 0x14d   : > { %843 = vmatprep.mubr.f32.mxu0 %v668_v15  ;;  %v497_v34 = vadd.f32 %v496_v20, %v2394_v41  ;;  %v669_v37 = vmax.f32 %v495_v18, 0.0 }
 0x14e   : > { %v500_v35 = vpop.f32.mrf.mxu0  ;;  %844 = vmatmul.mubr.f32.gmra.mxu0 %v667_v17 }
 0x14f   : > { %v670_v36 = vmax.f32 %v497_v34, 0.0  ;;  %v501_v38 = vadd.f32 %v500_v35, %v2392_v40 }
 0x150   : > { %v502_v43 = vpop.f32.mrf.mxu0 }
 0x151   : > { %v503_v44 = vadd.f32 %v502_v43, %v2394_v41  ;;  %848 = vmatprep.mubr.f32.mxu1 %v670_v36  ;;  %v671_v47 = vmax.f32 %v501_v38, 0.0 }
 0x152   : > { %v506_v0 = vpop.f32.mrf.mxu0  ;;  %849 = vmatmul.mubr.f32.vlgmr.msra.gmra.mxu1 %v669_v37 }
 0x153   : > { %v672_v46 = vmax.f32 %v503_v44, 0.0  ;;  %v507_v49 = vadd.f32 %v506_v0, %v2392_v40 }
 0x154   : > { %v508_v50 = vpop.f32.mrf.mxu0 }
 0x155   : > { %v509_v52 = vadd.f32 %v508_v50, %v2394_v41  ;;  %853 = vmatprep.mubr.f32.mxu1 %v672_v46  ;;  %v673_v56 = vmax.f32 %v507_v49, 0.0 }
 0x156   : > { %v512_v53 = vpop.f32.mrf.mxu0  ;;  %854 = vmatmul.mubr.f32.gmra.mxu1 %v671_v47 }
 0x157   : > { %v674_v55 = vmax.f32 %v509_v52, 0.0  ;;  %v513_v58 = vadd.f32 %v512_v53, %v2392_v40 }
 0x158   : > { %v514_v59 = vpop.f32.mrf.mxu0 }
 0x159   : > { %v515_v61 = vadd.f32 %v514_v59, %v2394_v41  ;;  %858 = vmatprep.mubr.f32.mxu1 %v674_v55  ;;  %v675_v3 = vmax.f32 %v513_v58, 0.0 }
 0x15a   : > { %v518_v62 = vpop.f32.mrf.mxu0  ;;  %859 = vmatmul.mubr.f32.gmra.mxu1 %v673_v56 }
 0x15b   : > { %v676_v1 = vmax.f32 %v515_v61, 0.0  ;;  %v519_v4 = vadd.f32 %v518_v62, %v2392_v40 }
 0x15c   : > { %v520_v6 = vpop.f32.mrf.mxu0 }
 0x15d   : > { %v521_v8 = vadd.f32 %v520_v6, %v2394_v41  ;;  %863 = vmatprep.mubr.f32.mxu1 %v676_v1  ;;  %v677_v13 = vmax.f32 %v519_v4, 0.0 }
 0x15e   : > { %v524_v9 = vpop.f32.mrf.mxu0  ;;  %864 = vmatmul.mubr.f32.gmra.mxu1 %v675_v3 }
 0x15f   : > { %v678_v11 = vmax.f32 %v521_v8, 0.0  ;;  %v525_v15 = vadd.f32 %v524_v9, %v2392_v40 }
 0x160   : > { %v526_v17 = vpop.f32.mrf.mxu0 }
 0x161   : > { %v527_v18 = vadd.f32 %v526_v17, %v2394_v41  ;;  %868 = vmatprep.mubr.f32.mxu1 %v678_v11  ;;  %v679_v35 = vmax.f32 %v525_v15, 0.0 }
 0x162   : > { %v530_v20 = vpop.f32.mrf.mxu0  ;;  %869 = vmatmul.mubr.f32.gmra.mxu1 %v677_v13 }
 0x163   : > { %v680_v34 = vmax.f32 %v527_v18, 0.0  ;;  %v531_v36 = vadd.f32 %v530_v20, %v2392_v40 }
 0x164   : > { %v532_v37 = vpop.f32.mrf.mxu0 }
 0x165   : > { %v533_v38 = vadd.f32 %v532_v37, %v2394_v41  ;;  %873 = vmatprep.mubr.f32.mxu1 %v680_v34  ;;  %v681_v0 = vmax.f32 %v531_v36, 0.0 }
 0x166   : > { %v536_v43 = vpop.f32.mrf.mxu0  ;;  %874 = vmatmul.mubr.f32.gmra.mxu1 %v679_v35 }
 0x167   : > { %v682_v44 = vmax.f32 %v533_v38, 0.0  ;;  %v537_v46 = vadd.f32 %v536_v43, %v2392_v40 }
 0x168   : > { %v538_v47 = vpop.f32.mrf.mxu0 }
 0x169   : > { %v539_v49 = vadd.f32 %v538_v47, %v2394_v41  ;;  %878 = vmatprep.mubr.f32.mxu1 %v682_v44  ;;  %v683_v53 = vmax.f32 %v537_v46, 0.0 }
 0x16a   : > { %v542_v50 = vpop.f32.mrf.mxu0  ;;  %879 = vmatmul.mubr.f32.gmra.mxu1 %v681_v0 }
 0x16b   : > { %v684_v52 = vmax.f32 %v539_v49, 0.0  ;;  %v543_v55 = vadd.f32 %v542_v50, %v2392_v40 }
 0x16c   : > { %v544_v56 = vpop.f32.mrf.mxu0 }
 0x16d   : > { %v545_v58 = vadd.f32 %v544_v56, %v2394_v41  ;;  %883 = vmatprep.mubr.f32.mxu1 %v684_v52  ;;  %v685_v62 = vmax.f32 %v543_v55, 0.0 }
 0x16e   : > { %v548_v59 = vpop.f32.mrf.mxu0  ;;  %884 = vmatmul.mubr.f32.gmra.mxu1 %v683_v53 }
 0x16f   : > { %v686_v61 = vmax.f32 %v545_v58, 0.0  ;;  %v549_v1 = vadd.f32 %v548_v59, %v2392_v40 }
 0x170   : > { %v550_v3 = vpop.f32.mrf.mxu0 }
 0x171   : > { %v551_v4 = vadd.f32 %v550_v3, %v2394_v41  ;;  %888 = vmatprep.mubr.f32.mxu1 %v686_v61  ;;  %v687_v9 = vmax.f32 %v549_v1, 0.0 }
 0x172   : > { %v554_v6 = vpop.f32.mrf.mxu0  ;;  %889 = vmatmul.mubr.f32.gmra.mxu1 %v685_v62 }
 0x173   : > { %v688_v8 = vmax.f32 %v551_v4, 0.0  ;;  %v555_v11 = vadd.f32 %v554_v6, %v2392_v40 }
 0x174   : > { %v556_v13 = vpop.f32.mrf.mxu0 }
 0x175   : > { %v557_v15 = vadd.f32 %v556_v13, %v2394_v41  ;;  %893 = vmatprep.mubr.f32.mxu1 %v688_v8  ;;  %v689_v20 = vmax.f32 %v555_v11, 0.0 }
 0x176   : > { %v560_v17 = vpop.f32.mrf.mxu0  ;;  %894 = vmatmul.mubr.f32.gmra.mxu1 %v687_v9 }
 0x177   : > { %v690_v18 = vmax.f32 %v557_v15, 0.0  ;;  %v561_v34 = vadd.f32 %v560_v17, %v2392_v40 }
 0x178   : > { %v562_v35 = vpop.f32.mrf.mxu0 }
 0x179   : > { %v563_v36 = vadd.f32 %v562_v35, %v2394_v41  ;;  %898 = vmatprep.mubr.f32.mxu1 %v690_v18  ;;  %v691_v43 = vmax.f32 %v561_v34, 0.0 }
 0x17a   : > { %v566_v37 = vpop.f32.mrf.mxu0  ;;  %899 = vmatmul.mubr.f32.gmra.mxu1 %v689_v20 }
 0x17b   : > { %v692_v38 = vmax.f32 %v563_v36, 0.0  ;;  %v567_v44 = vadd.f32 %v566_v37, %v2392_v40 }
 0x17c   : > { %v568_v0 = vpop.f32.mrf.mxu0 }
 0x17d   : > { %v569_v46 = vadd.f32 %v568_v0, %v2394_v41  ;;  %903 = vmatprep.mubr.f32.mxu1 %v692_v38  ;;  %v693_v50 = vmax.f32 %v567_v44, 0.0 }
 0x17e   : > { %v572_v47 = vpop.f32.mrf.mxu0  ;;  %904 = vmatmul.mubr.f32.gmra.mxu1 %v691_v43 }
 0x17f   : > { %v694_v49 = vmax.f32 %v569_v46, 0.0  ;;  %v573_v52 = vadd.f32 %v572_v47, %v2392_v40 }
 0x180   : > { %v574_v53 = vpop.f32.mrf.mxu0 }
 0x181   : > { %v575_v55 = vadd.f32 %v574_v53, %v2394_v41  ;;  %908 = vmatprep.mubr.f32.mxu1 %v694_v49  ;;  %v695_v59 = vmax.f32 %v573_v52, 0.0 }
 0x182   : > { %v578_v56 = vpop.f32.mrf.mxu0  ;;  %909 = vmatmul.mubr.f32.gmra.mxu1 %v693_v50 }
 0x183   : > { %v696_v58 = vmax.f32 %v575_v55, 0.0  ;;  %v579_v61 = vadd.f32 %v578_v56, %v2392_v40 }
 0x184   : > { %v580_v62 = vpop.f32.mrf.mxu0 }
 0x185   : > { %v581_v1 = vadd.f32 %v580_v62, %v2394_v41  ;;  %913 = vmatprep.mubr.f32.mxu1 %v696_v58  ;;  %v697_v6 = vmax.f32 %v579_v61, 0.0 }
 0x186   : > { %v584_v3 = vpop.f32.mrf.mxu0  ;;  %914 = vmatmul.mubr.f32.gmra.mxu1 %v695_v59 }
 0x187   : > { %v698_v4 = vmax.f32 %v581_v1, 0.0  ;;  %v585_v8 = vadd.f32 %v584_v3, %v2392_v40 }
 0x188   : > { %v586_v9 = vpop.f32.mrf.mxu0 }
 0x189   : > { %v587_v11 = vadd.f32 %v586_v9, %v2394_v41  ;;  %918 = vmatprep.mubr.f32.mxu1 %v698_v4  ;;  %v699_v17 = vmax.f32 %v585_v8, 0.0 }
 0x18a   : > { %v590_v13 = vpop.f32.mrf.mxu0  ;;  %919 = vmatmul.mubr.f32.gmra.mxu1 %v697_v6 }
 0x18b   : > { %v700_v15 = vmax.f32 %v587_v11, 0.0  ;;  %v591_v18 = vadd.f32 %v590_v13, %v2392_v40 }
 0x18c   : > { %v592_v20 = vpop.f32.mrf.mxu0 }
 0x18d   : > { %v593_v34 = vadd.f32 %v592_v20, %v2394_v41  ;;  %923 = vmatprep.mubr.f32.mxu1 %v700_v15  ;;  %v701_v37 = vmax.f32 %v591_v18, 0.0 }
 0x18e   : > { %v596_v35 = vpop.f32.mrf.mxu0  ;;  %924 = vmatmul.mubr.f32.gmra.mxu1 %v699_v17 }
 0x18f   : > { %v702_v36 = vmax.f32 %v593_v34, 0.0  ;;  %v597_v38 = vadd.f32 %v596_v35, %v2392_v40 }
 0x190   : > { %v598_v43 = vpop.f32.mrf.mxu0 }
 0x191   : > { %v599_v44 = vadd.f32 %v598_v43, %v2394_v41  ;;  %928 = vmatprep.mubr.f32.mxu1 %v702_v36  ;;  %v703_v47 = vmax.f32 %v597_v38, 0.0 }
 0x192   : > { %v602_v0 = vpop.f32.mrf.mxu0  ;;  %929 = vmatmul.mubr.f32.gmra.mxu1 %v701_v37 }
 0x193   : > { %v704_v46 = vmax.f32 %v599_v44, 0.0  ;;  %v603_v49 = vadd.f32 %v602_v0, %v2392_v40 }
 0x194   : > { %v604_v50 = vpop.f32.mrf.mxu0 }
 0x195   : > { %v605_v52 = vadd.f32 %v604_v50, %v2394_v41  ;;  %933 = vmatprep.mubr.f32.mxu1 %v704_v46  ;;  %v705_v56 = vmax.f32 %v603_v49, 0.0 }
 0x196   : > { %v608_v53 = vpop.f32.mrf.mxu0  ;;  %934 = vmatmul.mubr.f32.gmra.mxu1 %v703_v47 }
 0x197   : > { %v706_v55 = vmax.f32 %v605_v52, 0.0  ;;  %v609_v58 = vadd.f32 %v608_v53, %v2392_v40 }
 0x198   : > { %v610_v59 = vpop.f32.mrf.mxu0 }
 0x199   : > { %v611_v61 = vadd.f32 %v610_v59, %v2394_v41  ;;  %938 = vmatprep.mubr.f32.mxu1 %v706_v55  ;;  %v707_v3 = vmax.f32 %v609_v58, 0.0 }
 0x19a   : > { %v614_v62 = vpop.f32.mrf.mxu0  ;;  %939 = vmatmul.mubr.f32.gmra.mxu1 %v705_v56 }
 0x19b   : > { %v708_v1 = vmax.f32 %v611_v61, 0.0  ;;  %v615_v4 = vadd.f32 %v614_v62, %v2392_v40 }
 0x19c   : > { %v616_v6 = vpop.f32.mrf.mxu0 }
 0x19d   : > { %v617_v8 = vadd.f32 %v616_v6, %v2394_v41  ;;  %943 = vmatprep.mubr.f32.mxu1 %v708_v1  ;;  %v709_v13 = vmax.f32 %v615_v4, 0.0 }
 0x19e   : > { %v620_v9 = vpop.f32.mrf.mxu0  ;;  %944 = vmatmul.mubr.f32.gmra.mxu1 %v707_v3 }
 0x19f   : > { %v710_v11 = vmax.f32 %v617_v8, 0.0  ;;  %v621_v15 = vadd.f32 %v620_v9, %v2392_v40 }
 0x1a0   : > { %v622_v17 = vpop.f32.mrf.mxu0 }
 0x1a1   : > { %v623_v18 = vadd.f32 %v622_v17, %v2394_v41  ;;  %948 = vmatprep.mubr.f32.mxu1 %v710_v11  ;;  %v711_v35 = vmax.f32 %v621_v15, 0.0 }
 0x1a2   : > { %v626_v20 = vpop.f32.mrf.mxu0  ;;  %949 = vmatmul.mubr.f32.gmra.mxu1 %v709_v13 }
 0x1a3   : > { %v712_v34 = vmax.f32 %v623_v18, 0.0  ;;  %v627_v36 = vadd.f32 %v626_v20, %v2392_v40 }
 0x1a4   : > { %v628_v37 = vpop.f32.mrf.mxu0 }
 0x1a5   : > { %v629_v38 = vadd.f32 %v628_v37, %v2394_v41  ;;  %953 = vmatprep.mubr.f32.mxu1 %v712_v34  ;;  %v713_v0 = vmax.f32 %v627_v36, 0.0 }
 0x1a6   : > { %v632_v43 = vpop.f32.mrf.mxu0  ;;  %954 = vmatmul.mubr.f32.gmra.mxu1 %v711_v35 }
 0x1a7   : > { %v714_v44 = vmax.f32 %v629_v38, 0.0  ;;  %v633_v46 = vadd.f32 %v632_v43, %v2392_v40  ;;  %v2463_v43 = vld [vmem:[%s2981_s4] ss:$0 sm:$0xff] }
 0x1a8   : > { %v634_v47 = vpop.f32.mrf.mxu0 }
 0x1a9   : > { %v635_v49 = vadd.f32 %v634_v47, %v2394_v41  ;;  %958 = vmatprep.mubr.f32.mxu1 %v714_v44  ;;  %v715_v53 = vmax.f32 %v633_v46, 0.0 }
 0x1aa   : > { %v638_v50 = vpop.f32.mrf.mxu0  ;;  %959 = vmatmul.mubr.f32.gmra.mxu1 %v713_v0 }
 0x1ab   : > { %v716_v52 = vmax.f32 %v635_v49, 0.0  ;;  %v639_v55 = vadd.f32 %v638_v50, %v2392_v40 }
 0x1ac   : > { %v640_v56 = vpop.f32.mrf.mxu0 }
 0x1ad   : > { %v641_v58 = vadd.f32 %v640_v56, %v2394_v41  ;;  %963 = vmatprep.mubr.f32.mxu1 %v716_v52  ;;  %v717_v62 = vmax.f32 %v639_v55, 0.0  ;;  %v1816_v52 = vld [vmem:[%s2157_s11 + $0x8] sm:$0xff] }
 0x1ae   : > { %v644_v59 = vpop.f32.mrf.mxu0  ;;  %964 = vmatmul.mubr.f32.gmra.mxu1 %v715_v53 }
 0x1af   : > { %v718_v61 = vmax.f32 %v641_v58, 0.0  ;;  %v645_v1 = vadd.f32 %v644_v59, %v2392_v40 }
 0x1b0   : > { %v646_v3 = vpop.f32.mrf.mxu0 }
 0x1b1   : > { %v647_v4 = vadd.f32 %v646_v3, %v2394_v41  ;;  %968 = vmatprep.mubr.f32.mxu1 %v718_v61  ;;  %v719_v9 = vmax.f32 %v645_v1, 0.0 }
 0x1b2   : > { %v650_v6 = vpop.f32.mrf.mxu0  ;;  %969 = vmatmul.mubr.f32.gmra.mxu1 %v717_v62 }
 0x1b3   : > { %v720_v8 = vmax.f32 %v647_v4, 0.0  ;;  %v651_v11 = vadd.f32 %v650_v6, %v2392_v40 }
 0x1b4   : > { %v652_v13 = vpop.f32.mrf.mxu0 }
 0x1b5   : > { %v653_v15 = vadd.f32 %v652_v13, %v2394_v41  ;;  %973 = vmatprep.mubr.f32.mxu1 %v720_v8  ;;  %v721_v20 = vmax.f32 %v651_v11, 0.0 }
 0x1b6   : > { %v656_v17 = vpop.f32.mrf.mxu0  ;;  %974 = vmatmul.mubr.f32.gmra.mxu1 %v719_v9 }
 0x1b7   : > { %v722_v18 = vmax.f32 %v653_v15, 0.0  ;;  %v657_v34 = vadd.f32 %v656_v17, %v2392_v40  ;;  %v1815_v40 = vld [vmem:[%s2157_s11] sm:$0xff]  ;;  %s2930_s11 = scalar_lea.hbm %s2984_s7, %s1612_s21 }
 0x1b8   : > { %v658_v35 = vpop.f32.mrf.mxu0 }
 0x1b9   : > { %v659_v36 = vadd.f32 %v658_v35, %v2394_v41  ;;  %978 = vmatprep.mubr.f32.mxu1 %v722_v18  ;;  %v723_v38 = vmax.f32 %v657_v34, 0.0 }
 0x1ba   : > { %979 = vmatmul.mubr.f32.gmra.mxu1 %v721_v20 }
 0x1bb   : > { %v724_v37 = vmax.f32 %v659_v36, 0.0 }
 0x1bd   : > { %983 = vmatprep.mubr.f32.mxu1 %v724_v37 }
 0x1be   : > { %984 = vmatmul.mubr.f32.gmra.mxu1 %v723_v38 }
 0x202   : > { %v830_v44 = vpop.f32.mrf.mxu0 }
 0x203   : > { %v831_v0 = vadd.f32 %v2463_v43, %v830_v44 }
 0x204   : > { %v832_v46 = vpop.f32.mrf.mxu0 }
 0x205   : > { %v2467_v47 = vadd.f32 %v1815_v40, %v831_v0 }
 0x206   : > { %v835_v41 = vpop.f32.mrf.mxu0 }
 0x207   : > { %v836_v49 = vadd.f32 %v2463_v43, %v835_v41  ;;  %1021 = vadd.xlane.f32.xlu0 %v2467_v47 }
 0x208   : > { %v837_v50 = vpop.f32.mrf.mxu0 }
 0x209   : > { %v2472_v53 = vadd.f32 %v1816_v52, %v836_v49 }
 0x20a   : > { %v840_v55 = vpop.f32.mrf.mxu0 }
 0x20b   : > { %v841_v56 = vadd.f32 %v2463_v43, %v840_v55  ;;  %1023 = vadd.xlane.f32.xlu0 %v2472_v53 }
 0x20c   : > { %v842_v58 = vpop.f32.mrf.mxu0 }
 0x20d   : > { %v2477_v59 = vadd.f32 %v841_v56, %v2179_v39 }
 0x20e   : > { %v845_v61 = vpop.f32.mrf.mxu0 }
 0x20f   : > { %v846_v62 = vadd.f32 %v2463_v43, %v845_v61  ;;  %1025 = vadd.xlane.f32.xlu1 %v2477_v59 }
 0x210   : > { %v847_v1 = vpop.f32.mrf.mxu0 }
 0x211   : > { %v2482_v3 = vadd.f32 %v846_v62, %v2187_v42 }
 0x212   : > { %v850_v4 = vpop.f32.mrf.mxu1 }
 0x213   : > { %v851_v6 = vadd.f32 %v2463_v43, %v850_v4  ;;  %1027 = vadd.xlane.f32.xlu1 %v2482_v3 }
 0x214   : > { %v852_v8 = vpop.f32.mrf.mxu1 }
 0x215   : > { %v2487_v9 = vadd.f32 %v851_v6, %v2195_v45 }
 0x216   : > { %v855_v39 = vpop.f32.mrf.mxu1 }
 0x217   : > { %v856_v11 = vadd.f32 %v2463_v43, %v855_v39  ;;  %1029 = vadd.xlane.f32.xlu0 %v2487_v9 }
 0x218   : > { %v857_v13 = vpop.f32.mrf.mxu1 }
 0x219   : > { %v2492_v15 = vadd.f32 %v856_v11, %v2203_v48 }
 0x21a   : > { %v860_v42 = vpop.f32.mrf.mxu1 }
 0x21b   : > { %v861_v17 = vadd.f32 %v2463_v43, %v860_v42  ;;  %1031 = vadd.xlane.f32.xlu1 %v2492_v15 }
 0x21c   : > { %v862_v18 = vpop.f32.mrf.mxu1 }
 0x21d   : > { %v2497_v20 = vadd.f32 %v861_v17, %v2211_v51 }
 0x21e   : > { %v865_v45 = vpop.f32.mrf.mxu1 }
 0x21f   : > { %v866_v34 = vadd.f32 %v2463_v43, %v865_v45  ;;  %1033 = vadd.xlane.f32.xlu0 %v2497_v20 }
 0x220   : > { %v867_v35 = vpop.f32.mrf.mxu1 }
 0x221   : > { %v2502_v36 = vadd.f32 %v866_v34, %v2219_v54 }
 0x222   : > { %v870_v48 = vpop.f32.mrf.mxu1 }
 0x223   : > { %v871_v37 = vadd.f32 %v2463_v43, %v870_v48  ;;  %1035 = vadd.xlane.f32.xlu1 %v2502_v36 }
 0x224   : > { %v872_v38 = vpop.f32.mrf.mxu1 }
 0x225   : > { %v2507_v44 = vadd.f32 %v871_v37, %v2227_v57 }
 0x226   : > { %v875_v51 = vpop.f32.mrf.mxu1 }
 0x227   : > { %v876_v0 = vadd.f32 %v2463_v43, %v875_v51  ;;  %1037 = vadd.xlane.f32.xlu0 %v2507_v44 }
 0x228   : > { %v877_v46 = vpop.f32.mrf.mxu1 }
 0x229   : > { %v2512_v40 = vadd.f32 %v876_v0, %v2235_v60 }
 0x22a   : > { %v880_v54 = vpop.f32.mrf.mxu1 }
 0x22b   : > { %v881_v41 = vadd.f32 %v2463_v43, %v880_v54  ;;  %1039 = vadd.xlane.f32.xlu1 %v2512_v40 }
 0x22c   : > { %v882_v49 = vpop.f32.mrf.mxu1 }
 0x22d   : > { %v2517_v50 = vadd.f32 %v881_v41, %v2243_v63 }
 0x22e   : > { %v885_v57 = vpop.f32.mrf.mxu1 }
 0x22f   : > { %v886_v52 = vadd.f32 %v2463_v43, %v885_v57  ;;  %1041 = vadd.xlane.f32.xlu0 %v2517_v50 }
 0x230   : > { %v887_v55 = vpop.f32.mrf.mxu1 }
 0x231   : > { %v2522_v56 = vadd.f32 %v886_v52, %v2251_v2 }
 0x232   : > { %v890_v60 = vpop.f32.mrf.mxu1 }
 0x233   : > { %v891_v58 = vadd.f32 %v2463_v43, %v890_v60  ;;  %1043 = vadd.xlane.f32.xlu1 %v2522_v56 }
 0x234   : > { %v892_v61 = vpop.f32.mrf.mxu1 }
 0x235   : > { %v2527_v62 = vadd.f32 %v891_v58, %v2261_v5 }
 0x236   : > { %v895_v63 = vpop.f32.mrf.mxu1 }
 0x237   : > { %v896_v1 = vadd.f32 %v2463_v43, %v895_v63  ;;  %1045 = vadd.xlane.f32.xlu0 %v2527_v62 }
 0x238   : > { %v897_v4 = vpop.f32.mrf.mxu1 }
 0x239   : > { %v2532_v6 = vadd.f32 %v896_v1, %v2270_v7 }
 0x23a   : > { %v900_v2 = vpop.f32.mrf.mxu1 }
 0x23b   : > { %v901_v8 = vadd.f32 %v2463_v43, %v900_v2  ;;  %1047 = vadd.xlane.f32.xlu1 %v2532_v6 }
 0x23c   : > { %v902_v39 = vpop.f32.mrf.mxu1 }
 0x23d   : > { %v2537_v11 = vadd.f32 %v901_v8, %v2278_v10 }
 0x23e   : > { %v905_v5 = vpop.f32.mrf.mxu1 }
 0x23f   : > { %v906_v13 = vadd.f32 %v2463_v43, %v905_v5  ;;  %1049 = vadd.xlane.f32.xlu0 %v2537_v11 }
 0x240   : > { %v907_v42 = vpop.f32.mrf.mxu1 }
 0x241   : > { %v2542_v17 = vadd.f32 %v906_v13, %v2286_v12 }
 0x242   : > { %v910_v7 = vpop.f32.mrf.mxu1 }
 0x243   : > { %v911_v18 = vadd.f32 %v2463_v43, %v910_v7  ;;  %1051 = vadd.xlane.f32.xlu1 %v2542_v17 }
 0x244   : > { %v912_v45 = vpop.f32.mrf.mxu1 }
 0x245   : > { %v2547_v34 = vadd.f32 %v911_v18, %v2294_v14 }
 0x246   : > { %v915_v10 = vpop.f32.mrf.mxu1 }
 0x247   : > { %v916_v35 = vadd.f32 %v2463_v43, %v915_v10  ;;  %1053 = vadd.xlane.f32.xlu0 %v2547_v34 }
 0x248   : > { %v917_v48 = vpop.f32.mrf.mxu1 }
 0x249   : > { %v2552_v37 = vadd.f32 %v916_v35, %v2302_v16 }
 0x24a   : > { %v920_v12 = vpop.f32.mrf.mxu1 }
 0x24b   : > { %v921_v38 = vadd.f32 %v2463_v43, %v920_v12  ;;  %1055 = vadd.xlane.f32.xlu1 %v2552_v37 }
 0x24c   : > { %v922_v51 = vpop.f32.mrf.mxu1 }
 0x24d   : > { %v2557_v0 = vadd.f32 %v921_v38, %v2310_v19 }
 0x24e   : > { %v925_v14 = vpop.f32.mrf.mxu1 }
 0x24f   : > { %v926_v46 = vadd.f32 %v2463_v43, %v925_v14  ;;  %1057 = vadd.xlane.f32.xlu0 %v2557_v0 }
 0x250   : > { %v927_v54 = vpop.f32.mrf.mxu1 }
 0x251   : > { %v2562_v41 = vadd.f32 %v926_v46, %v2319_v21 }
 0x252   : > { %v930_v16 = vpop.f32.mrf.mxu1 }
 0x253   : > { %v931_v49 = vadd.f32 %v2463_v43, %v930_v16  ;;  %1059 = vadd.xlane.f32.xlu1 %v2562_v41 }
 0x254   : > { %v932_v57 = vpop.f32.mrf.mxu1 }
 0x255   : > { %v2567_v52 = vadd.f32 %v931_v49, %v2325_v22 }
 0x256   : > { %v935_v19 = vpop.f32.mrf.mxu1 }
 0x257   : > { %v936_v55 = vadd.f32 %v2463_v43, %v935_v19  ;;  %1061 = vadd.xlane.f32.xlu0 %v2567_v52 }
 0x258   : > { %v937_v60 = vpop.f32.mrf.mxu1 }
 0x259   : > { %v2572_v58 = vadd.f32 %v936_v55, %v2332_v23 }
 0x25a   : > { %v940_v21 = vpop.f32.mrf.mxu1 }
 0x25b   : > { %v941_v61 = vadd.f32 %v2463_v43, %v940_v21  ;;  %1063 = vadd.xlane.f32.xlu1 %v2572_v58 }
 0x25c   : > { %v942_v63 = vpop.f32.mrf.mxu1 }
 0x25d   : > { %v2577_v1 = vadd.f32 %v941_v61, %v2339_v24 }
 0x25e   : > { %v945_v22 = vpop.f32.mrf.mxu1 }
 0x25f   : > { %v946_v4 = vadd.f32 %v2463_v43, %v945_v22  ;;  %1065 = vadd.xlane.f32.xlu0 %v2577_v1 }
 0x260   : > { %v947_v2 = vpop.f32.mrf.mxu1 }
 0x261   : > { %v2582_v8 = vadd.f32 %v946_v4, %v2346_v25 }
 0x262   : > { %v950_v23 = vpop.f32.mrf.mxu1 }
 0x263   : > { %v951_v39 = vadd.f32 %v2463_v43, %v950_v23  ;;  %1067 = vadd.xlane.f32.xlu1 %v2582_v8 }
 0x264   : > { %v952_v5 = vpop.f32.mrf.mxu1 }
 0x265   : > { %v2587_v13 = vadd.f32 %v951_v39, %v2351_v26 }
 0x266   : > { %v955_v24 = vpop.f32.mrf.mxu1 }
 0x267   : > { %v956_v42 = vadd.f32 %v2463_v43, %v955_v24  ;;  %1069 = vadd.xlane.f32.xlu0 %v2587_v13 }
 0x268   : > { %v957_v7 = vpop.f32.mrf.mxu1 }
 0x269   : > { %v2592_v18 = vadd.f32 %v956_v42, %v2356_v27 }
 0x26a   : > { %v960_v25 = vpop.f32.mrf.mxu1 }
 0x26b   : > { %v961_v45 = vadd.f32 %v2463_v43, %v960_v25  ;;  %1071 = vadd.xlane.f32.xlu1 %v2592_v18 }
 0x26c   : > { %v962_v10 = vpop.f32.mrf.mxu1 }
 0x26d   : > { %v2597_v35 = vadd.f32 %v961_v45, %v2361_v28 }
 0x26e   : > { %v965_v26 = vpop.f32.mrf.mxu1 }
 0x26f   : > { %v966_v48 = vadd.f32 %v2463_v43, %v965_v26  ;;  %1073 = vadd.xlane.f32.xlu0 %v2597_v35 }
 0x270   : > { %v967_v12 = vpop.f32.mrf.mxu1 }
 0x271   : > { %v2602_v38 = vadd.f32 %v966_v48, %v2366_v29 }
 0x272   : > { %v970_v27 = vpop.f32.mrf.mxu1 }
 0x273   : > { %v971_v51 = vadd.f32 %v2463_v43, %v970_v27  ;;  %1075 = vadd.xlane.f32.xlu1 %v2602_v38 }
 0x274   : > { %v972_v14 = vpop.f32.mrf.mxu1 }
 0x275   : > { %v2607_v46 = vadd.f32 %v971_v51, %v2371_v30 }
 0x276   : > { %v975_v28 = vpop.f32.mrf.mxu1 }
 0x277   : > { %v976_v54 = vadd.f32 %v2463_v43, %v975_v28  ;;  %1077 = vadd.xlane.f32.xlu0 %v2607_v46 }
 0x278   : > { %v977_v16 = vpop.f32.mrf.mxu1 }
 0x279   : > { %v2612_v49 = vadd.f32 %v976_v54, %v2376_v31 }
 0x27a   : > { %v980_v29 = vpop.f32.mrf.mxu1 }
 0x27b   : > { %v981_v57 = vadd.f32 %v2463_v43, %v980_v29  ;;  %1079 = vadd.xlane.f32.xlu1 %v2612_v49 }
 0x27c   : > { %v982_v19 = vpop.f32.mrf.mxu1 }
 0x27d   : > { %v2617_v55 = vadd.f32 %v981_v57, %v2381_v32 }
 0x27e   : > { %v985_v30 = vpop.f32.mrf.mxu1 }
 0x27f   : > { %v986_v60 = vadd.f32 %v2463_v43, %v985_v30  ;;  %1081 = vadd.xlane.f32.xlu0 %v2617_v55 }
 0x280   : > { %v987_v21 = vpop.f32.mrf.mxu1 }
 0x281   : > { %v2622_v61 = vadd.f32 %v986_v60, %v2386_v33 }
 0x283   : > { %1083 = vadd.xlane.f32.xlu1 %v2622_v61 }
 0x290   : > { %v1022_v31 = vpop.xlane.xlu0 %1021 }
 0x291   : > { %v1086_v63 = vmul.f32 0.0078125, %v1022_v31 }
 0x293   : > { %v2626_v22 = vsub.f32 %v2467_v47, %v1086_v63 }
 0x294   : > { %v1024_v4 = vpop.xlane.xlu0 %1023 }
 0x295   : > { %v1087_v2 = vmul.f32 0.0078125, %v1024_v4  ;;  %v1150_v32 = vmul.f32 %v2626_v22, %v2626_v22 }
 0x297   : > { %v2631_v43 = vsub.f32 %v2472_v53, %v1087_v2  ;;  %1182 = vadd.xlane.f32.xlu0 %v1150_v32 }
 0x298   : > { %v1026_v23 = vpop.xlane.xlu1 %1025 }
 0x299   : > { %v1088_v39 = vmul.f32 0.0078125, %v1026_v23  ;;  %v1151_v33 = vmul.f32 %v2631_v43, %v2631_v43 }
 0x29b   : > { %v2636_v5 = vsub.f32 %v2477_v59, %v1088_v39  ;;  %1184 = vadd.xlane.f32.xlu1 %v1151_v33 }
 0x29c   : > { %v1028_v47 = vpop.xlane.xlu1 %1027 }
 0x29d   : > { %v1089_v24 = vmul.f32 0.0078125, %v1028_v47  ;;  %v1152_v42 = vmul.f32 %v2636_v5, %v2636_v5 }
 0x29f   : > { %v2641_v7 = vsub.f32 %v2482_v3, %v1089_v24  ;;  %1186 = vadd.xlane.f32.xlu0 %v1152_v42 }
 0x2a0   : > { %v1030_v53 = vpop.xlane.xlu0 %1029 }
 0x2a1   : > { %v1090_v25 = vmul.f32 0.0078125, %v1030_v53  ;;  %v1153_v45 = vmul.f32 %v2641_v7, %v2641_v7 }
 0x2a3   : > { %v2646_v10 = vsub.f32 %v2487_v9, %v1090_v25  ;;  %1188 = vadd.xlane.f32.xlu1 %v1153_v45 }
 0x2a4   : > { %v1032_v59 = vpop.xlane.xlu1 %1031 }
 0x2a5   : > { %v1091_v26 = vmul.f32 0.0078125, %v1032_v59  ;;  %v1154_v48 = vmul.f32 %v2646_v10, %v2646_v10 }
 0x2a7   : > { %v2651_v12 = vsub.f32 %v2492_v15, %v1091_v26  ;;  %1190 = vadd.xlane.f32.xlu0 %v1154_v48 }
 0x2a8   : > { %v1034_v3 = vpop.xlane.xlu0 %1033 }
 0x2a9   : > { %v1092_v27 = vmul.f32 0.0078125, %v1034_v3  ;;  %v1155_v51 = vmul.f32 %v2651_v12, %v2651_v12 }
 0x2ab   : > { %v2656_v14 = vsub.f32 %v2497_v20, %v1092_v27  ;;  %1192 = vadd.xlane.f32.xlu1 %v1155_v51 }
 0x2ac   : > { %v1036_v9 = vpop.xlane.xlu1 %1035 }
 0x2ad   : > { %v1093_v28 = vmul.f32 0.0078125, %v1036_v9  ;;  %v1156_v54 = vmul.f32 %v2656_v14, %v2656_v14 }
 0x2af   : > { %v2661_v16 = vsub.f32 %v2502_v36, %v1093_v28  ;;  %1194 = vadd.xlane.f32.xlu0 %v1156_v54 }
 0x2b0   : > { %v1038_v15 = vpop.xlane.xlu0 %1037 }
 0x2b1   : > { %v1094_v29 = vmul.f32 0.0078125, %v1038_v15  ;;  %v1157_v57 = vmul.f32 %v2661_v16, %v2661_v16 }
 0x2b3   : > { %v2666_v19 = vsub.f32 %v2507_v44, %v1094_v29  ;;  %1196 = vadd.xlane.f32.xlu1 %v1157_v57 }
 0x2b4   : > { %v1040_v20 = vpop.xlane.xlu1 %1039 }
 0x2b5   : > { %v1095_v30 = vmul.f32 0.0078125, %v1040_v20  ;;  %v1158_v60 = vmul.f32 %v2666_v19, %v2666_v19 }
 0x2b7   : > { %v2671_v21 = vsub.f32 %v2512_v40, %v1095_v30  ;;  %1198 = vadd.xlane.f32.xlu0 %v1158_v60 }
 0x2b8   : > { %v1042_v36 = vpop.xlane.xlu0 %1041 }
 0x2b9   : > { %v1096_v31 = vmul.f32 0.0078125, %v1042_v36  ;;  %v1159_v63 = vmul.f32 %v2671_v21, %v2671_v21 }
 0x2bb   : > { %v2676_v4 = vsub.f32 %v2517_v50, %v1096_v31  ;;  %1200 = vadd.xlane.f32.xlu1 %v1159_v63 }
 0x2bc   : > { %v1044_v44 = vpop.xlane.xlu1 %1043 }
 0x2bd   : > { %v1097_v2 = vmul.f32 0.0078125, %v1044_v44  ;;  %v1160_v32 = vmul.f32 %v2676_v4, %v2676_v4 }
 0x2bf   : > { %v2681_v23 = vsub.f32 %v2522_v56, %v1097_v2  ;;  %1202 = vadd.xlane.f32.xlu0 %v1160_v32 }
 0x2c0   : > { %v1046_v40 = vpop.xlane.xlu0 %1045 }
 0x2c1   : > { %v1098_v39 = vmul.f32 0.0078125, %v1046_v40  ;;  %v1161_v33 = vmul.f32 %v2681_v23, %v2681_v23 }
 0x2c3   : > { %v2686_v47 = vsub.f32 %v2527_v62, %v1098_v39  ;;  %1204 = vadd.xlane.f32.xlu1 %v1161_v33 }
 0x2c4   : > { %v1048_v50 = vpop.xlane.xlu1 %1047 }
 0x2c5   : > { %v1099_v24 = vmul.f32 0.0078125, %v1048_v50  ;;  %v1162_v42 = vmul.f32 %v2686_v47, %v2686_v47 }
 0x2c7   : > { %v2691_v53 = vsub.f32 %v2532_v6, %v1099_v24  ;;  %1206 = vadd.xlane.f32.xlu0 %v1162_v42 }
 0x2c8   : > { %v1050_v56 = vpop.xlane.xlu0 %1049 }
 0x2c9   : > { %v1100_v25 = vmul.f32 0.0078125, %v1050_v56  ;;  %v1163_v45 = vmul.f32 %v2691_v53, %v2691_v53 }
 0x2cb   : > { %v2696_v59 = vsub.f32 %v2537_v11, %v1100_v25  ;;  %1208 = vadd.xlane.f32.xlu1 %v1163_v45 }
 0x2cc   : > { %v1052_v62 = vpop.xlane.xlu1 %1051 }
 0x2cd   : > { %v1101_v26 = vmul.f32 0.0078125, %v1052_v62  ;;  %v1164_v48 = vmul.f32 %v2696_v59, %v2696_v59 }
 0x2cf   : > { %v2701_v3 = vsub.f32 %v2542_v17, %v1101_v26  ;;  %1210 = vadd.xlane.f32.xlu0 %v1164_v48 }
 0x2d0   : > { %v1054_v6 = vpop.xlane.xlu0 %1053 }
 0x2d1   : > { %v1102_v27 = vmul.f32 0.0078125, %v1054_v6  ;;  %v1165_v51 = vmul.f32 %v2701_v3, %v2701_v3 }
 0x2d3   : > { %v2706_v9 = vsub.f32 %v2547_v34, %v1102_v27  ;;  %1212 = vadd.xlane.f32.xlu1 %v1165_v51 }
 0x2d4   : > { %v1056_v11 = vpop.xlane.xlu1 %1055 }
 0x2d5   : > { %v1103_v28 = vmul.f32 0.0078125, %v1056_v11  ;;  %v1166_v54 = vmul.f32 %v2706_v9, %v2706_v9 }
 0x2d7   : > { %v2711_v15 = vsub.f32 %v2552_v37, %v1103_v28  ;;  %1214 = vadd.xlane.f32.xlu0 %v1166_v54 }
 0x2d8   : > { %v1058_v17 = vpop.xlane.xlu0 %1057 }
 0x2d9   : > { %v1104_v29 = vmul.f32 0.0078125, %v1058_v17  ;;  %v1167_v57 = vmul.f32 %v2711_v15, %v2711_v15 }
 0x2db   : > { %v2716_v20 = vsub.f32 %v2557_v0, %v1104_v29  ;;  %1216 = vadd.xlane.f32.xlu1 %v1167_v57 }
 0x2dc   : > { %v1060_v34 = vpop.xlane.xlu1 %1059 }
 0x2dd   : > { %v1105_v30 = vmul.f32 0.0078125, %v1060_v34  ;;  %v1168_v60 = vmul.f32 %v2716_v20, %v2716_v20 }
 0x2df   : > { %v2721_v36 = vsub.f32 %v2562_v41, %v1105_v30  ;;  %1218 = vadd.xlane.f32.xlu0 %v1168_v60 }
 0x2e0   : > { %v1062_v37 = vpop.xlane.xlu0 %1061 }
 0x2e1   : > { %v1106_v31 = vmul.f32 0.0078125, %v1062_v37  ;;  %v1169_v63 = vmul.f32 %v2721_v36, %v2721_v36 }
 0x2e3   : > { %v2726_v44 = vsub.f32 %v2567_v52, %v1106_v31  ;;  %1220 = vadd.xlane.f32.xlu1 %v1169_v63 }
 0x2e4   : > { %v1064_v0 = vpop.xlane.xlu1 %1063 }
 0x2e5   : > { %v1107_v2 = vmul.f32 0.0078125, %v1064_v0  ;;  %v1170_v32 = vmul.f32 %v2726_v44, %v2726_v44 }
 0x2e7   : > { %v2731_v40 = vsub.f32 %v2572_v58, %v1107_v2  ;;  %1222 = vadd.xlane.f32.xlu0 %v1170_v32 }
 0x2e8   : > { %v1066_v41 = vpop.xlane.xlu0 %1065 }
 0x2e9   : > { %v1108_v39 = vmul.f32 0.0078125, %v1066_v41  ;;  %v1171_v33 = vmul.f32 %v2731_v40, %v2731_v40 }
 0x2eb   : > { %v2736_v50 = vsub.f32 %v2577_v1, %v1108_v39  ;;  %1224 = vadd.xlane.f32.xlu1 %v1171_v33 }
 0x2ec   : > { %v1068_v52 = vpop.xlane.xlu1 %1067 }
 0x2ed   : > { %v1109_v24 = vmul.f32 0.0078125, %v1068_v52  ;;  %v1172_v42 = vmul.f32 %v2736_v50, %v2736_v50 }
 0x2ef   : > { %v2741_v56 = vsub.f32 %v2582_v8, %v1109_v24  ;;  %1226 = vadd.xlane.f32.xlu0 %v1172_v42 }
 0x2f0   : > { %v1070_v58 = vpop.xlane.xlu0 %1069 }
 0x2f1   : > { %v1110_v25 = vmul.f32 0.0078125, %v1070_v58  ;;  %v1173_v45 = vmul.f32 %v2741_v56, %v2741_v56 }
 0x2f3   : > { %v2746_v62 = vsub.f32 %v2587_v13, %v1110_v25  ;;  %1228 = vadd.xlane.f32.xlu1 %v1173_v45 }
 0x2f4   : > { %v1072_v1 = vpop.xlane.xlu1 %1071 }
 0x2f5   : > { %v1111_v26 = vmul.f32 0.0078125, %v1072_v1  ;;  %v1174_v48 = vmul.f32 %v2746_v62, %v2746_v62 }
 0x2f7   : > { %v2751_v6 = vsub.f32 %v2592_v18, %v1111_v26  ;;  %1230 = vadd.xlane.f32.xlu0 %v1174_v48 }
 0x2f8   : > { %v1074_v8 = vpop.xlane.xlu0 %1073 }
 0x2f9   : > { %v1112_v27 = vmul.f32 0.0078125, %v1074_v8  ;;  %v1175_v51 = vmul.f32 %v2751_v6, %v2751_v6 }
 0x2fb   : > { %v2756_v11 = vsub.f32 %v2597_v35, %v1112_v27  ;;  %1232 = vadd.xlane.f32.xlu1 %v1175_v51  ;;  %v2788_v51 = vld [vmem:[%s2982_s5] ss:$0 sm:$0xff] }
 0x2fc   : > { %v1076_v13 = vpop.xlane.xlu1 %1075 }
 0x2fd   : > { %v1113_v28 = vmul.f32 0.0078125, %v1076_v13  ;;  %v1176_v54 = vmul.f32 %v2756_v11, %v2756_v11 }
 0x2ff   : > { %v2761_v17 = vsub.f32 %v2602_v38, %v1113_v28  ;;  %1234 = vadd.xlane.f32.xlu0 %v1176_v54  ;;  %v2794_v54 = vld [vmem:[%s2983_s6] ss:$0 sm:$0xff] }
 0x300   : > { %v1078_v18 = vpop.xlane.xlu0 %1077 }
 0x301   : > { %v1114_v29 = vmul.f32 0.0078125, %v1078_v18  ;;  %v1177_v57 = vmul.f32 %v2761_v17, %v2761_v17 }
 0x303   : > { %v2766_v34 = vsub.f32 %v2607_v46, %v1114_v29  ;;  %1236 = vadd.xlane.f32.xlu1 %v1177_v57 }
 0x304   : > { %v1080_v35 = vpop.xlane.xlu1 %1079 }
 0x305   : > { %v1115_v30 = vmul.f32 0.0078125, %v1080_v35  ;;  %v1178_v60 = vmul.f32 %v2766_v34, %v2766_v34 }
 0x307   : > { %v2771_v37 = vsub.f32 %v2612_v49, %v1115_v30  ;;  %1238 = vadd.xlane.f32.xlu0 %v1178_v60 }
 0x308   : > { %v1082_v38 = vpop.xlane.xlu0 %1081 }
 0x309   : > { %v1116_v31 = vmul.f32 0.0078125, %v1082_v38  ;;  %v1179_v63 = vmul.f32 %v2771_v37, %v2771_v37 }
 0x30b   : > { %v2776_v0 = vsub.f32 %v2617_v55, %v1116_v31  ;;  %1240 = vadd.xlane.f32.xlu1 %v1179_v63 }
 0x30c   : > { %v1084_v46 = vpop.xlane.xlu1 %1083 }
 0x30d   : > { %v1117_v2 = vmul.f32 0.0078125, %v1084_v46  ;;  %v1180_v32 = vmul.f32 %v2776_v0, %v2776_v0 }
 0x30f   : > { %v2781_v41 = vsub.f32 %v2622_v61, %v1117_v2  ;;  %1242 = vadd.xlane.f32.xlu0 %v1180_v32 }
 0x311   : > { %v1181_v49 = vmul.f32 %v2781_v41, %v2781_v41 }
 0x313   : > { %1244 = vadd.xlane.f32.xlu1 %v1181_v49 }
 0x320   : > { %v1183_v39 = vpop.xlane.xlu0 %1182 }
 0x321   : > { %v1246_v33 = vmul.f32 0.0078125, %v1183_v39 }
 0x323   : > { %v1278_v52 = vadd.f32 1e-05, %v1246_v33 }
 0x324   : > { %v1185_v24 = vpop.xlane.xlu1 %1184 }
 0x325   : > { %1751 = vrsqrt.f32 %v1278_v52  ;;  %v1247_v55 = vmul.f32 0.0078125, %v1185_v24 }
 0x327   : > { %v1279_v42 = vadd.f32 1e-05, %v1247_v55 }
 0x328   : > { %v1187_v58 = vpop.xlane.xlu0 %1186 }
 0x329   : > { %1753 = vrsqrt.f32 %v1279_v42  ;;  %v1248_v25 = vmul.f32 0.0078125, %v1187_v58 }
 0x32b   : > { %v1280_v45 = vadd.f32 1e-05, %v1248_v25 }
 0x32c   : > { %v1189_v1 = vpop.xlane.xlu1 %1188 }
 0x32d   : > { %1755 = vrsqrt.f32 %v1280_v45  ;;  %v1249_v61 = vmul.f32 0.0078125, %v1189_v1 }
 0x32f   : > { %v1281_v26 = vadd.f32 1e-05, %v1249_v61 }
 0x330   : > { %v1191_v48 = vpop.xlane.xlu0 %1190 }
 0x331   : > { %1757 = vrsqrt.f32 %v1281_v26  ;;  %v1250_v8 = vmul.f32 0.0078125, %v1191_v48 }
 0x332   : > { %v1752_v27 = vpop.eup %1751 }
 0x333   : > { %v1342_v13 = vmul.f32 %v1752_v27, %v2626_v22  ;;  %v1282_v28 = vadd.f32 1e-05, %v1250_v8 }
 0x334   : > { %v1193_v18 = vpop.xlane.xlu1 %1192 }
 0x335   : > { %v1381_v29 = vmul.f32 %v2788_v51, %v1342_v13  ;;  %1759 = vrsqrt.f32 %v1282_v28  ;;  %v1251_v57 = vmul.f32 0.0078125, %v1193_v18 }
 0x336   : > { %v1754_v35 = vpop.eup %1753 }
 0x337   : > { %v1420_v30 = vadd.f32 %v2794_v54, %v1381_v29  ;;  %v1343_v60 = vmul.f32 %v1754_v35, %v2631_v43  ;;  %v1283_v38 = vadd.f32 1e-05, %v1251_v57 }
 0x338   : > { %v1195_v31 = vpop.xlane.xlu0 %1194 }
 0x339   : > { %1452 = vst [vmem:[%s2801_s14] sm:$0xff] %v1420_v30  ;;  %v1382_v22 = vmul.f32 %v2788_v51, %v1343_v60  ;;  %1761 = vrsqrt.f32 %v1283_v38  ;;  %v1252_v63 = vmul.f32 0.0078125, %v1195_v31 }
 0x33a   : > { %v1756_v46 = vpop.eup %1755 }
 0x33b   : > { %v1421_v2 = vadd.f32 %v2794_v54, %v1382_v22  ;;  %v1344_v32 = vmul.f32 %v1756_v46, %v2636_v5  ;;  %v1284_v49 = vadd.f32 1e-05, %v1252_v63 }
 0x33c   : > { %v1197_v43 = vpop.xlane.xlu1 %1196 }
 0x33d   : > { %1453 = vst [vmem:[%s2801_s14 + $0x8] sm:$0xff] %v1421_v2  ;;  %v1383_v39 = vmul.f32 %v2788_v51, %v1344_v32  ;;  %1763 = vrsqrt.f32 %v1284_v49  ;;  %v1253_v33 = vmul.f32 0.0078125, %v1197_v43 }
 0x33e   : > { %v1758_v52 = vpop.eup %1757 }
 0x33f   : > { %v1422_v24 = vadd.f32 %v2794_v54, %v1383_v39  ;;  %v1345_v55 = vmul.f32 %v1758_v52, %v2641_v7  ;;  %v1285_v42 = vadd.f32 1e-05, %v1253_v33 }
 0x340   : > { %v1199_v58 = vpop.xlane.xlu0 %1198 }
 0x341   : > { %1454 = vst [vmem:[%s2801_s14 + $0x10] sm:$0xff] %v1422_v24  ;;  %v1384_v25 = vmul.f32 %v2788_v51, %v1345_v55  ;;  %1765 = vrsqrt.f32 %v1285_v42  ;;  %v1254_v5 = vmul.f32 0.0078125, %v1199_v58 }
 0x342   : > { %v1760_v45 = vpop.eup %1759 }
 0x343   : > { %v1423_v1 = vadd.f32 %v2794_v54, %v1384_v25  ;;  %v1346_v61 = vmul.f32 %v1760_v45, %v2646_v10  ;;  %v1286_v26 = vadd.f32 1e-05, %v1254_v5 }
 0x344   : > { %v1201_v48 = vpop.xlane.xlu1 %1200 }
 0x345   : > { %1455 = vst [vmem:[%s2801_s14 + $0x18] sm:$0xff] %v1423_v1  ;;  %v1385_v8 = vmul.f32 %v2788_v51, %v1346_v61  ;;  %1767 = vrsqrt.f32 %v1286_v26  ;;  %v1255_v7 = vmul.f32 0.0078125, %v1201_v48 }
 0x346   : > { %v1762_v27 = vpop.eup %1761 }
 0x347   : > { %v1424_v13 = vadd.f32 %v2794_v54, %v1385_v8  ;;  %v1347_v28 = vmul.f32 %v1762_v27, %v2651_v12  ;;  %v1287_v18 = vadd.f32 1e-05, %v1255_v7 }
 0x348   : > { %v1203_v29 = vpop.xlane.xlu0 %1202 }
 0x349   : > { %1456 = vst [vmem:[%s2801_s14 + $0x20] sm:$0xff] %v1424_v13  ;;  %v1386_v57 = vmul.f32 %v2788_v51, %v1347_v28  ;;  %1769 = vrsqrt.f32 %v1287_v18  ;;  %v1256_v10 = vmul.f32 0.0078125, %v1203_v29 }
 0x34a   : > { %v1764_v35 = vpop.eup %1763 }
 0x34b   : > { %v1425_v30 = vadd.f32 %v2794_v54, %v1386_v57  ;;  %v1348_v60 = vmul.f32 %v1764_v35, %v2656_v14  ;;  %v1288_v38 = vadd.f32 1e-05, %v1256_v10 }
 0x34c   : > { %v1205_v31 = vpop.xlane.xlu1 %1204 }
 0x34d   : > { %1457 = vst [vmem:[%s2801_s14 + $0x28] sm:$0xff] %v1425_v30  ;;  %v1387_v22 = vmul.f32 %v2788_v51, %v1348_v60  ;;  %1771 = vrsqrt.f32 %v1288_v38  ;;  %v1257_v12 = vmul.f32 0.0078125, %v1205_v31 }
 0x34e   : > { %v1766_v63 = vpop.eup %1765 }
 0x34f   : > { %v1426_v46 = vadd.f32 %v2794_v54, %v1387_v22  ;;  %v1349_v2 = vmul.f32 %v1766_v63, %v2661_v16  ;;  %v1289_v32 = vadd.f32 1e-05, %v1257_v12 }
 0x350   : > { %v1207_v49 = vpop.xlane.xlu0 %1206 }
 0x351   : > { %1458 = vst [vmem:[%s2801_s14 + $0x30] sm:$0xff] %v1426_v46  ;;  %v1388_v43 = vmul.f32 %v2788_v51, %v1349_v2  ;;  %1773 = vrsqrt.f32 %v1289_v32  ;;  %v1258_v14 = vmul.f32 0.0078125, %v1207_v49 }
 0x352   : > { %v1768_v39 = vpop.eup %1767 }
 0x353   : > { %v1427_v33 = vadd.f32 %v2794_v54, %v1388_v43  ;;  %v1350_v52 = vmul.f32 %v1768_v39, %v2666_v19  ;;  %v1290_v24 = vadd.f32 1e-05, %v1258_v14 }
 0x354   : > { %v1209_v55 = vpop.xlane.xlu1 %1208 }
 0x355   : > { %1459 = vst [vmem:[%s2801_s14 + $0x38] sm:$0xff] %v1427_v33  ;;  %v1389_v42 = vmul.f32 %v2788_v51, %v1350_v52  ;;  %1775 = vrsqrt.f32 %v1290_v24  ;;  %v1259_v16 = vmul.f32 0.0078125, %v1209_v55 }
 0x356   : > { %v1770_v58 = vpop.eup %1769 }
 0x357   : > { %v1428_v25 = vadd.f32 %v2794_v54, %v1389_v42  ;;  %v1351_v5 = vmul.f32 %v1770_v58, %v2671_v21  ;;  %v1291_v45 = vadd.f32 1e-05, %v1259_v16 }
 0x358   : > { %v1211_v1 = vpop.xlane.xlu0 %1210 }
 0x359   : > { %1460 = vst [vmem:[%s2801_s14 + $0x40] sm:$0xff] %v1428_v25  ;;  %v1390_v61 = vmul.f32 %v2788_v51, %v1351_v5  ;;  %1777 = vrsqrt.f32 %v1291_v45  ;;  %v1260_v19 = vmul.f32 0.0078125, %v1211_v1 }
 0x35a   : > { %v1772_v26 = vpop.eup %1771 }
 0x35b   : > { %v1429_v48 = vadd.f32 %v2794_v54, %v1390_v61  ;;  %v1352_v8 = vmul.f32 %v1772_v26, %v2676_v4  ;;  %v1292_v7 = vadd.f32 1e-05, %v1260_v19 }
 0x35c   : > { %v1213_v27 = vpop.xlane.xlu1 %1212 }
 0x35d   : > { %1461 = vst [vmem:[%s2801_s14 + $0x48] sm:$0xff] %v1429_v48  ;;  %v1391_v13 = vmul.f32 %v2788_v51, %v1352_v8  ;;  %1779 = vrsqrt.f32 %v1292_v7  ;;  %v1261_v21 = vmul.f32 0.0078125, %v1213_v27 }
 0x35e   : > { %v1774_v28 = vpop.eup %1773 }
 0x35f   : > { %v1430_v18 = vadd.f32 %v2794_v54, %v1391_v13  ;;  %v1353_v29 = vmul.f32 %v1774_v28, %v2681_v23  ;;  %v1293_v57 = vadd.f32 1e-05, %v1261_v21 }
 0x360   : > { %v1215_v10 = vpop.xlane.xlu0 %1214 }
 0x361   : > { %1462 = vst [vmem:[%s2801_s14 + $0x50] sm:$0xff] %v1430_v18  ;;  %v1392_v35 = vmul.f32 %v2788_v51, %v1353_v29  ;;  %1781 = vrsqrt.f32 %v1293_v57  ;;  %v1262_v4 = vmul.f32 0.0078125, %v1215_v10 }
 0x362   : > { %v1776_v30 = vpop.eup %1775 }
 0x363   : > { %v1431_v60 = vadd.f32 %v2794_v54, %v1392_v35  ;;  %v1354_v38 = vmul.f32 %v1776_v30, %v2686_v47  ;;  %v1294_v31 = vadd.f32 1e-05, %v1262_v4 }
 0x364   : > { %v1217_v22 = vpop.xlane.xlu1 %1216 }
 0x365   : > { %1463 = vst [vmem:[%s2801_s14 + $0x58] sm:$0xff] %v1431_v60  ;;  %v1393_v12 = vmul.f32 %v2788_v51, %v1354_v38  ;;  %1783 = vrsqrt.f32 %v1294_v31  ;;  %v1263_v23 = vmul.f32 0.0078125, %v1217_v22 }
 0x366   : > { %v1778_v63 = vpop.eup %1777 }
 0x367   : > { %v1432_v46 = vadd.f32 %v2794_v54, %v1393_v12  ;;  %v1355_v2 = vmul.f32 %v1778_v63, %v2691_v53  ;;  %v1295_v32 = vadd.f32 1e-05, %v1263_v23 }
 0x368   : > { %v1219_v49 = vpop.xlane.xlu0 %1218 }
 0x369   : > { %1464 = vst [vmem:[%s2801_s14 + $0x60] sm:$0xff] %v1432_v46  ;;  %v1394_v43 = vmul.f32 %v2788_v51, %v1355_v2  ;;  %1785 = vrsqrt.f32 %v1295_v32  ;;  %v1264_v47 = vmul.f32 0.0078125, %v1219_v49 }
 0x36a   : > { %v1780_v14 = vpop.eup %1779 }
 0x36b   : > { %v1433_v39 = vadd.f32 %v2794_v54, %v1394_v43  ;;  %v1356_v33 = vmul.f32 %v1780_v14, %v2696_v59  ;;  %v1296_v52 = vadd.f32 1e-05, %v1264_v47 }
 0x36c   : > { %v1221_v24 = vpop.xlane.xlu1 %1220 }
 0x36d   : > { %1465 = vst [vmem:[%s2801_s14 + $0x68] sm:$0xff] %v1433_v39  ;;  %v1395_v55 = vmul.f32 %v2788_v51, %v1356_v33  ;;  %1787 = vrsqrt.f32 %v1296_v52  ;;  %v1265_v53 = vmul.f32 0.0078125, %v1221_v24 }
 0x36e   : > { %v1782_v42 = vpop.eup %1781 }
 0x36f   : > { %v1434_v16 = vadd.f32 %v2794_v54, %v1395_v55  ;;  %v1357_v58 = vmul.f32 %v1782_v42, %v2701_v3  ;;  %v1297_v25 = vadd.f32 1e-05, %v1265_v53 }
 0x370   : > { %v1223_v5 = vpop.xlane.xlu0 %1222 }
 0x371   : > { %1466 = vst [vmem:[%s2801_s14 + $0x70] sm:$0xff] %v1434_v16  ;;  %v1396_v45 = vmul.f32 %v2788_v51, %v1357_v58  ;;  %1789 = vrsqrt.f32 %v1297_v25  ;;  %v1266_v59 = vmul.f32 0.0078125, %v1223_v5 }
 0x372   : > { %v1784_v1 = vpop.eup %1783 }
 0x373   : > { %v1435_v61 = vadd.f32 %v2794_v54, %v1396_v45  ;;  %v1358_v19 = vmul.f32 %v1784_v1, %v2706_v9  ;;  %v1298_v26 = vadd.f32 1e-05, %v1266_v59 }
 0x374   : > { %v1225_v48 = vpop.xlane.xlu1 %1224 }
 0x375   : > { %1467 = vst [vmem:[%s2801_s14 + $0x78] sm:$0xff] %v1435_v61  ;;  %v1397_v8 = vmul.f32 %v2788_v51, %v1358_v19  ;;  %1791 = vrsqrt.f32 %v1298_v26  ;;  %v1267_v3 = vmul.f32 0.0078125, %v1225_v48 }
 0x376   : > { %v1786_v7 = vpop.eup %1785 }
 0x377   : > { %v1436_v27 = vadd.f32 %v2794_v54, %v1397_v8  ;;  %v1359_v13 = vmul.f32 %v1786_v7, %v2711_v15  ;;  %v1299_v21 = vadd.f32 1e-05, %v1267_v3 }
 0x378   : > { %v1227_v28 = vpop.xlane.xlu0 %1226 }
 0x379   : > { %1468 = vst [vmem:[%s2801_s14 + $0x80] sm:$0xff] %v1436_v27  ;;  %v1398_v18 = vmul.f32 %v2788_v51, %v1359_v13  ;;  %1793 = vrsqrt.f32 %v1299_v21  ;;  %v1268_v9 = vmul.f32 0.0078125, %v1227_v28 }
 0x37a   : > { %v1788_v29 = vpop.eup %1787 }
 0x37b   : > { %v1437_v57 = vadd.f32 %v2794_v54, %v1398_v18  ;;  %v1360_v10 = vmul.f32 %v1788_v29, %v2716_v20  ;;  %v1300_v35 = vadd.f32 1e-05, %v1268_v9 }
 0x37c   : > { %v1229_v4 = vpop.xlane.xlu1 %1228 }
 0x37d   : > { %1469 = vst [vmem:[%s2801_s14 + $0x88] sm:$0xff] %v1437_v57  ;;  %v1399_v30 = vmul.f32 %v2788_v51, %v1360_v10  ;;  %1795 = vrsqrt.f32 %v1300_v35  ;;  %v1269_v15 = vmul.f32 0.0078125, %v1229_v4 }
 0x37e   : > { %v1790_v60 = vpop.eup %1789 }
 0x37f   : > { %v1438_v38 = vadd.f32 %v2794_v54, %v1399_v30  ;;  %v1361_v31 = vmul.f32 %v1790_v60, %v2721_v36  ;;  %v1301_v22 = vadd.f32 1e-05, %v1269_v15 }
 0x380   : > { %v1231_v12 = vpop.xlane.xlu0 %1230 }
 0x381   : > { %1470 = vst [vmem:[%s2801_s14 + $0x90] sm:$0xff] %v1438_v38  ;;  %v1400_v23 = vmul.f32 %v2788_v51, %v1361_v31  ;;  %1797 = vrsqrt.f32 %v1301_v22  ;;  %v1270_v20 = vmul.f32 0.0078125, %v1231_v12 }
 0x382   : > { %v1792_v63 = vpop.eup %1791 }
 0x383   : > { %v1439_v46 = vadd.f32 %v2794_v54, %v1400_v23  ;;  %v1362_v2 = vmul.f32 %v1792_v63, %v2726_v44  ;;  %v1302_v32 = vadd.f32 1e-05, %v1270_v20 }
 0x384   : > { %v1233_v49 = vpop.xlane.xlu1 %1232 }
 0x385   : > { %1471 = vst [vmem:[%s2801_s14 + $0x98] sm:$0xff] %v1439_v46  ;;  %v1401_v43 = vmul.f32 %v2788_v51, %v1362_v2  ;;  %1799 = vrsqrt.f32 %v1302_v32  ;;  %v1271_v36 = vmul.f32 0.0078125, %v1233_v49 }
 0x386   : > { %v1794_v47 = vpop.eup %1793 }
 0x387   : > { %v1440_v14 = vadd.f32 %v2794_v54, %v1401_v43  ;;  %v1363_v39 = vmul.f32 %v1794_v47, %v2731_v40  ;;  %v1303_v33 = vadd.f32 1e-05, %v1271_v36 }
 0x388   : > { %v1235_v52 = vpop.xlane.xlu0 %1234 }
 0x389   : > { %1472 = vst [vmem:[%s2801_s14 + $0xa0] sm:$0xff] %v1440_v14  ;;  %v1402_v24 = vmul.f32 %v2788_v51, %v1363_v39  ;;  %1801 = vrsqrt.f32 %v1303_v33  ;;  %v1272_v44 = vmul.f32 0.0078125, %v1235_v52 }
 0x38a   : > { %v1796_v55 = vpop.eup %1795 }
 0x38b   : > { %v1441_v53 = vadd.f32 %v2794_v54, %v1402_v24  ;;  %v1364_v42 = vmul.f32 %v1796_v55, %v2736_v50  ;;  %v1304_v16 = vadd.f32 1e-05, %v1272_v44 }
 0x38c   : > { %v1237_v58 = vpop.xlane.xlu1 %1236 }
 0x38d   : > { %1473 = vst [vmem:[%s2801_s14 + $0xa8] sm:$0xff] %v1441_v53  ;;  %v1403_v25 = vmul.f32 %v2788_v51, %v1364_v42  ;;  %1803 = vrsqrt.f32 %v1304_v16  ;;  %v1273_v40 = vmul.f32 0.0078125, %v1237_v58 }
 0x38e   : > { %v1798_v5 = vpop.eup %1797 }
 0x38f   : > { %v1442_v45 = vadd.f32 %v2794_v54, %v1403_v25  ;;  %v1365_v59 = vmul.f32 %v1798_v5, %v2741_v56  ;;  %v1305_v1 = vadd.f32 1e-05, %v1273_v40 }
 0x390   : > { %v1239_v61 = vpop.xlane.xlu0 %1238 }
 0x391   : > { %1474 = vst [vmem:[%s2801_s14 + $0xb0] sm:$0xff] %v1442_v45  ;;  %v1404_v19 = vmul.f32 %v2788_v51, %v1365_v59  ;;  %1805 = vrsqrt.f32 %v1305_v1  ;;  %v1274_v50 = vmul.f32 0.0078125, %v1239_v61 }
 0x392   : > { %v1800_v26 = vpop.eup %1799 }
 0x393   : > { %v1443_v48 = vadd.f32 %v2794_v54, %v1404_v19  ;;  %v1366_v8 = vmul.f32 %v1800_v26, %v2746_v62  ;;  %v1306_v3 = vadd.f32 1e-05, %v1274_v50 }
 0x394   : > { %v1241_v7 = vpop.xlane.xlu1 %1240 }
 0x395   : > { %1475 = vst [vmem:[%s2801_s14 + $0xb8] sm:$0xff] %v1443_v48  ;;  %v1405_v27 = vmul.f32 %v2788_v51, %v1366_v8  ;;  %1807 = vrsqrt.f32 %v1306_v3  ;;  %v1275_v56 = vmul.f32 0.0078125, %v1241_v7 }
 0x396   : > { %v1802_v13 = vpop.eup %1801 }
 0x397   : > { %v1444_v21 = vadd.f32 %v2794_v54, %v1405_v27  ;;  %v1367_v28 = vmul.f32 %v1802_v13, %v2751_v6  ;;  %v1307_v18 = vadd.f32 1e-05, %v1275_v56 }
 0x398   : > { %v1243_v9 = vpop.xlane.xlu0 %1242 }
 0x399   : > { %1476 = vst [vmem:[%s2801_s14 + $0xc0] sm:$0xff] %v1444_v21  ;;  %v1406_v29 = vmul.f32 %v2788_v51, %v1367_v28  ;;  %1809 = vrsqrt.f32 %v1307_v18  ;;  %v1276_v62 = vmul.f32 0.0078125, %v1243_v9 }
 0x39a   : > { %v1804_v57 = vpop.eup %1803 }
 0x39b   : > { %v1445_v10 = vadd.f32 %v2794_v54, %v1406_v29  ;;  %v1368_v35 = vmul.f32 %v1804_v57, %v2756_v11  ;;  %v1308_v4 = vadd.f32 1e-05, %v1276_v62 }
 0x39c   : > { %v1245_v30 = vpop.xlane.xlu1 %1244 }
 0x39d   : > { %1477 = vst [vmem:[%s2801_s14 + $0xc8] sm:$0xff] %v1445_v10  ;;  %v1407_v15 = vmul.f32 %v2788_v51, %v1368_v35  ;;  %1811 = vrsqrt.f32 %v1308_v4  ;;  %v1277_v6 = vmul.f32 0.0078125, %v1245_v30 }
 0x39e   : > { %v1806_v60 = vpop.eup %1805 }
 0x39f   : > { %v1446_v38 = vadd.f32 %v2794_v54, %v1407_v15  ;;  %v1369_v31 = vmul.f32 %v1806_v60, %v2761_v17  ;;  %v1309_v22 = vadd.f32 1e-05, %v1277_v6 }
 0x3a1   : > { %1478 = vst [vmem:[%s2801_s14 + $0xd0] sm:$0xff] %v1446_v38  ;;  %v1408_v12 = vmul.f32 %v2788_v51, %v1369_v31  ;;  %1813 = vrsqrt.f32 %v1309_v22 }
 0x3a2   : > { %v1808_v11 = vpop.eup %1807 }
 0x3a3   : > { %v1447_v23 = vadd.f32 %v2794_v54, %v1408_v12  ;;  %v1370_v20 = vmul.f32 %v1808_v11, %v2766_v34 }
 0x3a5   : > { %1479 = vst [vmem:[%s2801_s14 + $0xd8] sm:$0xff] %v1447_v23  ;;  %v1409_v63 = vmul.f32 %v2788_v51, %v1370_v20 }
 0x3a6   : > { %v1810_v46 = vpop.eup %1809 }
 0x3a7   : > { %v1448_v17 = vadd.f32 %v2794_v54, %v1409_v63  ;;  %v1371_v2 = vmul.f32 %v1810_v46, %v2771_v37 }
 0x3a9   : > { %1480 = vst [vmem:[%s2801_s14 + $0xe0] sm:$0xff] %v1448_v17  ;;  %v1410_v32 = vmul.f32 %v2788_v51, %v1371_v2 }
 0x3aa   : > { %v1812_v49 = vpop.eup %1811 }
 0x3ab   : > { %v1449_v43 = vadd.f32 %v2794_v54, %v1410_v32  ;;  %v1372_v34 = vmul.f32 %v1812_v49, %v2776_v0 }
 0x3ad   : > { %1481 = vst [vmem:[%s2801_s14 + $0xe8] sm:$0xff] %v1449_v43  ;;  %v1411_v36 = vmul.f32 %v2788_v51, %v1372_v34 }
 0x3ae   : > { %v1814_v47 = vpop.eup %1813 }
 0x3af   : > { %v1450_v14 = vadd.f32 %v2794_v54, %v1411_v36  ;;  %v1373_v39 = vmul.f32 %v1814_v47, %v2781_v41 }
 0x3b1   : > { %1482 = vst [vmem:[%s2801_s14 + $0xf0] sm:$0xff] %v1450_v14  ;;  %v1412_v37 = vmul.f32 %v2788_v51, %v1373_v39 }
 0x3b3   : > { %v1451_v0 = vadd.f32 %v2794_v54, %v1412_v37 }
 0x3b5   : > { %1483 = vst [vmem:[%s2801_s14 + $0xf8] sm:$0xff] %v1451_v0 }
 0x3b6   : > { %1910 = shalt.err (!%p1907_p9)
}
 0x3b7   : > { %s1911_s13 = scalar_lea.hbm %s2930_s11, 4096  ;;  %s1915_s16 = scalar_lea.hbm %s2984_s7, 8192 }
 0x3b8   : > { %p1912_p13 = scmp.ne.s32.totalorder %s2930_s11, %s1911_s13  ;;  %p1916_p4 = scmp.lt.s32.totalorder %s2930_s11, %s2984_s7 }
 0x3b9   : > { %p1917_p8 = scmp.lt.s32.totalorder %s1915_s16, %s1911_s13 }
 0x3ba   : > { %p1913_p5 = pnand %p1912_p13, %p3006_p10 }
 0x3bb   : > { %p1918_p7 = por %p1917_p8, %p1916_p4 }
 0x3bc   : > { %p1914_p0 = pneg %p1913_p5 }
 0x3be   : > { %p1919_p11 = pnand %p1918_p7, %p1914_p0 }
 0x3c0   : > { %1922 = shalt.err (!%p1919_p11)
}
 0x3c1   : > { %s1976_s1 = smov 128   ;;  %s1977_s17 = smov 8  }
 0x3c2   : > { %1687 = dma.vmem_to_hbm [thread:$0]  (%p3006_p10), %s2932_s18, 4096, %s2930_s11, %s1485_s30, %s1976_s1, %s1976_s1, %s1977_s17  }
 0x3c3 PF: > { %s1513_s9 = sand.u32 1, %s1953_s24   ;;  %p3007_p1 = scmp.ne.s32.totalorder %s2993_s8, 0 }
 0x3c4   : > { %p3008_p2 = scmp.ge.s32.totalorder %s1965_s27, 2  ;;  %s1514_s28 = scalar_lea.sflag [#allocation4], %s1513_s9 }
 0x3c6   : > { %p1701_p6 = pnand %p3008_p2, %p3007_p1 }
 0x3c8   : > { %p1702_p12 = pneg %p1701_p6 }
 0x3ca   : > { %1948 = dma.done.wait (%p1702_p12), %s1514_s28, 4096  }
 0x3cb   : > { %1950 = vsyncadd (%p1702_p12), %s1514_s28, 4294963200  ;;  %p21_p3 = scmp.ge.s32.totalorder %s2093_s10, 4   ;;  %s3009_s24 = smov %s1957_s25 }
 0x3cc   : > { %s3010_s25 = smov %s1961_s26  ;;  %s3011_s26 = smov %s2102_s15 }
 0x3cd   : > { %s3012_s27 = smov %s2093_s10  ;;  %23 = sbr.rel (!%p21_p3) target bundleno = 8 (0x8), region = 101 }
 0x3d2   :  { %1519 = vsyncpa [#allocation3], 1 }
 0x3d3   :  { %1521 = vsyncpa [#allocation3 + $0x1], 1 }
 0x3d4   :  { %1522 = vsyncpa [#allocation6], 1 }
 0x3d5   :  { %1523 = vsyncpa [#allocation4], 1 }
 0x3d6   :  { %1525 = vsyncpa [#allocation4 + $0x1], 1 }

// kernel: tpu_custom_call.1
= control target key start
LH: loop header
LB: loop body
LE: loop exit
PB: predicated region body
PF: predicated region fallthrough
CT: control target
= control target key end

     0   :  { %s2977_s0 = inlined_call_operand.hbm [shape: f32[512,128], index: 0, kind: input, shape index: {}]   ;;  %s2978_s1 = inlined_call_operand.hbm [shape: f32[128,256], index: 1, kind: input, shape index: {}]   ;;  %s2979_s2 = inlined_call_operand.vmem [shape: f32[1,256], index: 2, kind: input, shape index: {}]   ;;  %s2980_s3 = inlined_call_operand.hbm [shape: f32[256,128], index: 3, kind: input, shape index: {}]   ;;  %s2981_s4 = inlined_call_operand.vmem [shape: f32[1,128], index: 4, kind: input, shape index: {}]   ;;  %s2982_s5 = inlined_call_operand.vmem [shape: f32[1,128], index: 5, kind: input, shape index: {}]   ;;  %s2983_s6 = inlined_call_operand.vmem [shape: f32[1,128], index: 6, kind: input, shape index: {}]   ;;  %s2984_s7 = inlined_call_operand.hbm [shape: f32[512,128], index: 7, kind: output, shape index: {}]  }
   0x1   :  { %2991 = sst [smem:[#allocation12_spill]] %s2978_s1 }
   0x2   :  { %12 = vsyncpa [#allocation3], 0 }
   0x3   :  { %14 = vsyncpa [#allocation3 + $0x1], 0 }
   0x4   :  { %15 = vsyncpa [#allocation6], 0 }
   0x5   :  { %16 = vsyncpa [#allocation4], 0 }
   0x6   :  { %18 = vsyncpa [#allocation4 + $0x1], 0  ;;  %s2018_s24 = smov 0   ;;  %s2020_s25 = smov 0  }
   0x7   :  { %s2022_s26 = smov 0   ;;  %s2024_s27 = smov 0  }
   0x8 LB: > { %s2039_s28 = sadd.s32 4294967295, %s1965_s27   ;;  %s1590_s29 = sadd.s32 4294967294, %s1965_s27   ;;  %s1965_s27 = sphi %s2024_s27, %s3012_s27   ;;  %s1961_s26 = sphi %s2022_s26, %s3011_s26   ;;  %s1957_s25 = sphi %s2020_s25, %s3010_s25   ;;  %s1953_s24 = sphi %s2018_s24, %s3009_s24  }
   0x9   : > { %p44_p0 = scmp.ne.s32.totalorder %s1957_s25, %s1953_s24  ;;  %p2985_p1 = scmp.eq.s32.totalorder %s2039_s28, 0 }
   0xa   : > { %p200_p3 = scmp.eq.s32.totalorder %s1590_s29, 1  ;;  %p1591_p5 = scmp.ge.s32.totalorder %s1965_s27, 1 }
   0xb   : > { %p2048_p4 = por %p2985_p1, %p44_p0  ;;  %p207_p7 = scmp.lt.s32.totalorder %s1965_s27, 3 }
   0xc   : > { %p2053_p6 = por %p200_p3, %p44_p0  ;;  %s1967_s10 = smov [#allocation5]  }
   0xd   : > { %s2992_s30 = scalar_select %p2048_p4, 1, 0 }
   0xe   : > { %s2993_s8 = scalar_select %p2053_p6, 1, 0 }
   0xf   : > { %p2058_p8 = pnand %p1591_p5, %p207_p7  ;;  %s219_s11 = sshll.u32 %s1967_s10, 4  ;;  %s220_s11 = int_to_ptr.vmem [resolvable:$true] %s219_s11 }
  0x10   : > { %s1968_s13 = smov [#allocation7]   ;;  %s1828_s15 = scalar_lea.vmem %s220_s11, 4096 }
  0x11   : > { %s2994_s9 = scalar_select %p2058_p8, 1, 0 }
  0x12   : > { %p1689_p9 = pneg %p2058_p8  ;;  %s235_s14 = sshll.u32 %s1968_s13, 4  ;;  %s236_s14 = int_to_ptr.vmem [resolvable:$true] %s235_s14 }
  0x13   : > { %p1829_p13 = scmp.ne.s32.totalorder %s220_s11, %s1828_s15  ;;  %p1836_p5 = scmp.lt.s32.totalorder %s220_s11, %s220_s11 }
  0x14   : > { %p2067_p11 = pnand %p1689_p9, %p2985_p1  ;;  %p1837_p7 = scmp.lt.s32.totalorder %s1828_s15, %s1828_s15 }
  0x16   : > { %p1819_p12 = pneg %p2067_p11  ;;  %p1838_p10 = por %p1837_p7, %p1836_p5 }
  0x18   : > { %p1831_p0 = pnand %p1829_p13, %p1819_p12 }
  0x1a   : > { %p1832_p3 = pneg %p1831_p0 }
  0x1c   : > { %p1839_p9 = pnand %p1838_p10, %p1832_p3 }
  0x1e   : > { %1842 = shalt.err (!%p1839_p9)
}
  0x1f   : > { %s1969_s16 = smov 256   ;;  %s1970_s17 = smov 16  }
  0x20   : > { %s2996_s1 = sld [smem:[#allocation12_spill]]  ;;  %s1854_s20 = scalar_lea.vmem %s236_s14, 4096 }
  0x21   : > { %p1855_p1 = scmp.ne.s32.totalorder %s236_s14, %s1854_s20  ;;  %p1862_p2 = scmp.lt.s32.totalorder %s236_s14, %s236_s14 }
  0x22   : > { %p1863_p6 = scmp.lt.s32.totalorder %s1854_s20, %s1854_s20 }
  0x23   : > { %p1857_p13 = pnand %p1855_p1, %p1819_p12 }
  0x24   : > { %p1864_p5 = por %p1863_p6, %p1862_p2 }
  0x25   : > { %p1858_p0 = pneg %p1857_p13 }
  0x26   : > { %1692 = dma.hbm_to_vmem [thread:$0]  (!%p2067_p11), %s2996_s1, 4096, %s220_s11, [#allocation6], %s1969_s16, %s1969_s16, %s1970_s17  }
  0x27   : > { %p1865_p10 = pnand %p1864_p5, %p1858_p0 }
  0x29   : > { %1868 = shalt.err (!%p1865_p10)
}
  0x2a   : > { %s2986_s21 = smov 128   ;;  %s2987_s22 = smov 8  }
  0x2b   : > { %1695 = dma.hbm_to_vmem [thread:$0]  (!%p2067_p11), %s2980_s3, 4096, %s236_s14, [#allocation6], %s2986_s21, %s2986_s21, %s2987_s22  }
  0x2c   : > { %s2093_s10 = sadd.s32 1, %s1965_s27   ;;  %s31_s13 = sadd.s32 1, %s1961_s26 }
  0x2d   : > { %s28_s11 = ssub.s32 %s1965_s27, %s2093_s10  ;;  %p38_p2 = scmp.ne.s32.totalorder %s1961_s26, %s1957_s25 }
  0x2e   : > { %p29_p1 = scmp.eq.s32.totalorder %s28_s11, 0  ;;  %p39_p6 = scmp.eq.s32.totalorder %s1965_s27, 0 }
  0x2f   : > { %p2997_p3 = scmp.eq.s32.totalorder %s2039_s28, 1  ;;  %p1706_p9 = scmp.lt.s32.totalorder %s1965_s27, 2 }
  0x30   : > { %s2102_s15 = scalar_select %p29_p1, %s1961_s26, %s31_s13  }
  0x31   : > { %p40_p12 = por %p39_p6, %p38_p2  ;;  %p2106_p7 = por %p2997_p3, %p38_p2 }
  0x32   : > { %s258_s16 = sand.u32 1, %s1961_s26   ;;  %s1611_s14 = sshll.u32 %s1965_s27, 12 }
  0x33   : > { %s2998_s12 = scalar_select %p2106_p7, 1, 0 }
  0x34   : > { %s1595_s17 = sshll.u32 %s258_s16, 8  ;;  %s2116_s20 = scalar_lea.hbm %s2977_s0, %s1611_s14 }
  0x35   : > { %s262_s23 = scalar_lea.vmem [#allocation2], %s1595_s17  ;;  %p2120_p11 = pnand %p1706_p9, %p40_p12 }
  0x36   : > { %s269_s29 = sshll.u32 %s262_s23, 4  ;;  %s2124_s13 = scalar_lea.sflag [#allocation3], %s258_s16  ;;  %s2118_s29 = int_to_ptr.vmem [resolvable:$true] %s269_s29 }
  0x37   : > { %s1869_s21 = scalar_lea.hbm %s2116_s20, 4096  ;;  %p1871_p0 = pneg %p2120_p11 }
  0x38   : > { %p1870_p13 = scmp.ne.s32.totalorder %s2116_s20, %s1869_s21  ;;  %s1874_s17 = scalar_lea.hbm %s2977_s0, 8192 }
  0x39   : > { %p1875_p1 = scmp.lt.s32.totalorder %s2116_s20, %s2977_s0  ;;  %p1876_p2 = scmp.lt.s32.totalorder %s1874_s17, %s1869_s21 }
  0x3a   : > { %p1872_p5 = pnand %p1871_p0, %p1870_p13 }
  0x3b   : > { %p1877_p6 = por %p1876_p2, %p1875_p1 }
  0x3c   : > { %p1873_p10 = pneg %p1872_p5 }
  0x3e   : > { %p1878_p12 = pnand %p1877_p6, %p1873_p10 }
  0x40   : > { %1881 = shalt.err (!%p1878_p12)
}
  0x41   : > { %s1882_s16 = scalar_lea.vmem %s2118_s29, 4096  ;;  %s1973_s22 = smov [#allocation2]  }
  0x42   : > { %p1883_p3 = scmp.ne.s32.totalorder %s2118_s29, %s1882_s16  ;;  %s1887_s1 = sshll.u32 %s1973_s22, 4  ;;  %s1888_s1 = int_to_ptr.vmem [resolvable:$false] %s1887_s1 }
  0x43   : > { %s1889_s14 = scalar_lea.vmem %s1888_s1, 8192  ;;  %p1890_p5 = scmp.lt.s32.totalorder %s2118_s29, %s1888_s1 }
  0x44   : > { %p1885_p9 = pnand %p1883_p3, %p1871_p0  ;;  %p1891_p7 = scmp.lt.s32.totalorder %s1889_s14, %s1882_s16 }
  0x46   : > { %p1886_p13 = pneg %p1885_p9  ;;  %p1892_p4 = por %p1891_p7, %p1890_p5 }
  0x48   : > { %p1893_p8 = pnand %p1892_p4, %p1886_p13 }
  0x4a   : > { %1896 = shalt.err (!%p1893_p8)
}
  0x4b   : > { %s3000_s21 = smov 8   ;;  %s3001_s18 = smov 128  }
  0x4c   : > { %1699 = dma.hbm_to_vmem [thread:$0]  (!%p2120_p11), %s2116_s20, 4096, %s2118_s29, %s2124_s13, %s3001_s18, %s3001_s18, %s3000_s21  }
  0x4d   : > { %p3002_p0 = scmp.ne.s32.totalorder %s2994_s9, 0 }
  0x4e   : > { %s2151_s22 = sand.u32 (!%p3002_p0), 1, %s1957_s25   ;;  %p3003_p4 = scmp.ne.s32.totalorder (!%p3002_p0), %s2992_s30, 0 }
  0x4f   : > { %281 = sbr.rel (%p3002_p0) target bundleno = 963 (0x3c3), region = 48  ;;  %s1599_s1 = sshll.u32 (!%p3002_p0), %s2151_s22, 8 }
  0x50   : > { %s284_s17 = scalar_lea.sflag (!%p3002_p0), [#allocation3], %s2151_s22  ;;  %s2157_s11 = scalar_lea.vmem (!%p3002_p0), [#allocation2], %s1599_s1 }
  0x54   : > { %1940 = dma.done.wait (%p3003_p4), %s284_s17, 4096  }
  0x55   : > { %1942 = vsyncadd (%p3003_p4), %s284_s17, 4294963200  ;;  %p3004_p8 = scmp.eq.s32.totalorder %s2039_s28, 0 }
  0x57   : > { %1944 = dma.done.wait (%p3004_p8), [#allocation6], 8192   ;;  %p3005_p7 = pmov %p3004_p8 }
  0x58   : > { %v1974_v0 = vmov 0.0   ;;  %v391_v1 = vld [vmem:[#allocation5 + $0xf8] sm:$0xff]  ;;  %v390_v2 = vld [vmem:[#allocation5 + $0xf0] sm:$0xff]  ;;  %v389_v3 = vld [vmem:[#allocation5 + $0xe8] sm:$0xff]  ;;  %s2801_s14 = scalar_lea.vmem [#allocation8], %s1599_s1  ;;  %s1612_s21 = sshll.u32 %s2039_s28, 12 }
  0x59   : > { %1946 = vsyncadd (%p3005_p7), [#allocation6], 4294959104  ;;  %468 = vmatprep.mubr.f32.mxu0 %v1974_v0  ;;  %1613 = vmatprep.subr.mxu1 %v1974_v0  ;;  %v388_v4 = vld [vmem:[#allocation5 + $0xe0] sm:$0xff]  ;;  %v387_v5 = vld [vmem:[#allocation5 + $0xd8] sm:$0xff]  ;;  %s1498_s18 = sshll.u32 %s2801_s14, 4  ;;  %s1485_s30 = scalar_lea.sflag [#allocation4], %s2151_s22  ;;  %s2932_s18 = int_to_ptr.vmem [resolvable:$true] %s1498_s18 }
  0x5a   : > { %404 = vmatprep.subr.mxu0 %v391_v1  ;;  %v386_v6 = vld [vmem:[#allocation5 + $0xd0] sm:$0xff]  ;;  %v385_v7 = vld [vmem:[#allocation5 + $0xc8] sm:$0xff]  ;;  %v384_v8 = vld [vmem:[#allocation5 + $0xc0] sm:$0xff]  ;;  %s1897_s9 = scalar_lea.vmem %s2932_s18, 4096  ;;  %p3006_p10 = scmp.ne.s32.totalorder %s2998_s12, 0 }
  0x5b   : > { %405 = vmatpush1.msra.mxu0 %v390_v2  ;;  %v383_v9 = vld [vmem:[#allocation5 + $0xb8] sm:$0xff]  ;;  %v382_v10 = vld [vmem:[#allocation5 + $0xb0] sm:$0xff]  ;;  %v381_v11 = vld [vmem:[#allocation5 + $0xa8] sm:$0xff]  ;;  %p1898_p11 = scmp.ne.s32.totalorder %s2932_s18, %s1897_s9  ;;  %s1975_s28 = smov [#allocation8]  }
  0x5c   : > { %406 = vmatprep.subr.mxu0 %v389_v3  ;;  %v380_v12 = vld [vmem:[#allocation5 + $0xa0] sm:$0xff]  ;;  %v379_v13 = vld [vmem:[#allocation5 + $0x98] sm:$0xff]  ;;  %v378_v14 = vld [vmem:[#allocation5 + $0x90] sm:$0xff]  ;;  %s1901_s20 = sshll.u32 %s1975_s28, 4  ;;  %s1902_s20 = int_to_ptr.vmem [resolvable:$false] %s1901_s20 }
  0x5d   : > { %407 = vmatpush1.msra.mxu0 %v388_v4  ;;  %v377_v15 = vld [vmem:[#allocation5 + $0x88] sm:$0xff]  ;;  %v376_v16 = vld [vmem:[#allocation5 + $0x80] sm:$0xff]  ;;  %v375_v17 = vld [vmem:[#allocation5 + $0x78] sm:$0xff]  ;;  %p1899_p1 = pnand %p1898_p11, %p3006_p10  ;;  %s1903_s29 = scalar_lea.vmem %s1902_s20, 8192 }
  0x5e   : > { %408 = vmatprep.subr.mxu0 %v387_v5  ;;  %v374_v18 = vld [vmem:[#allocation5 + $0x70] sm:$0xff]  ;;  %v373_v19 = vld [vmem:[#allocation5 + $0x68] sm:$0xff]  ;;  %v372_v20 = vld [vmem:[#allocation5 + $0x60] sm:$0xff]  ;;  %p1904_p6 = scmp.lt.s32.totalorder %s2932_s18, %s1902_s20  ;;  %p1905_p12 = scmp.lt.s32.totalorder %s1903_s29, %s1897_s9 }
  0x5f   : > { %409 = vmatpush1.msra.mxu0 %v386_v6  ;;  %v371_v21 = vld [vmem:[#allocation5 + $0x58] sm:$0xff]  ;;  %v370_v22 = vld [vmem:[#allocation5 + $0x50] sm:$0xff]  ;;  %v369_v23 = vld [vmem:[#allocation5 + $0x48] sm:$0xff]  ;;  %p1900_p2 = pneg %p1899_p1 }
  0x60   : > { %410 = vmatprep.subr.mxu0 %v385_v7  ;;  %v368_v24 = vld [vmem:[#allocation5 + $0x40] sm:$0xff]  ;;  %v367_v25 = vld [vmem:[#allocation5 + $0x38] sm:$0xff]  ;;  %v366_v26 = vld [vmem:[#allocation5 + $0x30] sm:$0xff]  ;;  %p1906_p3 = por %p1905_p12, %p1904_p6 }
  0x61   : > { %411 = vmatpush1.msra.mxu0 %v384_v8  ;;  %v365_v27 = vld [vmem:[#allocation5 + $0x28] sm:$0xff]  ;;  %v364_v28 = vld [vmem:[#allocation5 + $0x20] sm:$0xff]  ;;  %v363_v29 = vld [vmem:[#allocation5 + $0x18] sm:$0xff] }
  0x62   : > { %412 = vmatprep.subr.mxu0 %v383_v9  ;;  %v362_v30 = vld [vmem:[#allocation5 + $0x10] sm:$0xff]  ;;  %v361_v31 = vld [vmem:[#allocation5 + $0x8] sm:$0xff]  ;;  %v360_v32 = vld [vmem:[#allocation5] sm:$0xff]  ;;  %p1907_p9 = pnand %p1906_p3, %p1900_p2 }
  0x63   : > { %413 = vmatpush1.msra.mxu0 %v382_v10  ;;  %v740_v33 = vld [vmem:[#allocation7 + $0x78] sm:$0xff]  ;;  %v328_v34 = vld [vmem:[%s2157_s11] sm:$0xff]  ;;  %v739_v35 = vld [vmem:[#allocation7 + $0x70] sm:$0xff] }
  0x64   : > { %414 = vmatprep.subr.mxu0 %v381_v11  ;;  %1645 = vmatpush1.msra.mxu1 %v740_v33  ;;  %v329_v36 = vld [vmem:[%s2157_s11 + $0x8] sm:$0xff]  ;;  %v737_v38 = vld [vmem:[#allocation7 + $0x60] sm:$0xff]  ;;  %v2179_v39 = vld [vmem:[%s2157_s11 + $0x10] sm:$0xff] }
  0x65   : > { %415 = vmatpush1.msra.mxu0 %v380_v12  ;;  %1614 = vmatprep.subr.mxu1 %v1974_v0  ;;  %v738_v37 = vld [vmem:[#allocation7 + $0x68] sm:$0xff]  ;;  %v736_v40 = vld [vmem:[#allocation7 + $0x58] sm:$0xff]  ;;  %v735_v41 = vld [vmem:[#allocation7 + $0x50] sm:$0xff] }
  0x66   : > { %416 = vmatprep.subr.mxu0 %v379_v13  ;;  %1646 = vmatpush1.msra.mxu1 %v739_v35  ;;  %v2187_v42 = vld [vmem:[%s2157_s11 + $0x18] sm:$0xff]  ;;  %v734_v43 = vld [vmem:[#allocation7 + $0x48] sm:$0xff]  ;;  %v733_v44 = vld [vmem:[#allocation7 + $0x40] sm:$0xff] }
  0x67   : > { %417 = vmatpush1.msra.mxu0 %v378_v14  ;;  %1615 = vmatprep.subr.mxu1 %v1974_v0  ;;  %v2195_v45 = vld [vmem:[%s2157_s11 + $0x20] sm:$0xff]  ;;  %v732_v46 = vld [vmem:[#allocation7 + $0x38] sm:$0xff]  ;;  %v731_v47 = vld [vmem:[#allocation7 + $0x30] sm:$0xff] }
  0x68   : > { %418 = vmatprep.subr.mxu0 %v377_v15  ;;  %1647 = vmatpush1.msra.mxu1 %v738_v37  ;;  %v2203_v48 = vld [vmem:[%s2157_s11 + $0x28] sm:$0xff]  ;;  %v729_v50 = vld [vmem:[#allocation7 + $0x20] sm:$0xff]  ;;  %v2211_v51 = vld [vmem:[%s2157_s11 + $0x30] sm:$0xff] }
  0x69   : > { %419 = vmatpush1.msra.mxu0 %v376_v16  ;;  %1616 = vmatprep.subr.mxu1 %v1974_v0  ;;  %v730_v49 = vld [vmem:[#allocation7 + $0x28] sm:$0xff]  ;;  %v728_v52 = vld [vmem:[#allocation7 + $0x18] sm:$0xff]  ;;  %v727_v53 = vld [vmem:[#allocation7 + $0x10] sm:$0xff] }
  0x6a   : > { %420 = vmatprep.subr.mxu0 %v375_v17  ;;  %1648 = vmatpush1.msra.mxu1 %v737_v38  ;;  %v2219_v54 = vld [vmem:[%s2157_s11 + $0x38] sm:$0xff]  ;;  %v726_v55 = vld [vmem:[#allocation7 + $0x8] sm:$0xff]  ;;  %v725_v56 = vld [vmem:[#allocation7] sm:$0xff] }
  0x6b   : > { %421 = vmatpush1.msra.mxu0 %v374_v18  ;;  %1617 = vmatprep.subr.mxu1 %v1974_v0  ;;  %v2227_v57 = vld [vmem:[%s2157_s11 + $0x40] sm:$0xff]  ;;  %v756_v58 = vld [vmem:[#allocation7 + $0xf8] sm:$0xff]  ;;  %v755_v59 = vld [vmem:[#allocation7 + $0xf0] sm:$0xff] }
  0x6c   : > { %422 = vmatprep.subr.mxu0 %v373_v19  ;;  %1649 = vmatpush1.msra.mxu1 %v736_v40  ;;  %v2235_v60 = vld [vmem:[%s2157_s11 + $0x48] sm:$0xff]  ;;  %v753_v62 = vld [vmem:[#allocation7 + $0xe0] sm:$0xff]  ;;  %v2243_v63 = vld [vmem:[%s2157_s11 + $0x50] sm:$0xff] }
  0x6d   : > { %423 = vmatpush1.msra.mxu0 %v372_v20  ;;  %1618 = vmatprep.subr.mxu1 %v1974_v0  ;;  %v754_v61 = vld [vmem:[#allocation7 + $0xe8] sm:$0xff]  ;;  %v752_v1 = vld [vmem:[#allocation7 + $0xd8] sm:$0xff]  ;;  %v751_v3 = vld [vmem:[#allocation7 + $0xd0] sm:$0xff] }
  0x6e   : > { %424 = vmatprep.subr.mxu0 %v371_v21  ;;  %1650 = vmatpush1.msra.mxu1 %v735_v41  ;;  %v2251_v2 = vld [vmem:[%s2157_s11 + $0x58] sm:$0xff]  ;;  %v2257_v4 = vld [vmem:[#allocation7 + $0xc8] sm:$0xff]  ;;  %v2261_v5 = vld [vmem:[%s2157_s11 + $0x60] sm:$0xff] }
  0x6f   : > { %425 = vmatpush1.msra.mxu0 %v370_v22  ;;  %1619 = vmatprep.subr.mxu1 %v1974_v0  ;;  %v749_v6 = vld [vmem:[#allocation7 + $0xc0] sm:$0xff]  ;;  %v2270_v7 = vld [vmem:[%s2157_s11 + $0x68] sm:$0xff]  ;;  %v748_v8 = vld [vmem:[#allocation7 + $0xb8] sm:$0xff] }
  0x70   : > { %426 = vmatprep.subr.mxu0 %v369_v23  ;;  %1651 = vmatpush1.msra.mxu1 %v734_v43  ;;  %v747_v9 = vld [vmem:[#allocation7 + $0xb0] sm:$0xff]  ;;  %v746_v11 = vld [vmem:[#allocation7 + $0xa8] sm:$0xff]  ;;  %v2286_v12 = vld [vmem:[%s2157_s11 + $0x78] sm:$0xff] }
  0x71   : > { %427 = vmatpush1.msra.mxu0 %v368_v24  ;;  %1620 = vmatprep.subr.mxu1 %v1974_v0  ;;  %v2278_v10 = vld [vmem:[%s2157_s11 + $0x70] sm:$0xff]  ;;  %v745_v13 = vld [vmem:[#allocation7 + $0xa0] sm:$0xff]  ;;  %v744_v15 = vld [vmem:[#allocation7 + $0x98] sm:$0xff] }
  0x72   : > { %428 = vmatprep.subr.mxu0 %v367_v25  ;;  %1652 = vmatpush1.msra.mxu1 %v733_v44  ;;  %v2294_v14 = vld [vmem:[%s2157_s11 + $0x80] sm:$0xff]  ;;  %v2302_v16 = vld [vmem:[%s2157_s11 + $0x88] sm:$0xff]  ;;  %v743_v17 = vld [vmem:[#allocation7 + $0x90] sm:$0xff] }
  0x73   : > { %429 = vmatpush1.msra.mxu0 %v366_v26  ;;  %1621 = vmatprep.subr.mxu1 %v1974_v0  ;;  %v742_v18 = vld [vmem:[#allocation7 + $0x88] sm:$0xff]  ;;  %v2310_v19 = vld [vmem:[%s2157_s11 + $0x90] sm:$0xff]  ;;  %v741_v20 = vld [vmem:[#allocation7 + $0x80] sm:$0xff] }
  0x74   : > { %430 = vmatprep.subr.mxu0 %v365_v27  ;;  %1653 = vmatpush1.msra.mxu1 %v732_v46  ;;  %v2319_v21 = vld [vmem:[%s2157_s11 + $0x98] sm:$0xff]  ;;  %v2325_v22 = vld [vmem:[%s2157_s11 + $0xa0] sm:$0xff]  ;;  %v2332_v23 = vld [vmem:[%s2157_s11 + $0xa8] sm:$0xff] }
  0x75   : > { %431 = vmatpush1.msra.mxu0 %v364_v28  ;;  %1622 = vmatprep.subr.mxu1 %v1974_v0  ;;  %v2339_v24 = vld [vmem:[%s2157_s11 + $0xb0] sm:$0xff]  ;;  %v2346_v25 = vld [vmem:[%s2157_s11 + $0xb8] sm:$0xff]  ;;  %v2351_v26 = vld [vmem:[%s2157_s11 + $0xc0] sm:$0xff] }
  0x76   : > { %432 = vmatprep.subr.mxu0 %v363_v29  ;;  %1654 = vmatpush1.msra.mxu1 %v731_v47  ;;  %v2356_v27 = vld [vmem:[%s2157_s11 + $0xc8] sm:$0xff]  ;;  %v2361_v28 = vld [vmem:[%s2157_s11 + $0xd0] sm:$0xff]  ;;  %v2366_v29 = vld [vmem:[%s2157_s11 + $0xd8] sm:$0xff] }
  0x77   : > { %433 = vmatpush1.msra.mxu0 %v362_v30  ;;  %1623 = vmatprep.subr.mxu1 %v1974_v0  ;;  %v2371_v30 = vld [vmem:[%s2157_s11 + $0xe0] sm:$0xff] }
  0x78   : > { %434 = vmatprep.subr.mxu0 %v361_v31  ;;  %1655 = vmatpush1.msra.mxu1 %v730_v49  ;;  %v2376_v31 = vld [vmem:[%s2157_s11 + $0xe8] sm:$0xff] }
  0x79   : > { %435 = vmatpush1.msra.mxu0 %v360_v32  ;;  %1624 = vmatprep.subr.mxu1 %v1974_v0  ;;  %v2381_v32 = vld [vmem:[%s2157_s11 + $0xf0] sm:$0xff] }
  0x7a   : > { %469 = vmatmul.mubr.f32.vlgmr.msra.gmra.mxu0 %v328_v34  ;;  %764 = vmatprep.subr.mxu0 %v1974_v0  ;;  %v394_v34 = vlaneseq }
  0x7b   : > { %474 = vmatprep.mubr.f32.mxu0 %v1974_v0  ;;  %765 = vmatpush1.msra.mxu0 %v740_v33  ;;  %v2386_v33 = vld [vmem:[%s2157_s11 + $0xf8] sm:$0xff] }
  0x7c   : > { %766 = vmatprep.subr.mxu0 %v1974_v0  ;;  %1656 = vmatpush1.msra.mxu1 %v729_v50 }
  0x7d   : > { %767 = vmatpush1.msra.mxu0 %v739_v35  ;;  %1625 = vmatprep.subr.mxu1 %v1974_v0  ;;  %v395_v35 = vshrl.u32 %v394_v34, 7 }
  0x7e   : > { %475 = vmatmul.mubr.f32.gmra.mxu0 %v329_v36  ;;  %768 = vmatprep.subr.mxu0 %v1974_v0 }
  0x7f   : > { %480 = vmatprep.mubr.f32.mxu0 %v1974_v0  ;;  %769 = vmatpush1.msra.mxu0 %v738_v37  ;;  %v396_v36 = vsub.s32 0, %v395_v35  ;;  %v392_v37 = vld [vmem:[%s2979_s2] sm:$0x3] }
  0x80   : > { %770 = vmatprep.subr.mxu0 %v1974_v0  ;;  %1657 = vmatpush1.msra.mxu1 %v728_v52 }
  0x81   : > { %771 = vmatpush1.msra.mxu0 %v737_v38  ;;  %1626 = vmatprep.subr.mxu1 %v1974_v0  ;;  %v400_v38 = vsub.s32 1, %v395_v35 }
  0x82   : > { %481 = vmatmul.mubr.f32.gmra.mxu0 %v2179_v39  ;;  %772 = vmatprep.subr.mxu0 %v1974_v0 }
  0x83   : > { %486 = vmatprep.mubr.f32.mxu0 %v1974_v0  ;;  %773 = vmatpush1.msra.mxu0 %v736_v40  ;;  %v2392_v40 = vrot.slane %v392_v37, %v396_v36 }
  0x84   : > { %774 = vmatprep.subr.mxu0 %v1974_v0  ;;  %1658 = vmatpush1.msra.mxu1 %v727_v53 }
  0x85   : > { %775 = vmatpush1.msra.mxu0 %v735_v41  ;;  %1627 = vmatprep.subr.mxu1 %v1974_v0  ;;  %v2394_v41 = vrot.slane %v392_v37, %v400_v38 }
  0x86   : > { %487 = vmatmul.mubr.f32.gmra.mxu0 %v2187_v42  ;;  %776 = vmatprep.subr.mxu0 %v1974_v0 }
  0x87   : > { %492 = vmatprep.mubr.f32.mxu0 %v1974_v0  ;;  %777 = vmatpush1.msra.mxu0 %v734_v43 }
  0x88   : > { %778 = vmatprep.subr.mxu0 %v1974_v0  ;;  %1659 = vmatpush1.msra.mxu1 %v726_v55 }
  0x89   : > { %779 = vmatpush1.msra.mxu0 %v733_v44  ;;  %1628 = vmatprep.subr.mxu1 %v1974_v0 }
  0x8a   : > { %493 = vmatmul.mubr.f32.gmra.mxu0 %v2195_v45  ;;  %780 = vmatprep.subr.mxu0 %v1974_v0 }
  0x8b   : > { %498 = vmatprep.mubr.f32.mxu0 %v1974_v0  ;;  %781 = vmatpush1.msra.mxu0 %v732_v46 }
  0x8c   : > { %782 = vmatprep.subr.mxu0 %v1974_v0  ;;  %1660 = vmatpush1.msra.mxu1 %v725_v56 }
  0x8d   : > { %783 = vmatpush1.msra.mxu0 %v731_v47  ;;  %1629 = vmatprep.subr.mxu1 %v1974_v0 }
  0x8e   : > { %499 = vmatmul.mubr.f32.gmra.mxu0 %v2203_v48  ;;  %784 = vmatprep.subr.mxu0 %v1974_v0 }
  0x8f   : > { %504 = vmatprep.mubr.f32.mxu0 %v1974_v0  ;;  %785 = vmatpush1.msra.mxu0 %v730_v49 }
  0x90   : > { %786 = vmatprep.subr.mxu0 %v1974_v0  ;;  %1661 = vmatpush2.msra.mxu1 %v756_v58 }
  0x91   : > { %787 = vmatpush1.msra.mxu0 %v729_v50  ;;  %1630 = vmatprep.subr.mxu1 %v1974_v0 }
  0x92   : > { %505 = vmatmul.mubr.f32.gmra.mxu0 %v2211_v51  ;;  %788 = vmatprep.subr.mxu0 %v1974_v0 }
  0x93   : > { %510 = vmatprep.mubr.f32.mxu0 %v1974_v0  ;;  %789 = vmatpush1.msra.mxu0 %v728_v52 }
  0x94   : > { %790 = vmatprep.subr.mxu0 %v1974_v0  ;;  %1662 = vmatpush2.msra.mxu1 %v755_v59 }
  0x95   : > { %791 = vmatpush1.msra.mxu0 %v727_v53  ;;  %1631 = vmatprep.subr.mxu1 %v1974_v0 }
  0x96   : > { %511 = vmatmul.mubr.f32.gmra.mxu0 %v2219_v54  ;;  %792 = vmatprep.subr.mxu0 %v1974_v0 }
  0x97   : > { %516 = vmatprep.mubr.f32.mxu0 %v1974_v0  ;;  %793 = vmatpush1.msra.mxu0 %v726_v55 }
  0x98   : > { %794 = vmatprep.subr.mxu0 %v1974_v0  ;;  %1663 = vmatpush2.msra.mxu1 %v754_v61 }
  0x99   : > { %795 = vmatpush1.msra.mxu0 %v725_v56  ;;  %1632 = vmatprep.subr.mxu1 %v1974_v0 }
  0x9a   : > { %517 = vmatmul.mubr.f32.gmra.mxu0 %v2227_v57  ;;  %796 = vmatprep.subr.mxu0 %v1974_v0 }
  0x9b   : > { %522 = vmatprep.mubr.f32.mxu0 %v1974_v0  ;;  %797 = vmatpush2.msra.mxu0 %v756_v58 }
  0x9c   : > { %798 = vmatprep.subr.mxu0 %v1974_v0  ;;  %1664 = vmatpush2.msra.mxu1 %v753_v62 }
  0x9d   : > { %799 = vmatpush2.msra.mxu0 %v755_v59  ;;  %1633 = vmatprep.subr.mxu1 %v1974_v0 }
  0x9e   : > { %523 = vmatmul.mubr.f32.gmra.mxu0 %v2235_v60  ;;  %800 = vmatprep.subr.mxu0 %v1974_v0 }
  0x9f   : > { %528 = vmatprep.mubr.f32.mxu0 %v1974_v0  ;;  %801 = vmatpush2.msra.mxu0 %v754_v61 }
  0xa0   : > { %802 = vmatprep.subr.mxu0 %v1974_v0  ;;  %1665 = vmatpush2.msra.mxu1 %v752_v1 }
  0xa1   : > { %803 = vmatpush2.msra.mxu0 %v753_v62  ;;  %1634 = vmatprep.subr.mxu1 %v1974_v0 }
  0xa2   : > { %529 = vmatmul.mubr.f32.gmra.mxu0 %v2243_v63  ;;  %804 = vmatprep.subr.mxu0 %v1974_v0 }
  0xa3   : > { %534 = vmatprep.mubr.f32.mxu0 %v1974_v0  ;;  %805 = vmatpush2.msra.mxu0 %v752_v1 }
  0xa4   : > { %806 = vmatprep.subr.mxu0 %v1974_v0  ;;  %1666 = vmatpush2.msra.mxu1 %v751_v3 }
  0xa5   : > { %807 = vmatpush2.msra.mxu0 %v751_v3  ;;  %1635 = vmatprep.subr.mxu1 %v1974_v0 }
  0xa6   : > { %535 = vmatmul.mubr.f32.gmra.mxu0 %v2251_v2  ;;  %808 = vmatprep.subr.mxu0 %v1974_v0 }
  0xa7   : > { %540 = vmatprep.mubr.f32.mxu0 %v1974_v0  ;;  %809 = vmatpush2.msra.mxu0 %v2257_v4 }
  0xa8   : > { %810 = vmatprep.subr.mxu0 %v1974_v0  ;;  %1667 = vmatpush2.msra.mxu1 %v2257_v4 }
  0xa9   : > { %811 = vmatpush2.msra.mxu0 %v749_v6  ;;  %1636 = vmatprep.subr.mxu1 %v1974_v0 }
  0xaa   : > { %541 = vmatmul.mubr.f32.gmra.mxu0 %v2261_v5  ;;  %812 = vmatprep.subr.mxu0 %v1974_v0 }
  0xab   : > { %546 = vmatprep.mubr.f32.mxu0 %v1974_v0  ;;  %813 = vmatpush2.msra.mxu0 %v748_v8 }
  0xac   : > { %814 = vmatprep.subr.mxu0 %v1974_v0  ;;  %1668 = vmatpush2.msra.mxu1 %v749_v6 }
  0xad   : > { %815 = vmatpush2.msra.mxu0 %v747_v9  ;;  %1637 = vmatprep.subr.mxu1 %v1974_v0 }
  0xae   : > { %547 = vmatmul.mubr.f32.gmra.mxu0 %v2270_v7  ;;  %816 = vmatprep.subr.mxu0 %v1974_v0 }
  0xaf   : > { %552 = vmatprep.mubr.f32.mxu0 %v1974_v0  ;;  %817 = vmatpush2.msra.mxu0 %v746_v11 }
  0xb0   : > { %818 = vmatprep.subr.mxu0 %v1974_v0  ;;  %1669 = vmatpush2.msra.mxu1 %v748_v8 }
  0xb1   : > { %819 = vmatpush2.msra.mxu0 %v745_v13  ;;  %1638 = vmatprep.subr.mxu1 %v1974_v0 }
  0xb2   : > { %553 = vmatmul.mubr.f32.gmra.mxu0 %v2278_v10  ;;  %820 = vmatprep.subr.mxu0 %v1974_v0 }
  0xb3   : > { %558 = vmatprep.mubr.f32.mxu0 %v1974_v0  ;;  %821 = vmatpush2.msra.mxu0 %v744_v15 }
  0xb4   : > { %822 = vmatprep.subr.mxu0 %v1974_v0  ;;  %1670 = vmatpush2.msra.mxu1 %v747_v9 }
  0xb5   : > { %823 = vmatpush2.msra.mxu0 %v743_v17  ;;  %1639 = vmatprep.subr.mxu1 %v1974_v0 }
  0xb6   : > { %559 = vmatmul.mubr.f32.gmra.mxu0 %v2286_v12  ;;  %824 = vmatprep.subr.mxu0 %v1974_v0 }
  0xb7   : > { %564 = vmatprep.mubr.f32.mxu0 %v1974_v0  ;;  %825 = vmatpush2.msra.mxu0 %v742_v18 }
  0xb8   : > { %826 = vmatprep.subr.mxu0 %v1974_v0  ;;  %1671 = vmatpush2.msra.mxu1 %v746_v11 }
  0xb9   : > { %827 = vmatpush2.msra.mxu0 %v741_v20  ;;  %1640 = vmatprep.subr.mxu1 %v1974_v0 }
  0xba   : > { %565 = vmatmul.mubr.f32.gmra.mxu0 %v2294_v14  ;;  %1672 = vmatpush2.msra.mxu1 %v745_v13 }
  0xbb   : > { %570 = vmatprep.mubr.f32.mxu0 %v1974_v0  ;;  %1641 = vmatprep.subr.mxu1 %v1974_v0 }
  0xbc   : > { %1673 = vmatpush2.msra.mxu1 %v744_v15 }
  0xbd   : > { %1642 = vmatprep.subr.mxu1 %v1974_v0 }
  0xbe   : > { %571 = vmatmul.mubr.f32.gmra.mxu0 %v2302_v16  ;;  %1674 = vmatpush2.msra.mxu1 %v743_v17 }
  0xbf   : > { %576 = vmatprep.mubr.f32.mxu0 %v1974_v0  ;;  %1643 = vmatprep.subr.mxu1 %v1974_v0 }
  0xc0   : > { %1675 = vmatpush2.msra.mxu1 %v742_v18 }
  0xc1   : > { %1644 = vmatprep.subr.mxu1 %v1974_v0 }
  0xc2   : > { %577 = vmatmul.mubr.f32.gmra.mxu0 %v2310_v19  ;;  %1676 = vmatpush2.msra.mxu1 %v741_v20 }
  0xc3   : > { %582 = vmatprep.mubr.f32.mxu0 %v1974_v0 }
  0xc6   : > { %583 = vmatmul.mubr.f32.gmra.mxu0 %v2319_v21 }
  0xc7   : > { %588 = vmatprep.mubr.f32.mxu0 %v1974_v0 }
  0xca   : > { %589 = vmatmul.mubr.f32.gmra.mxu0 %v2325_v22 }
  0xcb   : > { %594 = vmatprep.mubr.f32.mxu0 %v1974_v0 }
  0xce   : > { %595 = vmatmul.mubr.f32.gmra.mxu0 %v2332_v23 }
  0xcf   : > { %600 = vmatprep.mubr.f32.mxu0 %v1974_v0 }
  0xd2   : > { %601 = vmatmul.mubr.f32.gmra.mxu0 %v2339_v24 }
  0xd3   : > { %606 = vmatprep.mubr.f32.mxu0 %v1974_v0 }
  0xd6   : > { %607 = vmatmul.mubr.f32.gmra.mxu0 %v2346_v25 }
  0xd7   : > { %612 = vmatprep.mubr.f32.mxu0 %v1974_v0 }
  0xda   : > { %613 = vmatmul.mubr.f32.gmra.mxu0 %v2351_v26 }
  0xdb   : > { %618 = vmatprep.mubr.f32.mxu0 %v1974_v0 }
  0xde   : > { %619 = vmatmul.mubr.f32.gmra.mxu0 %v2356_v27 }
  0xdf   : > { %624 = vmatprep.mubr.f32.mxu0 %v1974_v0 }
  0xe2   : > { %625 = vmatmul.mubr.f32.gmra.mxu0 %v2361_v28 }
  0xe3   : > { %630 = vmatprep.mubr.f32.mxu0 %v1974_v0 }
  0xe6   : > { %631 = vmatmul.mubr.f32.gmra.mxu0 %v2366_v29 }
  0xe7   : > { %636 = vmatprep.mubr.f32.mxu0 %v1974_v0 }
  0xea   : > { %637 = vmatmul.mubr.f32.gmra.mxu0 %v2371_v30 }
  0xeb   : > { %642 = vmatprep.mubr.f32.mxu0 %v1974_v0 }
  0xee   : > { %643 = vmatmul.mubr.f32.gmra.mxu0 %v2376_v31 }
  0xef   : > { %648 = vmatprep.mubr.f32.mxu0 %v1974_v0 }
  0xf2   : > { %649 = vmatmul.mubr.f32.gmra.mxu0 %v2381_v32 }
  0xf3   : > { %654 = vmatprep.mubr.f32.mxu0 %v1974_v0 }
  0xf6   : > { %655 = vmatmul.mubr.f32.gmra.mxu0 %v2386_v33 }
 0x13a   : > { %v470_v43 = vpop.f32.mrf.mxu0 }
 0x13b   : > { %v471_v44 = vadd.f32 %v470_v43, %v2392_v40 }
 0x13c   : > { %v472_v0 = vpop.f32.mrf.mxu0 }
 0x13d   : > { %v473_v46 = vadd.f32 %v472_v0, %v2394_v41  ;;  %v661_v50 = vmax.f32 %v471_v44, 0.0 }
 0x13e   : > { %v476_v47 = vpop.f32.mrf.mxu0 }
 0x13f   : > { %v662_v49 = vmax.f32 %v473_v46, 0.0  ;;  %v477_v52 = vadd.f32 %v476_v47, %v2392_v40 }
 0x140   : > { %v478_v53 = vpop.f32.mrf.mxu0 }
 0x141   : > { %v479_v55 = vadd.f32 %v478_v53, %v2394_v41  ;;  %828 = vmatprep.mubr.f32.mxu0 %v662_v49  ;;  %v663_v59 = vmax.f32 %v477_v52, 0.0 }
 0x142   : > { %v482_v56 = vpop.f32.mrf.mxu0  ;;  %829 = vmatmul.mubr.f32.vlgmr.msra.gmra.mxu0 %v661_v50 }
 0x143   : > { %v664_v58 = vmax.f32 %v479_v55, 0.0  ;;  %v483_v61 = vadd.f32 %v482_v56, %v2392_v40 }
 0x144   : > { %v484_v62 = vpop.f32.mrf.mxu0 }
 0x145   : > { %v485_v1 = vadd.f32 %v484_v62, %v2394_v41  ;;  %833 = vmatprep.mubr.f32.mxu0 %v664_v58  ;;  %v665_v6 = vmax.f32 %v483_v61, 0.0 }
 0x146   : > { %v488_v3 = vpop.f32.mrf.mxu0  ;;  %834 = vmatmul.mubr.f32.gmra.mxu0 %v663_v59 }
 0x147   : > { %v666_v4 = vmax.f32 %v485_v1, 0.0  ;;  %v489_v8 = vadd.f32 %v488_v3, %v2392_v40 }
 0x148   : > { %v490_v9 = vpop.f32.mrf.mxu0 }
 0x149   : > { %v491_v11 = vadd.f32 %v490_v9, %v2394_v41  ;;  %838 = vmatprep.mubr.f32.mxu0 %v666_v4  ;;  %v667_v17 = vmax.f32 %v489_v8, 0.0 }
 0x14a   : > { %v494_v13 = vpop.f32.mrf.mxu0  ;;  %839 = vmatmul.mubr.f32.gmra.mxu0 %v665_v6 }
 0x14b   : > { %v668_v15 = vmax.f32 %v491_v11, 0.0  ;;  %v495_v18 = vadd.f32 %v494_v13, %v2392_v40 }
 0x14c   : > { %v496_v20 = vpop.f32.mrf.mxu0 }
 0x14d   : > { %843 = vmatprep.mubr.f32.mxu0 %v668_v15  ;;  %v497_v34 = vadd.f32 %v496_v20, %v2394_v41  ;;  %v669_v37 = vmax.f32 %v495_v18, 0.0 }
 0x14e   : > { %v500_v35 = vpop.f32.mrf.mxu0  ;;  %844 = vmatmul.mubr.f32.gmra.mxu0 %v667_v17 }
 0x14f   : > { %v670_v36 = vmax.f32 %v497_v34, 0.0  ;;  %v501_v38 = vadd.f32 %v500_v35, %v2392_v40 }
 0x150   : > { %v502_v43 = vpop.f32.mrf.mxu0 }
 0x151   : > { %v503_v44 = vadd.f32 %v502_v43, %v2394_v41  ;;  %848 = vmatprep.mubr.f32.mxu1 %v670_v36  ;;  %v671_v47 = vmax.f32 %v501_v38, 0.0 }
 0x152   : > { %v506_v0 = vpop.f32.mrf.mxu0  ;;  %849 = vmatmul.mubr.f32.vlgmr.msra.gmra.mxu1 %v669_v37 }
 0x153   : > { %v672_v46 = vmax.f32 %v503_v44, 0.0  ;;  %v507_v49 = vadd.f32 %v506_v0, %v2392_v40 }
 0x154   : > { %v508_v50 = vpop.f32.mrf.mxu0 }
 0x155   : > { %v509_v52 = vadd.f32 %v508_v50, %v2394_v41  ;;  %853 = vmatprep.mubr.f32.mxu1 %v672_v46  ;;  %v673_v56 = vmax.f32 %v507_v49, 0.0 }
 0x156   : > { %v512_v53 = vpop.f32.mrf.mxu0  ;;  %854 = vmatmul.mubr.f32.gmra.mxu1 %v671_v47 }
 0x157   : > { %v674_v55 = vmax.f32 %v509_v52, 0.0  ;;  %v513_v58 = vadd.f32 %v512_v53, %v2392_v40 }
 0x158   : > { %v514_v59 = vpop.f32.mrf.mxu0 }
 0x159   : > { %v515_v61 = vadd.f32 %v514_v59, %v2394_v41  ;;  %858 = vmatprep.mubr.f32.mxu1 %v674_v55  ;;  %v675_v3 = vmax.f32 %v513_v58, 0.0 }
 0x15a   : > { %v518_v62 = vpop.f32.mrf.mxu0  ;;  %859 = vmatmul.mubr.f32.gmra.mxu1 %v673_v56 }
 0x15b   : > { %v676_v1 = vmax.f32 %v515_v61, 0.0  ;;  %v519_v4 = vadd.f32 %v518_v62, %v2392_v40 }
 0x15c   : > { %v520_v6 = vpop.f32.mrf.mxu0 }
 0x15d   : > { %v521_v8 = vadd.f32 %v520_v6, %v2394_v41  ;;  %863 = vmatprep.mubr.f32.mxu1 %v676_v1  ;;  %v677_v13 = vmax.f32 %v519_v4, 0.0 }
 0x15e   : > { %v524_v9 = vpop.f32.mrf.mxu0  ;;  %864 = vmatmul.mubr.f32.gmra.mxu1 %v675_v3 }
 0x15f   : > { %v678_v11 = vmax.f32 %v521_v8, 0.0  ;;  %v525_v15 = vadd.f32 %v524_v9, %v2392_v40 }
 0x160   : > { %v526_v17 = vpop.f32.mrf.mxu0 }
 0x161   : > { %v527_v18 = vadd.f32 %v526_v17, %v2394_v41  ;;  %868 = vmatprep.mubr.f32.mxu1 %v678_v11  ;;  %v679_v35 = vmax.f32 %v525_v15, 0.0 }
 0x162   : > { %v530_v20 = vpop.f32.mrf.mxu0  ;;  %869 = vmatmul.mubr.f32.gmra.mxu1 %v677_v13 }
 0x163   : > { %v680_v34 = vmax.f32 %v527_v18, 0.0  ;;  %v531_v36 = vadd.f32 %v530_v20, %v2392_v40 }
 0x164   : > { %v532_v37 = vpop.f32.mrf.mxu0 }
 0x165   : > { %v533_v38 = vadd.f32 %v532_v37, %v2394_v41  ;;  %873 = vmatprep.mubr.f32.mxu1 %v680_v34  ;;  %v681_v0 = vmax.f32 %v531_v36, 0.0 }
 0x166   : > { %v536_v43 = vpop.f32.mrf.mxu0  ;;  %874 = vmatmul.mubr.f32.gmra.mxu1 %v679_v35 }
 0x167   : > { %v682_v44 = vmax.f32 %v533_v38, 0.0  ;;  %v537_v46 = vadd.f32 %v536_v43, %v2392_v40 }
 0x168   : > { %v538_v47 = vpop.f32.mrf.mxu0 }
 0x169   : > { %v539_v49 = vadd.f32 %v538_v47, %v2394_v41  ;;  %878 = vmatprep.mubr.f32.mxu1 %v682_v44  ;;  %v683_v53 = vmax.f32 %v537_v46, 0.0 }
 0x16a   : > { %v542_v50 = vpop.f32.mrf.mxu0  ;;  %879 = vmatmul.mubr.f32.gmra.mxu1 %v681_v0 }
 0x16b   : > { %v684_v52 = vmax.f32 %v539_v49, 0.0  ;;  %v543_v55 = vadd.f32 %v542_v50, %v2392_v40 }
 0x16c   : > { %v544_v56 = vpop.f32.mrf.mxu0 }
 0x16d   : > { %v545_v58 = vadd.f32 %v544_v56, %v2394_v41  ;;  %883 = vmatprep.mubr.f32.mxu1 %v684_v52  ;;  %v685_v62 = vmax.f32 %v543_v55, 0.0 }
 0x16e   : > { %v548_v59 = vpop.f32.mrf.mxu0  ;;  %884 = vmatmul.mubr.f32.gmra.mxu1 %v683_v53 }
 0x16f   : > { %v686_v61 = vmax.f32 %v545_v58, 0.0  ;;  %v549_v1 = vadd.f32 %v548_v59, %v2392_v40 }
 0x170   : > { %v550_v3 = vpop.f32.mrf.mxu0 }
 0x171   : > { %v551_v4 = vadd.f32 %v550_v3, %v2394_v41  ;;  %888 = vmatprep.mubr.f32.mxu1 %v686_v61  ;;  %v687_v9 = vmax.f32 %v549_v1, 0.0 }
 0x172   : > { %v554_v6 = vpop.f32.mrf.mxu0  ;;  %889 = vmatmul.mubr.f32.gmra.mxu1 %v685_v62 }
 0x173   : > { %v688_v8 = vmax.f32 %v551_v4, 0.0  ;;  %v555_v11 = vadd.f32 %v554_v6, %v2392_v40 }
 0x174   : > { %v556_v13 = vpop.f32.mrf.mxu0 }
 0x175   : > { %v557_v15 = vadd.f32 %v556_v13, %v2394_v41  ;;  %893 = vmatprep.mubr.f32.mxu1 %v688_v8  ;;  %v689_v20 = vmax.f32 %v555_v11, 0.0 }
 0x176   : > { %v560_v17 = vpop.f32.mrf.mxu0  ;;  %894 = vmatmul.mubr.f32.gmra.mxu1 %v687_v9 }
 0x177   : > { %v690_v18 = vmax.f32 %v557_v15, 0.0  ;;  %v561_v34 = vadd.f32 %v560_v17, %v2392_v40 }
 0x178   : > { %v562_v35 = vpop.f32.mrf.mxu0 }
 0x179   : > { %v563_v36 = vadd.f32 %v562_v35, %v2394_v41  ;;  %898 = vmatprep.mubr.f32.mxu1 %v690_v18  ;;  %v691_v43 = vmax.f32 %v561_v34, 0.0 }
 0x17a   : > { %v566_v37 = vpop.f32.mrf.mxu0  ;;  %899 = vmatmul.mubr.f32.gmra.mxu1 %v689_v20 }
 0x17b   : > { %v692_v38 = vmax.f32 %v563_v36, 0.0  ;;  %v567_v44 = vadd.f32 %v566_v37, %v2392_v40 }
 0x17c   : > { %v568_v0 = vpop.f32.mrf.mxu0 }
 0x17d   : > { %v569_v46 = vadd.f32 %v568_v0, %v2394_v41  ;;  %903 = vmatprep.mubr.f32.mxu1 %v692_v38  ;;  %v693_v50 = vmax.f32 %v567_v44, 0.0 }
 0x17e   : > { %v572_v47 = vpop.f32.mrf.mxu0  ;;  %904 = vmatmul.mubr.f32.gmra.mxu1 %v691_v43 }
 0x17f   : > { %v694_v49 = vmax.f32 %v569_v46, 0.0  ;;  %v573_v52 = vadd.f32 %v572_v47, %v2392_v40 }
 0x180   : > { %v574_v53 = vpop.f32.mrf.mxu0 }
 0x181   : > { %v575_v55 = vadd.f32 %v574_v53, %v2394_v41  ;;  %908 = vmatprep.mubr.f32.mxu1 %v694_v49  ;;  %v695_v59 = vmax.f32 %v573_v52, 0.0 }
 0x182   : > { %v578_v56 = vpop.f32.mrf.mxu0  ;;  %909 = vmatmul.mubr.f32.gmra.mxu1 %v693_v50 }
 0x183   : > { %v696_v58 = vmax.f32 %v575_v55, 0.0  ;;  %v579_v61 = vadd.f32 %v578_v56, %v2392_v40 }
 0x184   : > { %v580_v62 = vpop.f32.mrf.mxu0 }
 0x185   : > { %v581_v1 = vadd.f32 %v580_v62, %v2394_v41  ;;  %913 = vmatprep.mubr.f32.mxu1 %v696_v58  ;;  %v697_v6 = vmax.f32 %v579_v61, 0.0 }
 0x186   : > { %v584_v3 = vpop.f32.mrf.mxu0  ;;  %914 = vmatmul.mubr.f32.gmra.mxu1 %v695_v59 }
 0x187   : > { %v698_v4 = vmax.f32 %v581_v1, 0.0  ;;  %v585_v8 = vadd.f32 %v584_v3, %v2392_v40 }
 0x188   : > { %v586_v9 = vpop.f32.mrf.mxu0 }
 0x189   : > { %v587_v11 = vadd.f32 %v586_v9, %v2394_v41  ;;  %918 = vmatprep.mubr.f32.mxu1 %v698_v4  ;;  %v699_v17 = vmax.f32 %v585_v8, 0.0 }
 0x18a   : > { %v590_v13 = vpop.f32.mrf.mxu0  ;;  %919 = vmatmul.mubr.f32.gmra.mxu1 %v697_v6 }
 0x18b   : > { %v700_v15 = vmax.f32 %v587_v11, 0.0  ;;  %v591_v18 = vadd.f32 %v590_v13, %v2392_v40 }
 0x18c   : > { %v592_v20 = vpop.f32.mrf.mxu0 }
 0x18d   : > { %v593_v34 = vadd.f32 %v592_v20, %v2394_v41  ;;  %923 = vmatprep.mubr.f32.mxu1 %v700_v15  ;;  %v701_v37 = vmax.f32 %v591_v18, 0.0 }
 0x18e   : > { %v596_v35 = vpop.f32.mrf.mxu0  ;;  %924 = vmatmul.mubr.f32.gmra.mxu1 %v699_v17 }
 0x18f   : > { %v702_v36 = vmax.f32 %v593_v34, 0.0  ;;  %v597_v38 = vadd.f32 %v596_v35, %v2392_v40 }
 0x190   : > { %v598_v43 = vpop.f32.mrf.mxu0 }
 0x191   : > { %v599_v44 = vadd.f32 %v598_v43, %v2394_v41  ;;  %928 = vmatprep.mubr.f32.mxu1 %v702_v36  ;;  %v703_v47 = vmax.f32 %v597_v38, 0.0 }
 0x192   : > { %v602_v0 = vpop.f32.mrf.mxu0  ;;  %929 = vmatmul.mubr.f32.gmra.mxu1 %v701_v37 }
 0x193   : > { %v704_v46 = vmax.f32 %v599_v44, 0.0  ;;  %v603_v49 = vadd.f32 %v602_v0, %v2392_v40 }
 0x194   : > { %v604_v50 = vpop.f32.mrf.mxu0 }
 0x195   : > { %v605_v52 = vadd.f32 %v604_v50, %v2394_v41  ;;  %933 = vmatprep.mubr.f32.mxu1 %v704_v46  ;;  %v705_v56 = vmax.f32 %v603_v49, 0.0 }
 0x196   : > { %v608_v53 = vpop.f32.mrf.mxu0  ;;  %934 = vmatmul.mubr.f32.gmra.mxu1 %v703_v47 }
 0x197   : > { %v706_v55 = vmax.f32 %v605_v52, 0.0  ;;  %v609_v58 = vadd.f32 %v608_v53, %v2392_v40 }
 0x198   : > { %v610_v59 = vpop.f32.mrf.mxu0 }
 0x199   : > { %v611_v61 = vadd.f32 %v610_v59, %v2394_v41  ;;  %938 = vmatprep.mubr.f32.mxu1 %v706_v55  ;;  %v707_v3 = vmax.f32 %v609_v58, 0.0 }
 0x19a   : > { %v614_v62 = vpop.f32.mrf.mxu0  ;;  %939 = vmatmul.mubr.f32.gmra.mxu1 %v705_v56 }
 0x19b   : > { %v708_v1 = vmax.f32 %v611_v61, 0.0  ;;  %v615_v4 = vadd.f32 %v614_v62, %v2392_v40 }
 0x19c   : > { %v616_v6 = vpop.f32.mrf.mxu0 }
 0x19d   : > { %v617_v8 = vadd.f32 %v616_v6, %v2394_v41  ;;  %943 = vmatprep.mubr.f32.mxu1 %v708_v1  ;;  %v709_v13 = vmax.f32 %v615_v4, 0.0 }
 0x19e   : > { %v620_v9 = vpop.f32.mrf.mxu0  ;;  %944 = vmatmul.mubr.f32.gmra.mxu1 %v707_v3 }
 0x19f   : > { %v710_v11 = vmax.f32 %v617_v8, 0.0  ;;  %v621_v15 = vadd.f32 %v620_v9, %v2392_v40 }
 0x1a0   : > { %v622_v17 = vpop.f32.mrf.mxu0 }
 0x1a1   : > { %v623_v18 = vadd.f32 %v622_v17, %v2394_v41  ;;  %948 = vmatprep.mubr.f32.mxu1 %v710_v11  ;;  %v711_v35 = vmax.f32 %v621_v15, 0.0 }
 0x1a2   : > { %v626_v20 = vpop.f32.mrf.mxu0  ;;  %949 = vmatmul.mubr.f32.gmra.mxu1 %v709_v13 }
 0x1a3   : > { %v712_v34 = vmax.f32 %v623_v18, 0.0  ;;  %v627_v36 = vadd.f32 %v626_v20, %v2392_v40 }
 0x1a4   : > { %v628_v37 = vpop.f32.mrf.mxu0 }
 0x1a5   : > { %v629_v38 = vadd.f32 %v628_v37, %v2394_v41  ;;  %953 = vmatprep.mubr.f32.mxu1 %v712_v34  ;;  %v713_v0 = vmax.f32 %v627_v36, 0.0 }
 0x1a6   : > { %v632_v43 = vpop.f32.mrf.mxu0  ;;  %954 = vmatmul.mubr.f32.gmra.mxu1 %v711_v35 }
 0x1a7   : > { %v714_v44 = vmax.f32 %v629_v38, 0.0  ;;  %v633_v46 = vadd.f32 %v632_v43, %v2392_v40  ;;  %v2463_v43 = vld [vmem:[%s2981_s4] ss:$0 sm:$0xff] }
 0x1a8   : > { %v634_v47 = vpop.f32.mrf.mxu0 }
 0x1a9   : > { %v635_v49 = vadd.f32 %v634_v47, %v2394_v41  ;;  %958 = vmatprep.mubr.f32.mxu1 %v714_v44  ;;  %v715_v53 = vmax.f32 %v633_v46, 0.0 }
 0x1aa   : > { %v638_v50 = vpop.f32.mrf.mxu0  ;;  %959 = vmatmul.mubr.f32.gmra.mxu1 %v713_v0 }
 0x1ab   : > { %v716_v52 = vmax.f32 %v635_v49, 0.0  ;;  %v639_v55 = vadd.f32 %v638_v50, %v2392_v40 }
 0x1ac   : > { %v640_v56 = vpop.f32.mrf.mxu0 }
 0x1ad   : > { %v641_v58 = vadd.f32 %v640_v56, %v2394_v41  ;;  %963 = vmatprep.mubr.f32.mxu1 %v716_v52  ;;  %v717_v62 = vmax.f32 %v639_v55, 0.0  ;;  %v1816_v52 = vld [vmem:[%s2157_s11 + $0x8] sm:$0xff] }
 0x1ae   : > { %v644_v59 = vpop.f32.mrf.mxu0  ;;  %964 = vmatmul.mubr.f32.gmra.mxu1 %v715_v53 }
 0x1af   : > { %v718_v61 = vmax.f32 %v641_v58, 0.0  ;;  %v645_v1 = vadd.f32 %v644_v59, %v2392_v40 }
 0x1b0   : > { %v646_v3 = vpop.f32.mrf.mxu0 }
 0x1b1   : > { %v647_v4 = vadd.f32 %v646_v3, %v2394_v41  ;;  %968 = vmatprep.mubr.f32.mxu1 %v718_v61  ;;  %v719_v9 = vmax.f32 %v645_v1, 0.0 }
 0x1b2   : > { %v650_v6 = vpop.f32.mrf.mxu0  ;;  %969 = vmatmul.mubr.f32.gmra.mxu1 %v717_v62 }
 0x1b3   : > { %v720_v8 = vmax.f32 %v647_v4, 0.0  ;;  %v651_v11 = vadd.f32 %v650_v6, %v2392_v40 }
 0x1b4   : > { %v652_v13 = vpop.f32.mrf.mxu0 }
 0x1b5   : > { %v653_v15 = vadd.f32 %v652_v13, %v2394_v41  ;;  %973 = vmatprep.mubr.f32.mxu1 %v720_v8  ;;  %v721_v20 = vmax.f32 %v651_v11, 0.0 }
 0x1b6   : > { %v656_v17 = vpop.f32.mrf.mxu0  ;;  %974 = vmatmul.mubr.f32.gmra.mxu1 %v719_v9 }
 0x1b7   : > { %v722_v18 = vmax.f32 %v653_v15, 0.0  ;;  %v657_v34 = vadd.f32 %v656_v17, %v2392_v40  ;;  %v1815_v40 = vld [vmem:[%s2157_s11] sm:$0xff]  ;;  %s2930_s11 = scalar_lea.hbm %s2984_s7, %s1612_s21 }
 0x1b8   : > { %v658_v35 = vpop.f32.mrf.mxu0 }
 0x1b9   : > { %v659_v36 = vadd.f32 %v658_v35, %v2394_v41  ;;  %978 = vmatprep.mubr.f32.mxu1 %v722_v18  ;;  %v723_v38 = vmax.f32 %v657_v34, 0.0 }
 0x1ba   : > { %979 = vmatmul.mubr.f32.gmra.mxu1 %v721_v20 }
 0x1bb   : > { %v724_v37 = vmax.f32 %v659_v36, 0.0 }
 0x1bd   : > { %983 = vmatprep.mubr.f32.mxu1 %v724_v37 }
 0x1be   : > { %984 = vmatmul.mubr.f32.gmra.mxu1 %v723_v38 }
 0x202   : > { %v830_v44 = vpop.f32.mrf.mxu0 }
 0x203   : > { %v831_v0 = vadd.f32 %v2463_v43, %v830_v44 }
 0x204   : > { %v832_v46 = vpop.f32.mrf.mxu0 }
 0x205   : > { %v2467_v47 = vadd.f32 %v1815_v40, %v831_v0 }
 0x206   : > { %v835_v41 = vpop.f32.mrf.mxu0 }
 0x207   : > { %v836_v49 = vadd.f32 %v2463_v43, %v835_v41  ;;  %1021 = vadd.xlane.f32.xlu0 %v2467_v47 }
 0x208   : > { %v837_v50 = vpop.f32.mrf.mxu0 }
 0x209   : > { %v2472_v53 = vadd.f32 %v1816_v52, %v836_v49 }
 0x20a   : > { %v840_v55 = vpop.f32.mrf.mxu0 }
 0x20b   : > { %v841_v56 = vadd.f32 %v2463_v43, %v840_v55  ;;  %1023 = vadd.xlane.f32.xlu0 %v2472_v53 }
 0x20c   : > { %v842_v58 = vpop.f32.mrf.mxu0 }
 0x20d   : > { %v2477_v59 = vadd.f32 %v841_v56, %v2179_v39 }
 0x20e   : > { %v845_v61 = vpop.f32.mrf.mxu0 }
 0x20f   : > { %v846_v62 = vadd.f32 %v2463_v43, %v845_v61  ;;  %1025 = vadd.xlane.f32.xlu1 %v2477_v59 }
 0x210   : > { %v847_v1 = vpop.f32.mrf.mxu0 }
 0x211   : > { %v2482_v3 = vadd.f32 %v846_v62, %v2187_v42 }
 0x212   : > { %v850_v4 = vpop.f32.mrf.mxu1 }
 0x213   : > { %v851_v6 = vadd.f32 %v2463_v43, %v850_v4  ;;  %1027 = vadd.xlane.f32.xlu1 %v2482_v3 }
 0x214   : > { %v852_v8 = vpop.f32.mrf.mxu1 }
 0x215   : > { %v2487_v9 = vadd.f32 %v851_v6, %v2195_v45 }
 0x216   : > { %v855_v39 = vpop.f32.mrf.mxu1 }
 0x217   : > { %v856_v11 = vadd.f32 %v2463_v43, %v855_v39  ;;  %1029 = vadd.xlane.f32.xlu0 %v2487_v9 }
 0x218   : > { %v857_v13 = vpop.f32.mrf.mxu1 }
 0x219   : > { %v2492_v15 = vadd.f32 %v856_v11, %v2203_v48 }
 0x21a   : > { %v860_v42 = vpop.f32.mrf.mxu1 }
 0x21b   : > { %v861_v17 = vadd.f32 %v2463_v43, %v860_v42  ;;  %1031 = vadd.xlane.f32.xlu1 %v2492_v15 }
 0x21c   : > { %v862_v18 = vpop.f32.mrf.mxu1 }
 0x21d   : > { %v2497_v20 = vadd.f32 %v861_v17, %v2211_v51 }
 0x21e   : > { %v865_v45 = vpop.f32.mrf.mxu1 }
 0x21f   : > { %v866_v34 = vadd.f32 %v2463_v43, %v865_v45  ;;  %1033 = vadd.xlane.f32.xlu0 %v2497_v20 }
 0x220   : > { %v867_v35 = vpop.f32.mrf.mxu1 }
 0x221   : > { %v2502_v36 = vadd.f32 %v866_v34, %v2219_v54 }
 0x222   : > { %v870_v48 = vpop.f32.mrf.mxu1 }
 0x223   : > { %v871_v37 = vadd.f32 %v2463_v43, %v870_v48  ;;  %1035 = vadd.xlane.f32.xlu1 %v2502_v36 }
 0x224   : > { %v872_v38 = vpop.f32.mrf.mxu1 }
 0x225   : > { %v2507_v44 = vadd.f32 %v871_v37, %v2227_v57 }
 0x226   : > { %v875_v51 = vpop.f32.mrf.mxu1 }
 0x227   : > { %v876_v0 = vadd.f32 %v2463_v43, %v875_v51  ;;  %1037 = vadd.xlane.f32.xlu0 %v2507_v44 }
 0x228   : > { %v877_v46 = vpop.f32.mrf.mxu1 }
 0x229   : > { %v2512_v40 = vadd.f32 %v876_v0, %v2235_v60 }
 0x22a   : > { %v880_v54 = vpop.f32.mrf.mxu1 }
 0x22b   : > { %v881_v41 = vadd.f32 %v2463_v43, %v880_v54  ;;  %1039 = vadd.xlane.f32.xlu1 %v2512_v40 }
 0x22c   : > { %v882_v49 = vpop.f32.mrf.mxu1 }
 0x22d   : > { %v2517_v50 = vadd.f32 %v881_v41, %v2243_v63 }
 0x22e   : > { %v885_v57 = vpop.f32.mrf.mxu1 }
 0x22f   : > { %v886_v52 = vadd.f32 %v2463_v43, %v885_v57  ;;  %1041 = vadd.xlane.f32.xlu0 %v2517_v50 }
 0x230   : > { %v887_v55 = vpop.f32.mrf.mxu1 }
 0x231   : > { %v2522_v56 = vadd.f32 %v886_v52, %v2251_v2 }
 0x232   : > { %v890_v60 = vpop.f32.mrf.mxu1 }
 0x233   : > { %v891_v58 = vadd.f32 %v2463_v43, %v890_v60  ;;  %1043 = vadd.xlane.f32.xlu1 %v2522_v56 }
 0x234   : > { %v892_v61 = vpop.f32.mrf.mxu1 }
 0x235   : > { %v2527_v62 = vadd.f32 %v891_v58, %v2261_v5 }
 0x236   : > { %v895_v63 = vpop.f32.mrf.mxu1 }
 0x237   : > { %v896_v1 = vadd.f32 %v2463_v43, %v895_v63  ;;  %1045 = vadd.xlane.f32.xlu0 %v2527_v62 }
 0x238   : > { %v897_v4 = vpop.f32.mrf.mxu1 }
 0x239   : > { %v2532_v6 = vadd.f32 %v896_v1, %v2270_v7 }
 0x23a   : > { %v900_v2 = vpop.f32.mrf.mxu1 }
 0x23b   : > { %v901_v8 = vadd.f32 %v2463_v43, %v900_v2  ;;  %1047 = vadd.xlane.f32.xlu1 %v2532_v6 }
 0x23c   : > { %v902_v39 = vpop.f32.mrf.mxu1 }
 0x23d   : > { %v2537_v11 = vadd.f32 %v901_v8, %v2278_v10 }
 0x23e   : > { %v905_v5 = vpop.f32.mrf.mxu1 }
 0x23f   : > { %v906_v13 = vadd.f32 %v2463_v43, %v905_v5  ;;  %1049 = vadd.xlane.f32.xlu0 %v2537_v11 }
 0x240   : > { %v907_v42 = vpop.f32.mrf.mxu1 }
 0x241   : > { %v2542_v17 = vadd.f32 %v906_v13, %v2286_v12 }
 0x242   : > { %v910_v7 = vpop.f32.mrf.mxu1 }
 0x243   : > { %v911_v18 = vadd.f32 %v2463_v43, %v910_v7  ;;  %1051 = vadd.xlane.f32.xlu1 %v2542_v17 }
 0x244   : > { %v912_v45 = vpop.f32.mrf.mxu1 }
 0x245   : > { %v2547_v34 = vadd.f32 %v911_v18, %v2294_v14 }
 0x246   : > { %v915_v10 = vpop.f32.mrf.mxu1 }
 0x247   : > { %v916_v35 = vadd.f32 %v2463_v43, %v915_v10  ;;  %1053 = vadd.xlane.f32.xlu0 %v2547_v34 }
 0x248   : > { %v917_v48 = vpop.f32.mrf.mxu1 }
 0x249   : > { %v2552_v37 = vadd.f32 %v916_v35, %v2302_v16 }
 0x24a   : > { %v920_v12 = vpop.f32.mrf.mxu1 }
 0x24b   : > { %v921_v38 = vadd.f32 %v2463_v43, %v920_v12  ;;  %1055 = vadd.xlane.f32.xlu1 %v2552_v37 }
 0x24c   : > { %v922_v51 = vpop.f32.mrf.mxu1 }
 0x24d   : > { %v2557_v0 = vadd.f32 %v921_v38, %v2310_v19 }
 0x24e   : > { %v925_v14 = vpop.f32.mrf.mxu1 }
 0x24f   : > { %v926_v46 = vadd.f32 %v2463_v43, %v925_v14  ;;  %1057 = vadd.xlane.f32.xlu0 %v2557_v0 }
 0x250   : > { %v927_v54 = vpop.f32.mrf.mxu1 }
 0x251   : > { %v2562_v41 = vadd.f32 %v926_v46, %v2319_v21 }
 0x252   : > { %v930_v16 = vpop.f32.mrf.mxu1 }
 0x253   : > { %v931_v49 = vadd.f32 %v2463_v43, %v930_v16  ;;  %1059 = vadd.xlane.f32.xlu1 %v2562_v41 }
 0x254   : > { %v932_v57 = vpop.f32.mrf.mxu1 }
 0x255   : > { %v2567_v52 = vadd.f32 %v931_v49, %v2325_v22 }
 0x256   : > { %v935_v19 = vpop.f32.mrf.mxu1 }
 0x257   : > { %v936_v55 = vadd.f32 %v2463_v43, %v935_v19  ;;  %1061 = vadd.xlane.f32.xlu0 %v2567_v52 }
 0x258   : > { %v937_v60 = vpop.f32.mrf.mxu1 }
 0x259   : > { %v2572_v58 = vadd.f32 %v936_v55, %v2332_v23 }
 0x25a   : > { %v940_v21 = vpop.f32.mrf.mxu1 }
 0x25b   : > { %v941_v61 = vadd.f32 %v2463_v43, %v940_v21  ;;  %1063 = vadd.xlane.f32.xlu1 %v2572_v58 }
 0x25c   : > { %v942_v63 = vpop.f32.mrf.mxu1 }
 0x25d   : > { %v2577_v1 = vadd.f32 %v941_v61, %v2339_v24 }
 0x25e   : > { %v945_v22 = vpop.f32.mrf.mxu1 }
 0x25f   : > { %v946_v4 = vadd.f32 %v2463_v43, %v945_v22  ;;  %1065 = vadd.xlane.f32.xlu0 %v2577_v1 }
 0x260   : > { %v947_v2 = vpop.f32.mrf.mxu1 }
 0x261   : > { %v2582_v8 = vadd.f32 %v946_v4, %v2346_v25 }
 0x262   : > { %v950_v23 = vpop.f32.mrf.mxu1 }
 0x263   : > { %v951_v39 = vadd.f32 %v2463_v43, %v950_v23  ;;  %1067 = vadd.xlane.f32.xlu1 %v2582_v8 }
 0x264   : > { %v952_v5 = vpop.f32.mrf.mxu1 }
 0x265   : > { %v2587_v13 = vadd.f32 %v951_v39, %v2351_v26 }
 0x266   : > { %v955_v24 = vpop.f32.mrf.mxu1 }
 0x267   : > { %v956_v42 = vadd.f32 %v2463_v43, %v955_v24  ;;  %1069 = vadd.xlane.f32.xlu0 %v2587_v13 }
 0x268   : > { %v957_v7 = vpop.f32.mrf.mxu1 }
 0x269   : > { %v2592_v18 = vadd.f32 %v956_v42, %v2356_v27 }
 0x26a   : > { %v960_v25 = vpop.f32.mrf.mxu1 }
 0x26b   : > { %v961_v45 = vadd.f32 %v2463_v43, %v960_v25  ;;  %1071 = vadd.xlane.f32.xlu1 %v2592_v18 }
 0x26c   : > { %v962_v10 = vpop.f32.mrf.mxu1 }
 0x26d   : > { %v2597_v35 = vadd.f32 %v961_v45, %v2361_v28 }
 0x26e   : > { %v965_v26 = vpop.f32.mrf.mxu1 }
 0x26f   : > { %v966_v48 = vadd.f32 %v2463_v43, %v965_v26  ;;  %1073 = vadd.xlane.f32.xlu0 %v2597_v35 }
 0x270   : > { %v967_v12 = vpop.f32.mrf.mxu1 }
 0x271   : > { %v2602_v38 = vadd.f32 %v966_v48, %v2366_v29 }
 0x272   : > { %v970_v27 = vpop.f32.mrf.mxu1 }
 0x273   : > { %v971_v51 = vadd.f32 %v2463_v43, %v970_v27  ;;  %1075 = vadd.xlane.f32.xlu1 %v2602_v38 }
 0x274   : > { %v972_v14 = vpop.f32.mrf.mxu1 }
 0x275   : > { %v2607_v46 = vadd.f32 %v971_v51, %v2371_v30 }
 0x276   : > { %v975_v28 = vpop.f32.mrf.mxu1 }
 0x277   : > { %v976_v54 = vadd.f32 %v2463_v43, %v975_v28  ;;  %1077 = vadd.xlane.f32.xlu0 %v2607_v46 }
 0x278   : > { %v977_v16 = vpop.f32.mrf.mxu1 }
 0x279   : > { %v2612_v49 = vadd.f32 %v976_v54, %v2376_v31 }
 0x27a   : > { %v980_v29 = vpop.f32.mrf.mxu1 }
 0x27b   : > { %v981_v57 = vadd.f32 %v2463_v43, %v980_v29  ;;  %1079 = vadd.xlane.f32.xlu1 %v2612_v49 }
 0x27c   : > { %v982_v19 = vpop.f32.mrf.mxu1 }
 0x27d   : > { %v2617_v55 = vadd.f32 %v981_v57, %v2381_v32 }
 0x27e   : > { %v985_v30 = vpop.f32.mrf.mxu1 }
 0x27f   : > { %v986_v60 = vadd.f32 %v2463_v43, %v985_v30  ;;  %1081 = vadd.xlane.f32.xlu0 %v2617_v55 }
 0x280   : > { %v987_v21 = vpop.f32.mrf.mxu1 }
 0x281   : > { %v2622_v61 = vadd.f32 %v986_v60, %v2386_v33 }
 0x283   : > { %1083 = vadd.xlane.f32.xlu1 %v2622_v61 }
 0x290   : > { %v1022_v31 = vpop.xlane.xlu0 %1021 }
 0x291   : > { %v1086_v63 = vmul.f32 0.0078125, %v1022_v31 }
 0x293   : > { %v2626_v22 = vsub.f32 %v2467_v47, %v1086_v63 }
 0x294   : > { %v1024_v4 = vpop.xlane.xlu0 %1023 }
 0x295   : > { %v1087_v2 = vmul.f32 0.0078125, %v1024_v4  ;;  %v1150_v32 = vmul.f32 %v2626_v22, %v2626_v22 }
 0x297   : > { %v2631_v43 = vsub.f32 %v2472_v53, %v1087_v2  ;;  %1182 = vadd.xlane.f32.xlu0 %v1150_v32 }
 0x298   : > { %v1026_v23 = vpop.xlane.xlu1 %1025 }
 0x299   : > { %v1088_v39 = vmul.f32 0.0078125, %v1026_v23  ;;  %v1151_v33 = vmul.f32 %v2631_v43, %v2631_v43 }
 0x29b   : > { %v2636_v5 = vsub.f32 %v2477_v59, %v1088_v39  ;;  %1184 = vadd.xlane.f32.xlu1 %v1151_v33 }
 0x29c   : > { %v1028_v47 = vpop.xlane.xlu1 %1027 }
 0x29d   : > { %v1089_v24 = vmul.f32 0.0078125, %v1028_v47  ;;  %v1152_v42 = vmul.f32 %v2636_v5, %v2636_v5 }
 0x29f   : > { %v2641_v7 = vsub.f32 %v2482_v3, %v1089_v24  ;;  %1186 = vadd.xlane.f32.xlu0 %v1152_v42 }
 0x2a0   : > { %v1030_v53 = vpop.xlane.xlu0 %1029 }
 0x2a1   : > { %v1090_v25 = vmul.f32 0.0078125, %v1030_v53  ;;  %v1153_v45 = vmul.f32 %v2641_v7, %v2641_v7 }
 0x2a3   : > { %v2646_v10 = vsub.f32 %v2487_v9, %v1090_v25  ;;  %1188 = vadd.xlane.f32.xlu1 %v1153_v45 }
 0x2a4   : > { %v1032_v59 = vpop.xlane.xlu1 %1031 }
 0x2a5   : > { %v1091_v26 = vmul.f32 0.0078125, %v1032_v59  ;;  %v1154_v48 = vmul.f32 %v2646_v10, %v2646_v10 }
 0x2a7   : > { %v2651_v12 = vsub.f32 %v2492_v15, %v1091_v26  ;;  %1190 = vadd.xlane.f32.xlu0 %v1154_v48 }
 0x2a8   : > { %v1034_v3 = vpop.xlane.xlu0 %1033 }
 0x2a9   : > { %v1092_v27 = vmul.f32 0.0078125, %v1034_v3  ;;  %v1155_v51 = vmul.f32 %v2651_v12, %v2651_v12 }
 0x2ab   : > { %v2656_v14 = vsub.f32 %v2497_v20, %v1092_v27  ;;  %1192 = vadd.xlane.f32.xlu1 %v1155_v51 }
 0x2ac   : > { %v1036_v9 = vpop.xlane.xlu1 %1035 }
 0x2ad   : > { %v1093_v28 = vmul.f32 0.0078125, %v1036_v9  ;;  %v1156_v54 = vmul.f32 %v2656_v14, %v2656_v14 }
 0x2af   : > { %v2661_v16 = vsub.f32 %v2502_v36, %v1093_v28  ;;  %1194 = vadd.xlane.f32.xlu0 %v1156_v54 }
 0x2b0   : > { %v1038_v15 = vpop.xlane.xlu0 %1037 }
 0x2b1   : > { %v1094_v29 = vmul.f32 0.0078125, %v1038_v15  ;;  %v1157_v57 = vmul.f32 %v2661_v16, %v2661_v16 }
 0x2b3   : > { %v2666_v19 = vsub.f32 %v2507_v44, %v1094_v29  ;;  %1196 = vadd.xlane.f32.xlu1 %v1157_v57 }
 0x2b4   : > { %v1040_v20 = vpop.xlane.xlu1 %1039 }
 0x2b5   : > { %v1095_v30 = vmul.f32 0.0078125, %v1040_v20  ;;  %v1158_v60 = vmul.f32 %v2666_v19, %v2666_v19 }
 0x2b7   : > { %v2671_v21 = vsub.f32 %v2512_v40, %v1095_v30  ;;  %1198 = vadd.xlane.f32.xlu0 %v1158_v60 }
 0x2b8   : > { %v1042_v36 = vpop.xlane.xlu0 %1041 }
 0x2b9   : > { %v1096_v31 = vmul.f32 0.0078125, %v1042_v36  ;;  %v1159_v63 = vmul.f32 %v2671_v21, %v2671_v21 }
 0x2bb   : > { %v2676_v4 = vsub.f32 %v2517_v50, %v1096_v31  ;;  %1200 = vadd.xlane.f32.xlu1 %v1159_v63 }
 0x2bc   : > { %v1044_v44 = vpop.xlane.xlu1 %1043 }
 0x2bd   : > { %v1097_v2 = vmul.f32 0.0078125, %v1044_v44  ;;  %v1160_v32 = vmul.f32 %v2676_v4, %v2676_v4 }
 0x2bf   : > { %v2681_v23 = vsub.f32 %v2522_v56, %v1097_v2  ;;  %1202 = vadd.xlane.f32.xlu0 %v1160_v32 }
 0x2c0   : > { %v1046_v40 = vpop.xlane.xlu0 %1045 }
 0x2c1   : > { %v1098_v39 = vmul.f32 0.0078125, %v1046_v40  ;;  %v1161_v33 = vmul.f32 %v2681_v23, %v2681_v23 }
 0x2c3   : > { %v2686_v47 = vsub.f32 %v2527_v62, %v1098_v39  ;;  %1204 = vadd.xlane.f32.xlu1 %v1161_v33 }
 0x2c4   : > { %v1048_v50 = vpop.xlane.xlu1 %1047 }
 0x2c5   : > { %v1099_v24 = vmul.f32 0.0078125, %v1048_v50  ;;  %v1162_v42 = vmul.f32 %v2686_v47, %v2686_v47 }
 0x2c7   : > { %v2691_v53 = vsub.f32 %v2532_v6, %v1099_v24  ;;  %1206 = vadd.xlane.f32.xlu0 %v1162_v42 }
 0x2c8   : > { %v1050_v56 = vpop.xlane.xlu0 %1049 }
 0x2c9   : > { %v1100_v25 = vmul.f32 0.0078125, %v1050_v56  ;;  %v1163_v45 = vmul.f32 %v2691_v53, %v2691_v53 }
 0x2cb   : > { %v2696_v59 = vsub.f32 %v2537_v11, %v1100_v25  ;;  %1208 = vadd.xlane.f32.xlu1 %v1163_v45 }
 0x2cc   : > { %v1052_v62 = vpop.xlane.xlu1 %1051 }
 0x2cd   : > { %v1101_v26 = vmul.f32 0.0078125, %v1052_v62  ;;  %v1164_v48 = vmul.f32 %v2696_v59, %v2696_v59 }
 0x2cf   : > { %v2701_v3 = vsub.f32 %v2542_v17, %v1101_v26  ;;  %1210 = vadd.xlane.f32.xlu0 %v1164_v48 }
 0x2d0   : > { %v1054_v6 = vpop.xlane.xlu0 %1053 }
 0x2d1   : > { %v1102_v27 = vmul.f32 0.0078125, %v1054_v6  ;;  %v1165_v51 = vmul.f32 %v2701_v3, %v2701_v3 }
 0x2d3   : > { %v2706_v9 = vsub.f32 %v2547_v34, %v1102_v27  ;;  %1212 = vadd.xlane.f32.xlu1 %v1165_v51 }
 0x2d4   : > { %v1056_v11 = vpop.xlane.xlu1 %1055 }
 0x2d5   : > { %v1103_v28 = vmul.f32 0.0078125, %v1056_v11  ;;  %v1166_v54 = vmul.f32 %v2706_v9, %v2706_v9 }
 0x2d7   : > { %v2711_v15 = vsub.f32 %v2552_v37, %v1103_v28  ;;  %1214 = vadd.xlane.f32.xlu0 %v1166_v54 }
 0x2d8   : > { %v1058_v17 = vpop.xlane.xlu0 %1057 }
 0x2d9   : > { %v1104_v29 = vmul.f32 0.0078125, %v1058_v17  ;;  %v1167_v57 = vmul.f32 %v2711_v15, %v2711_v15 }
 0x2db   : > { %v2716_v20 = vsub.f32 %v2557_v0, %v1104_v29  ;;  %1216 = vadd.xlane.f32.xlu1 %v1167_v57 }
 0x2dc   : > { %v1060_v34 = vpop.xlane.xlu1 %1059 }
 0x2dd   : > { %v1105_v30 = vmul.f32 0.0078125, %v1060_v34  ;;  %v1168_v60 = vmul.f32 %v2716_v20, %v2716_v20 }
 0x2df   : > { %v2721_v36 = vsub.f32 %v2562_v41, %v1105_v30  ;;  %1218 = vadd.xlane.f32.xlu0 %v1168_v60 }
 0x2e0   : > { %v1062_v37 = vpop.xlane.xlu0 %1061 }
 0x2e1   : > { %v1106_v31 = vmul.f32 0.0078125, %v1062_v37  ;;  %v1169_v63 = vmul.f32 %v2721_v36, %v2721_v36 }
 0x2e3   : > { %v2726_v44 = vsub.f32 %v2567_v52, %v1106_v31  ;;  %1220 = vadd.xlane.f32.xlu1 %v1169_v63 }
 0x2e4   : > { %v1064_v0 = vpop.xlane.xlu1 %1063 }
 0x2e5   : > { %v1107_v2 = vmul.f32 0.0078125, %v1064_v0  ;;  %v1170_v32 = vmul.f32 %v2726_v44, %v2726_v44 }
 0x2e7   : > { %v2731_v40 = vsub.f32 %v2572_v58, %v1107_v2  ;;  %1222 = vadd.xlane.f32.xlu0 %v1170_v32 }
 0x2e8   : > { %v1066_v41 = vpop.xlane.xlu0 %1065 }
 0x2e9   : > { %v1108_v39 = vmul.f32 0.0078125, %v1066_v41  ;;  %v1171_v33 = vmul.f32 %v2731_v40, %v2731_v40 }
 0x2eb   : > { %v2736_v50 = vsub.f32 %v2577_v1, %v1108_v39  ;;  %1224 = vadd.xlane.f32.xlu1 %v1171_v33 }
 0x2ec   : > { %v1068_v52 = vpop.xlane.xlu1 %1067 }
 0x2ed   : > { %v1109_v24 = vmul.f32 0.0078125, %v1068_v52  ;;  %v1172_v42 = vmul.f32 %v2736_v50, %v2736_v50 }
 0x2ef   : > { %v2741_v56 = vsub.f32 %v2582_v8, %v1109_v24  ;;  %1226 = vadd.xlane.f32.xlu0 %v1172_v42 }
 0x2f0   : > { %v1070_v58 = vpop.xlane.xlu0 %1069 }
 0x2f1   : > { %v1110_v25 = vmul.f32 0.0078125, %v1070_v58  ;;  %v1173_v45 = vmul.f32 %v2741_v56, %v2741_v56 }
 0x2f3   : > { %v2746_v62 = vsub.f32 %v2587_v13, %v1110_v25  ;;  %1228 = vadd.xlane.f32.xlu1 %v1173_v45 }
 0x2f4   : > { %v1072_v1 = vpop.xlane.xlu1 %1071 }
 0x2f5   : > { %v1111_v26 = vmul.f32 0.0078125, %v1072_v1  ;;  %v1174_v48 = vmul.f32 %v2746_v62, %v2746_v62 }
 0x2f7   : > { %v2751_v6 = vsub.f32 %v2592_v18, %v1111_v26  ;;  %1230 = vadd.xlane.f32.xlu0 %v1174_v48 }
 0x2f8   : > { %v1074_v8 = vpop.xlane.xlu0 %1073 }
 0x2f9   : > { %v1112_v27 = vmul.f32 0.0078125, %v1074_v8  ;;  %v1175_v51 = vmul.f32 %v2751_v6, %v2751_v6 }
 0x2fb   : > { %v2756_v11 = vsub.f32 %v2597_v35, %v1112_v27  ;;  %1232 = vadd.xlane.f32.xlu1 %v1175_v51  ;;  %v2788_v51 = vld [vmem:[%s2982_s5] ss:$0 sm:$0xff] }
 0x2fc   : > { %v1076_v13 = vpop.xlane.xlu1 %1075 }
 0x2fd   : > { %v1113_v28 = vmul.f32 0.0078125, %v1076_v13  ;;  %v1176_v54 = vmul.f32 %v2756_v11, %v2756_v11 }
 0x2ff   : > { %v2761_v17 = vsub.f32 %v2602_v38, %v1113_v28  ;;  %1234 = vadd.xlane.f32.xlu0 %v1176_v54  ;;  %v2794_v54 = vld [vmem:[%s2983_s6] ss:$0 sm:$0xff] }
 0x300   : > { %v1078_v18 = vpop.xlane.xlu0 %1077 }
 0x301   : > { %v1114_v29 = vmul.f32 0.0078125, %v1078_v18  ;;  %v1177_v57 = vmul.f32 %v2761_v17, %v2761_v17 }
 0x303   : > { %v2766_v34 = vsub.f32 %v2607_v46, %v1114_v29  ;;  %1236 = vadd.xlane.f32.xlu1 %v1177_v57 }
 0x304   : > { %v1080_v35 = vpop.xlane.xlu1 %1079 }
 0x305   : > { %v1115_v30 = vmul.f32 0.0078125, %v1080_v35  ;;  %v1178_v60 = vmul.f32 %v2766_v34, %v2766_v34 }
 0x307   : > { %v2771_v37 = vsub.f32 %v2612_v49, %v1115_v30  ;;  %1238 = vadd.xlane.f32.xlu0 %v1178_v60 }
 0x308   : > { %v1082_v38 = vpop.xlane.xlu0 %1081 }
 0x309   : > { %v1116_v31 = vmul.f32 0.0078125, %v1082_v38  ;;  %v1179_v63 = vmul.f32 %v2771_v37, %v2771_v37 }
 0x30b   : > { %v2776_v0 = vsub.f32 %v2617_v55, %v1116_v31  ;;  %1240 = vadd.xlane.f32.xlu1 %v1179_v63 }
 0x30c   : > { %v1084_v46 = vpop.xlane.xlu1 %1083 }
 0x30d   : > { %v1117_v2 = vmul.f32 0.0078125, %v1084_v46  ;;  %v1180_v32 = vmul.f32 %v2776_v0, %v2776_v0 }
 0x30f   : > { %v2781_v41 = vsub.f32 %v2622_v61, %v1117_v2  ;;  %1242 = vadd.xlane.f32.xlu0 %v1180_v32 }
 0x311   : > { %v1181_v49 = vmul.f32 %v2781_v41, %v2781_v41 }
 0x313   : > { %1244 = vadd.xlane.f32.xlu1 %v1181_v49 }
 0x320   : > { %v1183_v39 = vpop.xlane.xlu0 %1182 }
 0x321   : > { %v1246_v33 = vmul.f32 0.0078125, %v1183_v39 }
 0x323   : > { %v1278_v52 = vadd.f32 1e-05, %v1246_v33 }
 0x324   : > { %v1185_v24 = vpop.xlane.xlu1 %1184 }
 0x325   : > { %1751 = vrsqrt.f32 %v1278_v52  ;;  %v1247_v55 = vmul.f32 0.0078125, %v1185_v24 }
 0x327   : > { %v1279_v42 = vadd.f32 1e-05, %v1247_v55 }
 0x328   : > { %v1187_v58 = vpop.xlane.xlu0 %1186 }
 0x329   : > { %1753 = vrsqrt.f32 %v1279_v42  ;;  %v1248_v25 = vmul.f32 0.0078125, %v1187_v58 }
 0x32b   : > { %v1280_v45 = vadd.f32 1e-05, %v1248_v25 }
 0x32c   : > { %v1189_v1 = vpop.xlane.xlu1 %1188 }
 0x32d   : > { %1755 = vrsqrt.f32 %v1280_v45  ;;  %v1249_v61 = vmul.f32 0.0078125, %v1189_v1 }
 0x32f   : > { %v1281_v26 = vadd.f32 1e-05, %v1249_v61 }
 0x330   : > { %v1191_v48 = vpop.xlane.xlu0 %1190 }
 0x331   : > { %1757 = vrsqrt.f32 %v1281_v26  ;;  %v1250_v8 = vmul.f32 0.0078125, %v1191_v48 }
 0x332   : > { %v1752_v27 = vpop.eup %1751 }
 0x333   : > { %v1342_v13 = vmul.f32 %v1752_v27, %v2626_v22  ;;  %v1282_v28 = vadd.f32 1e-05, %v1250_v8 }
 0x334   : > { %v1193_v18 = vpop.xlane.xlu1 %1192 }
 0x335   : > { %v1381_v29 = vmul.f32 %v2788_v51, %v1342_v13  ;;  %1759 = vrsqrt.f32 %v1282_v28  ;;  %v1251_v57 = vmul.f32 0.0078125, %v1193_v18 }
 0x336   : > { %v1754_v35 = vpop.eup %1753 }
 0x337   : > { %v1420_v30 = vadd.f32 %v2794_v54, %v1381_v29  ;;  %v1343_v60 = vmul.f32 %v1754_v35, %v2631_v43  ;;  %v1283_v38 = vadd.f32 1e-05, %v1251_v57 }
 0x338   : > { %v1195_v31 = vpop.xlane.xlu0 %1194 }
 0x339   : > { %1452 = vst [vmem:[%s2801_s14] sm:$0xff] %v1420_v30  ;;  %v1382_v22 = vmul.f32 %v2788_v51, %v1343_v60  ;;  %1761 = vrsqrt.f32 %v1283_v38  ;;  %v1252_v63 = vmul.f32 0.0078125, %v1195_v31 }
 0x33a   : > { %v1756_v46 = vpop.eup %1755 }
 0x33b   : > { %v1421_v2 = vadd.f32 %v2794_v54, %v1382_v22  ;;  %v1344_v32 = vmul.f32 %v1756_v46, %v2636_v5  ;;  %v1284_v49 = vadd.f32 1e-05, %v1252_v63 }
 0x33c   : > { %v1197_v43 = vpop.xlane.xlu1 %1196 }
 0x33d   : > { %1453 = vst [vmem:[%s2801_s14 + $0x8] sm:$0xff] %v1421_v2  ;;  %v1383_v39 = vmul.f32 %v2788_v51, %v1344_v32  ;;  %1763 = vrsqrt.f32 %v1284_v49  ;;  %v1253_v33 = vmul.f32 0.0078125, %v1197_v43 }
 0x33e   : > { %v1758_v52 = vpop.eup %1757 }
 0x33f   : > { %v1422_v24 = vadd.f32 %v2794_v54, %v1383_v39  ;;  %v1345_v55 = vmul.f32 %v1758_v52, %v2641_v7  ;;  %v1285_v42 = vadd.f32 1e-05, %v1253_v33 }
 0x340   : > { %v1199_v58 = vpop.xlane.xlu0 %1198 }
 0x341   : > { %1454 = vst [vmem:[%s2801_s14 + $0x10] sm:$0xff] %v1422_v24  ;;  %v1384_v25 = vmul.f32 %v2788_v51, %v1345_v55  ;;  %1765 = vrsqrt.f32 %v1285_v42  ;;  %v1254_v5 = vmul.f32 0.0078125, %v1199_v58 }
 0x342   : > { %v1760_v45 = vpop.eup %1759 }
 0x343   : > { %v1423_v1 = vadd.f32 %v2794_v54, %v1384_v25  ;;  %v1346_v61 = vmul.f32 %v1760_v45, %v2646_v10  ;;  %v1286_v26 = vadd.f32 1e-05, %v1254_v5 }
 0x344   : > { %v1201_v48 = vpop.xlane.xlu1 %1200 }
 0x345   : > { %1455 = vst [vmem:[%s2801_s14 + $0x18] sm:$0xff] %v1423_v1  ;;  %v1385_v8 = vmul.f32 %v2788_v51, %v1346_v61  ;;  %1767 = vrsqrt.f32 %v1286_v26  ;;  %v1255_v7 = vmul.f32 0.0078125, %v1201_v48 }
 0x346   : > { %v1762_v27 = vpop.eup %1761 }
 0x347   : > { %v1424_v13 = vadd.f32 %v2794_v54, %v1385_v8  ;;  %v1347_v28 = vmul.f32 %v1762_v27, %v2651_v12  ;;  %v1287_v18 = vadd.f32 1e-05, %v1255_v7 }
 0x348   : > { %v1203_v29 = vpop.xlane.xlu0 %1202 }
 0x349   : > { %1456 = vst [vmem:[%s2801_s14 + $0x20] sm:$0xff] %v1424_v13  ;;  %v1386_v57 = vmul.f32 %v2788_v51, %v1347_v28  ;;  %1769 = vrsqrt.f32 %v1287_v18  ;;  %v1256_v10 = vmul.f32 0.0078125, %v1203_v29 }
 0x34a   : > { %v1764_v35 = vpop.eup %1763 }
 0x34b   : > { %v1425_v30 = vadd.f32 %v2794_v54, %v1386_v57  ;;  %v1348_v60 = vmul.f32 %v1764_v35, %v2656_v14  ;;  %v1288_v38 = vadd.f32 1e-05, %v1256_v10 }
 0x34c   : > { %v1205_v31 = vpop.xlane.xlu1 %1204 }
 0x34d   : > { %1457 = vst [vmem:[%s2801_s14 + $0x28] sm:$0xff] %v1425_v30  ;;  %v1387_v22 = vmul.f32 %v2788_v51, %v1348_v60  ;;  %1771 = vrsqrt.f32 %v1288_v38  ;;  %v1257_v12 = vmul.f32 0.0078125, %v1205_v31 }
 0x34e   : > { %v1766_v63 = vpop.eup %1765 }
 0x34f   : > { %v1426_v46 = vadd.f32 %v2794_v54, %v1387_v22  ;;  %v1349_v2 = vmul.f32 %v1766_v63, %v2661_v16  ;;  %v1289_v32 = vadd.f32 1e-05, %v1257_v12 }
 0x350   : > { %v1207_v49 = vpop.xlane.xlu0 %1206 }
 0x351   : > { %1458 = vst [vmem:[%s2801_s14 + $0x30] sm:$0xff] %v1426_v46  ;;  %v1388_v43 = vmul.f32 %v2788_v51, %v1349_v2  ;;  %1773 = vrsqrt.f32 %v1289_v32  ;;  %v1258_v14 = vmul.f32 0.0078125, %v1207_v49 }
 0x352   : > { %v1768_v39 = vpop.eup %1767 }
 0x353   : > { %v1427_v33 = vadd.f32 %v2794_v54, %v1388_v43  ;;  %v1350_v52 = vmul.f32 %v1768_v39, %v2666_v19  ;;  %v1290_v24 = vadd.f32 1e-05, %v1258_v14 }
 0x354   : > { %v1209_v55 = vpop.xlane.xlu1 %1208 }
 0x355   : > { %1459 = vst [vmem:[%s2801_s14 + $0x38] sm:$0xff] %v1427_v33  ;;  %v1389_v42 = vmul.f32 %v2788_v51, %v1350_v52  ;;  %1775 = vrsqrt.f32 %v1290_v24  ;;  %v1259_v16 = vmul.f32 0.0078125, %v1209_v55 }
 0x356   : > { %v1770_v58 = vpop.eup %1769 }
 0x357   : > { %v1428_v25 = vadd.f32 %v2794_v54, %v1389_v42  ;;  %v1351_v5 = vmul.f32 %v1770_v58, %v2671_v21  ;;  %v1291_v45 = vadd.f32 1e-05, %v1259_v16 }
 0x358   : > { %v1211_v1 = vpop.xlane.xlu0 %1210 }
 0x359   : > { %1460 = vst [vmem:[%s2801_s14 + $0x40] sm:$0xff] %v1428_v25  ;;  %v1390_v61 = vmul.f32 %v2788_v51, %v1351_v5  ;;  %1777 = vrsqrt.f32 %v1291_v45  ;;  %v1260_v19 = vmul.f32 0.0078125, %v1211_v1 }
 0x35a   : > { %v1772_v26 = vpop.eup %1771 }
 0x35b   : > { %v1429_v48 = vadd.f32 %v2794_v54, %v1390_v61  ;;  %v1352_v8 = vmul.f32 %v1772_v26, %v2676_v4  ;;  %v1292_v7 = vadd.f32 1e-05, %v1260_v19 }
 0x35c   : > { %v1213_v27 = vpop.xlane.xlu1 %1212 }
 0x35d   : > { %1461 = vst [vmem:[%s2801_s14 + $0x48] sm:$0xff] %v1429_v48  ;;  %v1391_v13 = vmul.f32 %v2788_v51, %v1352_v8  ;;  %1779 = vrsqrt.f32 %v1292_v7  ;;  %v1261_v21 = vmul.f32 0.0078125, %v1213_v27 }
 0x35e   : > { %v1774_v28 = vpop.eup %1773 }
 0x35f   : > { %v1430_v18 = vadd.f32 %v2794_v54, %v1391_v13  ;;  %v1353_v29 = vmul.f32 %v1774_v28, %v2681_v23  ;;  %v1293_v57 = vadd.f32 1e-05, %v1261_v21 }
 0x360   : > { %v1215_v10 = vpop.xlane.xlu0 %1214 }
 0x361   : > { %1462 = vst [vmem:[%s2801_s14 + $0x50] sm:$0xff] %v1430_v18  ;;  %v1392_v35 = vmul.f32 %v2788_v51, %v1353_v29  ;;  %1781 = vrsqrt.f32 %v1293_v57  ;;  %v1262_v4 = vmul.f32 0.0078125, %v1215_v10 }
 0x362   : > { %v1776_v30 = vpop.eup %1775 }
 0x363   : > { %v1431_v60 = vadd.f32 %v2794_v54, %v1392_v35  ;;  %v1354_v38 = vmul.f32 %v1776_v30, %v2686_v47  ;;  %v1294_v31 = vadd.f32 1e-05, %v1262_v4 }
 0x364   : > { %v1217_v22 = vpop.xlane.xlu1 %1216 }
 0x365   : > { %1463 = vst [vmem:[%s2801_s14 + $0x58] sm:$0xff] %v1431_v60  ;;  %v1393_v12 = vmul.f32 %v2788_v51, %v1354_v38  ;;  %1783 = vrsqrt.f32 %v1294_v31  ;;  %v1263_v23 = vmul.f32 0.0078125, %v1217_v22 }
 0x366   : > { %v1778_v63 = vpop.eup %1777 }
 0x367   : > { %v1432_v46 = vadd.f32 %v2794_v54, %v1393_v12  ;;  %v1355_v2 = vmul.f32 %v1778_v63, %v2691_v53  ;;  %v1295_v32 = vadd.f32 1e-05, %v1263_v23 }
 0x368   : > { %v1219_v49 = vpop.xlane.xlu0 %1218 }
 0x369   : > { %1464 = vst [vmem:[%s2801_s14 + $0x60] sm:$0xff] %v1432_v46  ;;  %v1394_v43 = vmul.f32 %v2788_v51, %v1355_v2  ;;  %1785 = vrsqrt.f32 %v1295_v32  ;;  %v1264_v47 = vmul.f32 0.0078125, %v1219_v49 }
 0x36a   : > { %v1780_v14 = vpop.eup %1779 }
 0x36b   : > { %v1433_v39 = vadd.f32 %v2794_v54, %v1394_v43  ;;  %v1356_v33 = vmul.f32 %v1780_v14, %v2696_v59  ;;  %v1296_v52 = vadd.f32 1e-05, %v1264_v47 }
 0x36c   : > { %v1221_v24 = vpop.xlane.xlu1 %1220 }
 0x36d   : > { %1465 = vst [vmem:[%s2801_s14 + $0x68] sm:$0xff] %v1433_v39  ;;  %v1395_v55 = vmul.f32 %v2788_v51, %v1356_v33  ;;  %1787 = vrsqrt.f32 %v1296_v52  ;;  %v1265_v53 = vmul.f32 0.0078125, %v1221_v24 }
 0x36e   : > { %v1782_v42 = vpop.eup %1781 }
 0x36f   : > { %v1434_v16 = vadd.f32 %v2794_v54, %v1395_v55  ;;  %v1357_v58 = vmul.f32 %v1782_v42, %v2701_v3  ;;  %v1297_v25 = vadd.f32 1e-05, %v1265_v53 }
 0x370   : > { %v1223_v5 = vpop.xlane.xlu0 %1222 }
 0x371   : > { %1466 = vst [vmem:[%s2801_s14 + $0x70] sm:$0xff] %v1434_v16  ;;  %v1396_v45 = vmul.f32 %v2788_v51, %v1357_v58  ;;  %1789 = vrsqrt.f32 %v1297_v25  ;;  %v1266_v59 = vmul.f32 0.0078125, %v1223_v5 }
 0x372   : > { %v1784_v1 = vpop.eup %1783 }
 0x373   : > { %v1435_v61 = vadd.f32 %v2794_v54, %v1396_v45  ;;  %v1358_v19 = vmul.f32 %v1784_v1, %v2706_v9  ;;  %v1298_v26 = vadd.f32 1e-05, %v1266_v59 }
 0x374   : > { %v1225_v48 = vpop.xlane.xlu1 %1224 }
 0x375   : > { %1467 = vst [vmem:[%s2801_s14 + $0x78] sm:$0xff] %v1435_v61  ;;  %v1397_v8 = vmul.f32 %v2788_v51, %v1358_v19  ;;  %1791 = vrsqrt.f32 %v1298_v26  ;;  %v1267_v3 = vmul.f32 0.0078125, %v1225_v48 }
 0x376   : > { %v1786_v7 = vpop.eup %1785 }
 0x377   : > { %v1436_v27 = vadd.f32 %v2794_v54, %v1397_v8  ;;  %v1359_v13 = vmul.f32 %v1786_v7, %v2711_v15  ;;  %v1299_v21 = vadd.f32 1e-05, %v1267_v3 }
 0x378   : > { %v1227_v28 = vpop.xlane.xlu0 %1226 }
 0x379   : > { %1468 = vst [vmem:[%s2801_s14 + $0x80] sm:$0xff] %v1436_v27  ;;  %v1398_v18 = vmul.f32 %v2788_v51, %v1359_v13  ;;  %1793 = vrsqrt.f32 %v1299_v21  ;;  %v1268_v9 = vmul.f32 0.0078125, %v1227_v28 }
 0x37a   : > { %v1788_v29 = vpop.eup %1787 }
 0x37b   : > { %v1437_v57 = vadd.f32 %v2794_v54, %v1398_v18  ;;  %v1360_v10 = vmul.f32 %v1788_v29, %v2716_v20  ;;  %v1300_v35 = vadd.f32 1e-05, %v1268_v9 }
 0x37c   : > { %v1229_v4 = vpop.xlane.xlu1 %1228 }
 0x37d   : > { %1469 = vst [vmem:[%s2801_s14 + $0x88] sm:$0xff] %v1437_v57  ;;  %v1399_v30 = vmul.f32 %v2788_v51, %v1360_v10  ;;  %1795 = vrsqrt.f32 %v1300_v35  ;;  %v1269_v15 = vmul.f32 0.0078125, %v1229_v4 }
 0x37e   : > { %v1790_v60 = vpop.eup %1789 }
 0x37f   : > { %v1438_v38 = vadd.f32 %v2794_v54, %v1399_v30  ;;  %v1361_v31 = vmul.f32 %v1790_v60, %v2721_v36  ;;  %v1301_v22 = vadd.f32 1e-05, %v1269_v15 }
 0x380   : > { %v1231_v12 = vpop.xlane.xlu0 %1230 }
 0x381   : > { %1470 = vst [vmem:[%s2801_s14 + $0x90] sm:$0xff] %v1438_v38  ;;  %v1400_v23 = vmul.f32 %v2788_v51, %v1361_v31  ;;  %1797 = vrsqrt.f32 %v1301_v22  ;;  %v1270_v20 = vmul.f32 0.0078125, %v1231_v12 }
 0x382   : > { %v1792_v63 = vpop.eup %1791 }
 0x383   : > { %v1439_v46 = vadd.f32 %v2794_v54, %v1400_v23  ;;  %v1362_v2 = vmul.f32 %v1792_v63, %v2726_v44  ;;  %v1302_v32 = vadd.f32 1e-05, %v1270_v20 }
 0x384   : > { %v1233_v49 = vpop.xlane.xlu1 %1232 }
 0x385   : > { %1471 = vst [vmem:[%s2801_s14 + $0x98] sm:$0xff] %v1439_v46  ;;  %v1401_v43 = vmul.f32 %v2788_v51, %v1362_v2  ;;  %1799 = vrsqrt.f32 %v1302_v32  ;;  %v1271_v36 = vmul.f32 0.0078125, %v1233_v49 }
 0x386   : > { %v1794_v47 = vpop.eup %1793 }
 0x387   : > { %v1440_v14 = vadd.f32 %v2794_v54, %v1401_v43  ;;  %v1363_v39 = vmul.f32 %v1794_v47, %v2731_v40  ;;  %v1303_v33 = vadd.f32 1e-05, %v1271_v36 }
 0x388   : > { %v1235_v52 = vpop.xlane.xlu0 %1234 }
 0x389   : > { %1472 = vst [vmem:[%s2801_s14 + $0xa0] sm:$0xff] %v1440_v14  ;;  %v1402_v24 = vmul.f32 %v2788_v51, %v1363_v39  ;;  %1801 = vrsqrt.f32 %v1303_v33  ;;  %v1272_v44 = vmul.f32 0.0078125, %v1235_v52 }
 0x38a   : > { %v1796_v55 = vpop.eup %1795 }
 0x38b   : > { %v1441_v53 = vadd.f32 %v2794_v54, %v1402_v24  ;;  %v1364_v42 = vmul.f32 %v1796_v55, %v2736_v50  ;;  %v1304_v16 = vadd.f32 1e-05, %v1272_v44 }
 0x38c   : > { %v1237_v58 = vpop.xlane.xlu1 %1236 }
 0x38d   : > { %1473 = vst [vmem:[%s2801_s14 + $0xa8] sm:$0xff] %v1441_v53  ;;  %v1403_v25 = vmul.f32 %v2788_v51, %v1364_v42  ;;  %1803 = vrsqrt.f32 %v1304_v16  ;;  %v1273_v40 = vmul.f32 0.0078125, %v1237_v58 }
 0x38e   : > { %v1798_v5 = vpop.eup %1797 }
 0x38f   : > { %v1442_v45 = vadd.f32 %v2794_v54, %v1403_v25  ;;  %v1365_v59 = vmul.f32 %v1798_v5, %v2741_v56  ;;  %v1305_v1 = vadd.f32 1e-05, %v1273_v40 }
 0x390   : > { %v1239_v61 = vpop.xlane.xlu0 %1238 }
 0x391   : > { %1474 = vst [vmem:[%s2801_s14 + $0xb0] sm:$0xff] %v1442_v45  ;;  %v1404_v19 = vmul.f32 %v2788_v51, %v1365_v59  ;;  %1805 = vrsqrt.f32 %v1305_v1  ;;  %v1274_v50 = vmul.f32 0.0078125, %v1239_v61 }
 0x392   : > { %v1800_v26 = vpop.eup %1799 }
 0x393   : > { %v1443_v48 = vadd.f32 %v2794_v54, %v1404_v19  ;;  %v1366_v8 = vmul.f32 %v1800_v26, %v2746_v62  ;;  %v1306_v3 = vadd.f32 1e-05, %v1274_v50 }
 0x394   : > { %v1241_v7 = vpop.xlane.xlu1 %1240 }
 0x395   : > { %1475 = vst [vmem:[%s2801_s14 + $0xb8] sm:$0xff] %v1443_v48  ;;  %v1405_v27 = vmul.f32 %v2788_v51, %v1366_v8  ;;  %1807 = vrsqrt.f32 %v1306_v3  ;;  %v1275_v56 = vmul.f32 0.0078125, %v1241_v7 }
 0x396   : > { %v1802_v13 = vpop.eup %1801 }
 0x397   : > { %v1444_v21 = vadd.f32 %v2794_v54, %v1405_v27  ;;  %v1367_v28 = vmul.f32 %v1802_v13, %v2751_v6  ;;  %v1307_v18 = vadd.f32 1e-05, %v1275_v56 }
 0x398   : > { %v1243_v9 = vpop.xlane.xlu0 %1242 }
 0x399   : > { %1476 = vst [vmem:[%s2801_s14 + $0xc0] sm:$0xff] %v1444_v21  ;;  %v1406_v29 = vmul.f32 %v2788_v51, %v1367_v28  ;;  %1809 = vrsqrt.f32 %v1307_v18  ;;  %v1276_v62 = vmul.f32 0.0078125, %v1243_v9 }
 0x39a   : > { %v1804_v57 = vpop.eup %1803 }
 0x39b   : > { %v1445_v10 = vadd.f32 %v2794_v54, %v1406_v29  ;;  %v1368_v35 = vmul.f32 %v1804_v57, %v2756_v11  ;;  %v1308_v4 = vadd.f32 1e-05, %v1276_v62 }
 0x39c   : > { %v1245_v30 = vpop.xlane.xlu1 %1244 }
 0x39d   : > { %1477 = vst [vmem:[%s2801_s14 + $0xc8] sm:$0xff] %v1445_v10  ;;  %v1407_v15 = vmul.f32 %v2788_v51, %v1368_v35  ;;  %1811 = vrsqrt.f32 %v1308_v4  ;;  %v1277_v6 = vmul.f32 0.0078125, %v1245_v30 }
 0x39e   : > { %v1806_v60 = vpop.eup %1805 }
 0x39f   : > { %v1446_v38 = vadd.f32 %v2794_v54, %v1407_v15  ;;  %v1369_v31 = vmul.f32 %v1806_v60, %v2761_v17  ;;  %v1309_v22 = vadd.f32 1e-05, %v1277_v6 }
 0x3a1   : > { %1478 = vst [vmem:[%s2801_s14 + $0xd0] sm:$0xff] %v1446_v38  ;;  %v1408_v12 = vmul.f32 %v2788_v51, %v1369_v31  ;;  %1813 = vrsqrt.f32 %v1309_v22 }
 0x3a2   : > { %v1808_v11 = vpop.eup %1807 }
 0x3a3   : > { %v1447_v23 = vadd.f32 %v2794_v54, %v1408_v12  ;;  %v1370_v20 = vmul.f32 %v1808_v11, %v2766_v34 }
 0x3a5   : > { %1479 = vst [vmem:[%s2801_s14 + $0xd8] sm:$0xff] %v1447_v23  ;;  %v1409_v63 = vmul.f32 %v2788_v51, %v1370_v20 }
 0x3a6   : > { %v1810_v46 = vpop.eup %1809 }
 0x3a7   : > { %v1448_v17 = vadd.f32 %v2794_v54, %v1409_v63  ;;  %v1371_v2 = vmul.f32 %v1810_v46, %v2771_v37 }
 0x3a9   : > { %1480 = vst [vmem:[%s2801_s14 + $0xe0] sm:$0xff] %v1448_v17  ;;  %v1410_v32 = vmul.f32 %v2788_v51, %v1371_v2 }
 0x3aa   : > { %v1812_v49 = vpop.eup %1811 }
 0x3ab   : > { %v1449_v43 = vadd.f32 %v2794_v54, %v1410_v32  ;;  %v1372_v34 = vmul.f32 %v1812_v49, %v2776_v0 }
 0x3ad   : > { %1481 = vst [vmem:[%s2801_s14 + $0xe8] sm:$0xff] %v1449_v43  ;;  %v1411_v36 = vmul.f32 %v2788_v51, %v1372_v34 }
 0x3ae   : > { %v1814_v47 = vpop.eup %1813 }
 0x3af   : > { %v1450_v14 = vadd.f32 %v2794_v54, %v1411_v36  ;;  %v1373_v39 = vmul.f32 %v1814_v47, %v2781_v41 }
 0x3b1   : > { %1482 = vst [vmem:[%s2801_s14 + $0xf0] sm:$0xff] %v1450_v14  ;;  %v1412_v37 = vmul.f32 %v2788_v51, %v1373_v39 }
 0x3b3   : > { %v1451_v0 = vadd.f32 %v2794_v54, %v1412_v37 }
 0x3b5   : > { %1483 = vst [vmem:[%s2801_s14 + $0xf8] sm:$0xff] %v1451_v0 }
 0x3b6   : > { %1910 = shalt.err (!%p1907_p9)
}
 0x3b7   : > { %s1911_s13 = scalar_lea.hbm %s2930_s11, 4096  ;;  %s1915_s16 = scalar_lea.hbm %s2984_s7, 8192 }
 0x3b8   : > { %p1912_p13 = scmp.ne.s32.totalorder %s2930_s11, %s1911_s13  ;;  %p1916_p4 = scmp.lt.s32.totalorder %s2930_s11, %s2984_s7 }
 0x3b9   : > { %p1917_p8 = scmp.lt.s32.totalorder %s1915_s16, %s1911_s13 }
 0x3ba   : > { %p1913_p5 = pnand %p1912_p13, %p3006_p10 }
 0x3bb   : > { %p1918_p7 = por %p1917_p8, %p1916_p4 }
 0x3bc   : > { %p1914_p0 = pneg %p1913_p5 }
 0x3be   : > { %p1919_p11 = pnand %p1918_p7, %p1914_p0 }
 0x3c0   : > { %1922 = shalt.err (!%p1919_p11)
}
 0x3c1   : > { %s1976_s1 = smov 128   ;;  %s1977_s17 = smov 8  }
 0x3c2   : > { %1687 = dma.vmem_to_hbm [thread:$0]  (%p3006_p10), %s2932_s18, 4096, %s2930_s11, %s1485_s30, %s1976_s1, %s1976_s1, %s1977_s17  }
 0x3c3 PF: > { %s1513_s9 = sand.u32 1, %s1953_s24   ;;  %p3007_p1 = scmp.ne.s32.totalorder %s2993_s8, 0 }
 0x3c4   : > { %p3008_p2 = scmp.ge.s32.totalorder %s1965_s27, 2  ;;  %s1514_s28 = scalar_lea.sflag [#allocation4], %s1513_s9 }
 0x3c6   : > { %p1701_p6 = pnand %p3008_p2, %p3007_p1 }
 0x3c8   : > { %p1702_p12 = pneg %p1701_p6 }
 0x3ca   : > { %1948 = dma.done.wait (%p1702_p12), %s1514_s28, 4096  }
 0x3cb   : > { %1950 = vsyncadd (%p1702_p12), %s1514_s28, 4294963200  ;;  %p21_p3 = scmp.ge.s32.totalorder %s2093_s10, 4   ;;  %s3009_s24 = smov %s1957_s25 }
 0x3cc   : > { %s3010_s25 = smov %s1961_s26  ;;  %s3011_s26 = smov %s2102_s15 }
 0x3cd   : > { %s3012_s27 = smov %s2093_s10  ;;  %23 = sbr.rel (!%p21_p3) target bundleno = 8 (0x8), region = 101 }
 0x3d2   :  { %1519 = vsyncpa [#allocation3], 1 }
 0x3d3   :  { %1521 = vsyncpa [#allocation3 + $0x1], 1 }
 0x3d4   :  { %1522 = vsyncpa [#allocation6], 1 }
 0x3d5   :  { %1523 = vsyncpa [#allocation4], 1 }
 0x3d6   :  { %1525 = vsyncpa [#allocation4 + $0x1], 1 }

</bundles_post_ra>
